<compile_context>
chip_gen: v7x
topology: tpu7x:2x2x1
jax: 0.10.0
libtpu: 0.0.40
codegen_flags: <defaults>
</compile_context>

<pallas_src>
import functools

import jax
import jax.numpy as jnp
from jax import lax
from jax.experimental import pallas as pl
from jax.experimental.pallas import tpu as pltpu


# ----------------------------------------------------------------------------
# In-kernel helpers
# ----------------------------------------------------------------------------
def _qp_neg_logsoftmax_cols(q, g, h, p_cols):
    """Exact single-inequality QP solve + log_softmax + negation, column-wise.

    q      : 9 SMEM scalars, row-major symmetric PD 3x3 Q
    g      : 3 SMEM scalars (the single inequality row); h: SMEM scalar
    p_cols : three (B, 1) f32 columns of the QP linear term (P^T)
    returns: three (B, 1) columns of  -log_softmax(z, dim=1)
    """
    a, b, c, _, d, e, _, _, f = q      # symmetric: Q10=b, Q20=c, Q21=e
    # adjugate / cofactors of the symmetric 3x3 — pure scalar-ALU work
    A00 = d * f - e * e
    A01 = c * e - b * f
    A02 = b * e - c * d
    A11 = a * f - c * c
    A12 = b * c - a * e
    A22 = a * d - b * b
    det = a * A00 + b * A01 + c * A02          # > 0 (Q is PD)
    inv_det = 1.0 / det
    qi = ((A00 * inv_det, A01 * inv_det, A02 * inv_det),
          (A01 * inv_det, A11 * inv_det, A12 * inv_det),
          (A02 * inv_det, A12 * inv_det, A22 * inv_det))

    g0, g1, g2 = g
    # qig_j = (G Q^{-1})_j ; denom = G Q^{-1} G^T  (guarded only for G ~ 0,
    # which the reference solver would also treat as degenerate)
    qig = tuple(g0 * qi[0][j] + g1 * qi[1][j] + g2 * qi[2][j] for j in range(3))
    denom = qig[0] * g0 + qig[1] * g1 + qig[2] * g2
    inv_denom = 1.0 / jnp.maximum(denom, 1e-20)

    p0, p1, p2 = p_cols
    # unconstrained minimizer columns  z_unc[:, j] = -(P Q^{-1})[:, j]
    z_unc = [-(p0 * qi[0][j] + p1 * qi[1][j] + p2 * qi[2][j]) for j in range(3)]
    # constraint violation and active multiplier
    s = g0 * z_unc[0] + g1 * z_unc[1] + g2 * z_unc[2] - h          # (B, 1)
    lam = jnp.maximum(s, 0.0) * inv_denom
    z = [z_unc[j] - lam * qig[j] for j in range(3)]                # QP solution

    # F.log_softmax over the 3 classes — elementwise across the 3 columns
    zmax = jnp.maximum(jnp.maximum(z[0], z[1]), z[2])
    lse = jnp.log(jnp.exp(z[0] - zmax) + jnp.exp(z[1] - zmax)
                  + jnp.exp(z[2] - zmax)) + zmax
    return [lse - z[j] for j in range(3)]                          # -log_softmax


def _branch_block(q_ref, g_ref, h_ref, pp_ref, p_ref, *, nbatch, nsize,
                  lane_ids, sub_iota):
    """One OptNet branch: QP solve -> -log_softmax -> /max -> pixel scatter."""
    n_pix = nsize * nsize

    # Rebuild the three (B, 1) columns of P^T from SMEM scalars: a few trivial
    # VPU selects per column instead of any host / XLU transpose.
    p_cols = []
    for j in range(3):
        col = jnp.zeros((nbatch, 1), jnp.float32)
        for b in range(nbatch):
            col = jnp.where(sub_iota == b, p_ref[j, b], col)
        p_cols.append(col)

    q = tuple(q_ref[i // 3, i % 3] for i in range(9))
    g = (g_ref[0, 0], g_ref[0, 1], g_ref[0, 2])
    out_cols = _qp_neg_logsoftmax_cols(q, g, h_ref[0], p_cols)

    # process_opt: output /= max(output)   (exact divide, per review)
    mx = jnp.max(jnp.maximum(jnp.maximum(out_cols[0], out_cols[1]),
                             out_cols[2]), keepdims=True)           # (1, 1)
    out_cols = [o / mx for o in out_cols]

    # modify_output: class column k -> pixel column (x-1)*nsize + (y-1)
    # (sequential selects: duplicate pixel coords keep the last, like torch)
    block = jnp.zeros((nbatch, n_pix), jnp.float32)
    for k in range(3):
        col_idx = (pp_ref[k, 0] - 1) * nsize + (pp_ref[k, 1] - 1)
        block = jnp.where(lane_ids == col_idx, out_cols[k], block)
    return block


# ----------------------------------------------------------------------------
# Fused kernel: 2x (QP + log_softmax + normalize + scatter) -> k-means (k=2)
# ----------------------------------------------------------------------------
def ensemble_kernel(q1_ref, g1_ref, h1_ref, pp1_ref, p1_ref,
                    q2_ref, g2_ref, h2_ref, pp2_ref, p2_ref,
                    out_ref, assign_ref, *, nsize, kmeans_iters):
    n_pix = nsize * nsize
    nbatch = p1_ref.shape[1]
    lane_ids = lax.broadcasted_iota(jnp.int32, (nbatch, n_pix), 1)
    sub_iota = lax.broadcasted_iota(jnp.int32, (nbatch, 1), 0)

    block0 = _branch_block(q1_ref, g1_ref, h1_ref, pp1_ref, p1_ref,
                           nbatch=nbatch, nsize=nsize,
                           lane_ids=lane_ids, sub_iota=sub_iota)
    block1 = _branch_block(q2_ref, g2_ref, h2_ref, pp2_ref, p2_ref,
                           nbatch=nbatch, nsize=nsize,
                           lane_ids=lane_ids, sub_iota=sub_iota)
    # Per-branch aligned stores (no sublane-misaligned concat).
    out_ref[0] = block0
    out_ref[1] = block1

    # ---------------- k-means, k = 2 (Lloyd), points = pixel columns ---------
    # Deterministic init: pixel columns 0 and n_pix//2.  Centroids are kept as
    # a pair of (B, 1) halves (one per branch block) — no concatenated slab.
    idx = n_pix // 2
    c0a, c0b = block0[:, 0:1], block1[:, 0:1]
    c1a, c1b = block0[:, idx:idx + 1], block1[:, idx:idx + 1]

    # Hoisted for the complement trick.
    row_tot0 = jnp.sum(block0, axis=1, keepdims=True)               # (B, 1)
    row_tot1 = jnp.sum(block1, axis=1, keepdims=True)
    n_total = float(n_pix)
    w1_init = jnp.zeros((1, n_pix), jnp.float32)

    def body(_, carry):
        c0a, c0b, c1a, c1b, _ = carry
        d_a = c0a - c1a
        d_b = c0b - c1b
        # d1 < d0  <=>  x.(c0 - c1) < 0.5 * (|c0|^2 - |c1|^2)
        thresh = 0.5 * (jnp.sum(d_a * (c0a + c1a), keepdims=True)
                        + jnp.sum(d_b * (c0b + c1b), keepdims=True))  # (1, 1)
        dot = (jnp.sum(block0 * d_a, axis=0, keepdims=True)
               + jnp.sum(block1 * d_b, axis=0, keepdims=True))        # (1, n_pix)
        w1 = (dot < thresh).astype(jnp.float32)                       # (1, n_pix)

        # Complement trick: reduce only cluster-1 sums, derive cluster-0.
        n1 = jnp.sum(w1, keepdims=True)                               # (1, 1)
        n0 = n_total - n1
        s1a = jnp.sum(block0 * w1, axis=1, keepdims=True)             # (B, 1)
        s1b = jnp.sum(block1 * w1, axis=1, keepdims=True)
        s0a = row_tot0 - s1a
        s0b = row_tot1 - s1b

        inv1 = pl.reciprocal(jnp.maximum(n1, 1.0), approx=True)
        inv0 = pl.reciprocal(jnp.maximum(n0, 1.0), approx=True)
        keep0 = n0 > 0.0
        keep1 = n1 > 0.0
        c0a_n = jnp.where(keep0, s0a * inv0, c0a)
        c0b_n = jnp.where(keep0, s0b * inv0, c0b)
        c1a_n = jnp.where(keep1, s1a * inv1, c1a)
        c1b_n = jnp.where(keep1, s1b * inv1, c1b)
        return c0a_n, c0b_n, c1a_n, c1b_n, w1

    # Carry the assignment mask; the final write reuses it (converged k-means
    # gives the same labels as one extra assignment with the final centroids).
    *_, w1 = lax.fori_loop(0, kmeans_iters, body,
                           (c0a, c0b, c1a, c1b, w1_init), unroll=True)
    assign_ref[...] = w1.astype(jnp.int32)                            # (1, n_pix)


# ----------------------------------------------------------------------------
# Host wrapper: one pallas_call, all operands passed raw (no stack/transpose)
# ----------------------------------------------------------------------------
@functools.partial(jax.jit, static_argnames=("nsize", "kmeans_iters"))
def _ensemble_forward_jit(Q1, p1, G1, h1, pp1, Q2, p2, G2, h2, pp2,
                          *, nsize, kmeans_iters):
    f32, i32 = jnp.float32, jnp.int32
    nbatch = p1.shape[1]
    n_pix = nsize * nsize
    smem = pl.BlockSpec(memory_space=pltpu.MemorySpace.SMEM)
    vmem = pl.BlockSpec(memory_space=pltpu.MemorySpace.VMEM)

    slab, assign = pl.pallas_call(
        functools.partial(ensemble_kernel, nsize=nsize,
                          kmeans_iters=kmeans_iters),
        out_shape=(jax.ShapeDtypeStruct((2, nbatch, n_pix), f32),
                   jax.ShapeDtypeStruct((1, n_pix), i32)),
        in_specs=[smem] * 10,
        out_specs=(vmem, vmem),
    )(Q1.astype(f32), G1.astype(f32), h1.astype(f32), pp1.astype(i32), p1.astype(f32),
      Q2.astype(f32), G2.astype(f32), h2.astype(f32), pp2.astype(i32), p2.astype(f32))

    output = slab.reshape(2 * nbatch, nsize, nsize)   # bitcast reshape (free)
    y = assign.reshape(-1)                            # (n_pix,)
    return y, output


def ensemble_forward(x, Q1, p1, G1, h1, m1, img, anno1, Pixel_pos1,
                     Q2, p2, G2, h2, m2, anno2, Pixel_pos2, kmeans_iters=10):
    # x, anno1, anno2 are unused by the reference forward pass (kept for fidelity)
    del x, anno1, anno2
    # TODO(synk): m >= 5000 path (np.random.rand placeholder output) not implemented.
    assert m1 < 5000 and m2 < 5000
    assert m1 > 1 and m2 > 1            # p arrives as (nCls, nBatch) and is transposed
    # TODO(synk): Pixel_pos=None reshape path not implemented (shape-inconsistent here).
    assert Pixel_pos1 is not None and Pixel_pos2 is not None
    nsize = int(img.shape[1])
    return _ensemble_forward_jit(Q1, p1, G1, h1, Pixel_pos1,
                                 Q2, p2, G2, h2, Pixel_pos2,
                                 nsize=nsize, kmeans_iters=kmeans_iters)


# ----------------------------------------------------------------------------
# OptNet __init__ parameters (created only for fidelity; forward never reads them)
# ----------------------------------------------------------------------------
def init_optnet_params(key, nFeatures=1, nHidden=1, nCls=3, nineq=1):
    ks = jax.random.split(key, 5)
    return {
        "fc1_w": jax.random.normal(ks[0], (nHidden, nFeatures)) * 0.1,
        "fc1_b": jnp.zeros((nHidden,)),
        "fc2_w": jax.random.normal(ks[1], (nCls, nHidden)) * 0.1,
        "fc2_b": jnp.zeros((nCls,)),
        "M": jnp.tril(jnp.ones((nCls, nCls))),
        "L": jnp.tril(jax.random.uniform(ks[2], (nCls, nCls))),
        "p": jax.random.uniform(ks[3], (1, nCls), minval=-1.0, maxval=1.0),
        "G": jax.random.uniform(ks[4], (nineq, nCls), minval=-1.0, maxval=1.0),
        "z0": jnp.zeros((nCls,)),
        "s0": jnp.ones((nineq,)),
    }


# ----------------------------------------------------------------------------
# Driver
# ----------------------------------------------------------------------------
if __name__ == "__main__":
    key = jax.random.PRNGKey(0)
    ks = jax.random.split(key, 12)

    nCls, nineq, nBatchQP = 3, 1, 10
    H = W = 10

    _opt1_params = init_optnet_params(ks[10], 1, 1, nCls, nineq)
    _opt2_params = init_optnet_params(ks[11], 1, 1, nCls, nineq)

    # QP inputs, branch 1
    A1 = jax.random.normal(ks[0], (nCls, nCls))
    Q1 = A1 @ A1.T + 0.1 * jnp.eye(nCls)                 # symmetric PD
    p1 = jax.random.uniform(ks[1], (nCls, nBatchQP), minval=-1.0, maxval=1.0)
    G1 = jax.random.uniform(ks[2], (nineq, nCls), minval=-1.0, maxval=1.0)
    h1 = jax.random.uniform(ks[3], (nineq,), minval=0.1, maxval=1.0)

    # QP inputs, branch 2
    A2 = jax.random.normal(ks[4], (nCls, nCls))
    Q2 = A2 @ A2.T + 0.1 * jnp.eye(nCls)
    p2 = jax.random.uniform(ks[5], (nCls, nBatchQP), minval=-1.0, maxval=1.0)
    G2 = jax.random.uniform(ks[6], (nineq, nCls), minval=-1.0, maxval=1.0)
    h2 = jax.random.uniform(ks[7], (nineq,), minval=0.1, maxval=1.0)

    m1 = 10
    m2 = 10

    img = jax.random.uniform(ks[8], (1, H, W), dtype=jnp.float32)
    x = jax.random.normal(ks[9], (nBatchQP, 1), dtype=jnp.float32)
    anno1 = jnp.zeros((H, W), dtype=jnp.float32)
    anno2 = jnp.zeros((H, W), dtype=jnp.float32)
    Pixel_pos1 = jnp.array([[1, 2], [3, 4], [5, 6]], dtype=jnp.int32)    # 1-based
    Pixel_pos2 = jnp.array([[2, 3], [7, 8], [9, 10]], dtype=jnp.int32)

    y, output = ensemble_forward(x, Q1, p1, G1, h1, m1, img, anno1, Pixel_pos1,
                                 Q2, p2, G2, h2, m2, anno2, Pixel_pos2)
    jax.block_until_ready((y, output))

    assert y.shape == (H * W,) and y.dtype == jnp.int32
    assert output.shape == (20, H, W) and output.dtype == jnp.float32
    assert bool(jnp.all(jnp.isfinite(output)))
    print("KERNEL_OK")
</pallas_src>

<mosaic_0001>
module attributes {stable_mosaic.version = 11 : i64} {
  func.func @ensemble_kernel(%arg0: memref<3x3xf32, #tpu.memory_space<smem>>, %arg1: memref<1x3xf32, #tpu.memory_space<smem>>, %arg2: memref<1xf32, #tpu.memory_space<smem>>, %arg3: memref<3x2xi32, #tpu.memory_space<smem>>, %arg4: memref<3x10xf32, #tpu.memory_space<smem>>, %arg5: memref<3x3xf32, #tpu.memory_space<smem>>, %arg6: memref<1x3xf32, #tpu.memory_space<smem>>, %arg7: memref<1xf32, #tpu.memory_space<smem>>, %arg8: memref<3x2xi32, #tpu.memory_space<smem>>, %arg9: memref<3x10xf32, #tpu.memory_space<smem>>, %arg10: memref<2x10x100xf32, #tpu.memory_space<vmem>>, %arg11: memref<1x100xi32, #tpu.memory_space<vmem>>) attributes {dimension_semantics = [], scalar_prefetch = 0 : i64, scratch_operands = 0 : i64, tpu.core_type = #tpu.core_type<tc>} {
    %0 = tpu.iota {dimensions = array<i32: 1>} : vector<10x100xi32>
    %1 = tpu.iota {dimensions = array<i32: 0>} : vector<10x1xi32>
    %cst = arith.constant 0.000000e+00 : f32
    %2 = vector.broadcast %cst : f32 to vector<10x1xf32>
    %c0_i32 = arith.constant 0 : i32
    %3 = vector.broadcast %c0_i32 : i32 to vector<10x1xi32>
    %4 = arith.cmpi eq, %1, %3 : vector<10x1xi32>
    %c0 = arith.constant 0 : index
    %c0_0 = arith.constant 0 : index
    %5 = memref.load %arg4[%c0, %c0_0] : memref<3x10xf32, #tpu.memory_space<smem>>
    %6 = vector.broadcast %5 : f32 to vector<10x1xf32>
    %7 = arith.select %4, %6, %2 : vector<10x1xi1>, vector<10x1xf32>
    %c1_i32 = arith.constant 1 : i32
    %8 = vector.broadcast %c1_i32 : i32 to vector<10x1xi32>
    %9 = arith.cmpi eq, %1, %8 : vector<10x1xi32>
    %c0_1 = arith.constant 0 : index
    %c1 = arith.constant 1 : index
    %10 = memref.load %arg4[%c0_1, %c1] : memref<3x10xf32, #tpu.memory_space<smem>>
    %11 = vector.broadcast %10 : f32 to vector<10x1xf32>
    %12 = arith.select %9, %11, %7 : vector<10x1xi1>, vector<10x1xf32>
    %c2_i32 = arith.constant 2 : i32
    %13 = vector.broadcast %c2_i32 : i32 to vector<10x1xi32>
    %14 = arith.cmpi eq, %1, %13 : vector<10x1xi32>
    %c0_2 = arith.constant 0 : index
    %c2 = arith.constant 2 : index
    %15 = memref.load %arg4[%c0_2, %c2] : memref<3x10xf32, #tpu.memory_space<smem>>
    %16 = vector.broadcast %15 : f32 to vector<10x1xf32>
    %17 = arith.select %14, %16, %12 : vector<10x1xi1>, vector<10x1xf32>
    %c3_i32 = arith.constant 3 : i32
    %18 = vector.broadcast %c3_i32 : i32 to vector<10x1xi32>
    %19 = arith.cmpi eq, %1, %18 : vector<10x1xi32>
    %c0_3 = arith.constant 0 : index
    %c3 = arith.constant 3 : index
    %20 = memref.load %arg4[%c0_3, %c3] : memref<3x10xf32, #tpu.memory_space<smem>>
    %21 = vector.broadcast %20 : f32 to vector<10x1xf32>
    %22 = arith.select %19, %21, %17 : vector<10x1xi1>, vector<10x1xf32>
    %c4_i32 = arith.constant 4 : i32
    %23 = vector.broadcast %c4_i32 : i32 to vector<10x1xi32>
    %24 = arith.cmpi eq, %1, %23 : vector<10x1xi32>
    %c0_4 = arith.constant 0 : index
    %c4 = arith.constant 4 : index
    %25 = memref.load %arg4[%c0_4, %c4] : memref<3x10xf32, #tpu.memory_space<smem>>
    %26 = vector.broadcast %25 : f32 to vector<10x1xf32>
    %27 = arith.select %24, %26, %22 : vector<10x1xi1>, vector<10x1xf32>
    %c5_i32 = arith.constant 5 : i32
    %28 = vector.broadcast %c5_i32 : i32 to vector<10x1xi32>
    %29 = arith.cmpi eq, %1, %28 : vector<10x1xi32>
    %c0_5 = arith.constant 0 : index
    %c5 = arith.constant 5 : index
    %30 = memref.load %arg4[%c0_5, %c5] : memref<3x10xf32, #tpu.memory_space<smem>>
    %31 = vector.broadcast %30 : f32 to vector<10x1xf32>
    %32 = arith.select %29, %31, %27 : vector<10x1xi1>, vector<10x1xf32>
    %c6_i32 = arith.constant 6 : i32
    %33 = vector.broadcast %c6_i32 : i32 to vector<10x1xi32>
    %34 = arith.cmpi eq, %1, %33 : vector<10x1xi32>
    %c0_6 = arith.constant 0 : index
    %c6 = arith.constant 6 : index
    %35 = memref.load %arg4[%c0_6, %c6] : memref<3x10xf32, #tpu.memory_space<smem>>
    %36 = vector.broadcast %35 : f32 to vector<10x1xf32>
    %37 = arith.select %34, %36, %32 : vector<10x1xi1>, vector<10x1xf32>
    %c7_i32 = arith.constant 7 : i32
    %38 = vector.broadcast %c7_i32 : i32 to vector<10x1xi32>
    %39 = arith.cmpi eq, %1, %38 : vector<10x1xi32>
    %c0_7 = arith.constant 0 : index
    %c7 = arith.constant 7 : index
    %40 = memref.load %arg4[%c0_7, %c7] : memref<3x10xf32, #tpu.memory_space<smem>>
    %41 = vector.broadcast %40 : f32 to vector<10x1xf32>
    %42 = arith.select %39, %41, %37 : vector<10x1xi1>, vector<10x1xf32>
    %c8_i32 = arith.constant 8 : i32
    %43 = vector.broadcast %c8_i32 : i32 to vector<10x1xi32>
    %44 = arith.cmpi eq, %1, %43 : vector<10x1xi32>
    %c0_8 = arith.constant 0 : index
    %c8 = arith.constant 8 : index
    %45 = memref.load %arg4[%c0_8, %c8] : memref<3x10xf32, #tpu.memory_space<smem>>
    %46 = vector.broadcast %45 : f32 to vector<10x1xf32>
    %47 = arith.select %44, %46, %42 : vector<10x1xi1>, vector<10x1xf32>
    %c9_i32 = arith.constant 9 : i32
    %48 = vector.broadcast %c9_i32 : i32 to vector<10x1xi32>
    %49 = arith.cmpi eq, %1, %48 : vector<10x1xi32>
    %c0_9 = arith.constant 0 : index
    %c9 = arith.constant 9 : index
    %50 = memref.load %arg4[%c0_9, %c9] : memref<3x10xf32, #tpu.memory_space<smem>>
    %51 = vector.broadcast %50 : f32 to vector<10x1xf32>
    %52 = arith.select %49, %51, %47 : vector<10x1xi1>, vector<10x1xf32>
    %cst_10 = arith.constant 0.000000e+00 : f32
    %53 = vector.broadcast %cst_10 : f32 to vector<10x1xf32>
    %c0_i32_11 = arith.constant 0 : i32
    %54 = vector.broadcast %c0_i32_11 : i32 to vector<10x1xi32>
    %55 = arith.cmpi eq, %1, %54 : vector<10x1xi32>
    %c1_12 = arith.constant 1 : index
    %c0_13 = arith.constant 0 : index
    %56 = memref.load %arg4[%c1_12, %c0_13] : memref<3x10xf32, #tpu.memory_space<smem>>
    %57 = vector.broadcast %56 : f32 to vector<10x1xf32>
    %58 = arith.select %55, %57, %53 : vector<10x1xi1>, vector<10x1xf32>
    %c1_i32_14 = arith.constant 1 : i32
    %59 = vector.broadcast %c1_i32_14 : i32 to vector<10x1xi32>
    %60 = arith.cmpi eq, %1, %59 : vector<10x1xi32>
    %c1_15 = arith.constant 1 : index
    %c1_16 = arith.constant 1 : index
    %61 = memref.load %arg4[%c1_15, %c1_16] : memref<3x10xf32, #tpu.memory_space<smem>>
    %62 = vector.broadcast %61 : f32 to vector<10x1xf32>
    %63 = arith.select %60, %62, %58 : vector<10x1xi1>, vector<10x1xf32>
    %c2_i32_17 = arith.constant 2 : i32
    %64 = vector.broadcast %c2_i32_17 : i32 to vector<10x1xi32>
    %65 = arith.cmpi eq, %1, %64 : vector<10x1xi32>
    %c1_18 = arith.constant 1 : index
    %c2_19 = arith.constant 2 : index
    %66 = memref.load %arg4[%c1_18, %c2_19] : memref<3x10xf32, #tpu.memory_space<smem>>
    %67 = vector.broadcast %66 : f32 to vector<10x1xf32>
    %68 = arith.select %65, %67, %63 : vector<10x1xi1>, vector<10x1xf32>
    %c3_i32_20 = arith.constant 3 : i32
    %69 = vector.broadcast %c3_i32_20 : i32 to vector<10x1xi32>
    %70 = arith.cmpi eq, %1, %69 : vector<10x1xi32>
    %c1_21 = arith.constant 1 : index
    %c3_22 = arith.constant 3 : index
    %71 = memref.load %arg4[%c1_21, %c3_22] : memref<3x10xf32, #tpu.memory_space<smem>>
    %72 = vector.broadcast %71 : f32 to vector<10x1xf32>
    %73 = arith.select %70, %72, %68 : vector<10x1xi1>, vector<10x1xf32>
    %c4_i32_23 = arith.constant 4 : i32
    %74 = vector.broadcast %c4_i32_23 : i32 to vector<10x1xi32>
    %75 = arith.cmpi eq, %1, %74 : vector<10x1xi32>
    %c1_24 = arith.constant 1 : index
    %c4_25 = arith.constant 4 : index
    %76 = memref.load %arg4[%c1_24, %c4_25] : memref<3x10xf32, #tpu.memory_space<smem>>
    %77 = vector.broadcast %76 : f32 to vector<10x1xf32>
    %78 = arith.select %75, %77, %73 : vector<10x1xi1>, vector<10x1xf32>
    %c5_i32_26 = arith.constant 5 : i32
    %79 = vector.broadcast %c5_i32_26 : i32 to vector<10x1xi32>
    %80 = arith.cmpi eq, %1, %79 : vector<10x1xi32>
    %c1_27 = arith.constant 1 : index
    %c5_28 = arith.constant 5 : index
    %81 = memref.load %arg4[%c1_27, %c5_28] : memref<3x10xf32, #tpu.memory_space<smem>>
    %82 = vector.broadcast %81 : f32 to vector<10x1xf32>
    %83 = arith.select %80, %82, %78 : vector<10x1xi1>, vector<10x1xf32>
    %c6_i32_29 = arith.constant 6 : i32
    %84 = vector.broadcast %c6_i32_29 : i32 to vector<10x1xi32>
    %85 = arith.cmpi eq, %1, %84 : vector<10x1xi32>
    %c1_30 = arith.constant 1 : index
    %c6_31 = arith.constant 6 : index
    %86 = memref.load %arg4[%c1_30, %c6_31] : memref<3x10xf32, #tpu.memory_space<smem>>
    %87 = vector.broadcast %86 : f32 to vector<10x1xf32>
    %88 = arith.select %85, %87, %83 : vector<10x1xi1>, vector<10x1xf32>
    %c7_i32_32 = arith.constant 7 : i32
    %89 = vector.broadcast %c7_i32_32 : i32 to vector<10x1xi32>
    %90 = arith.cmpi eq, %1, %89 : vector<10x1xi32>
    %c1_33 = arith.constant 1 : index
    %c7_34 = arith.constant 7 : index
    %91 = memref.load %arg4[%c1_33, %c7_34] : memref<3x10xf32, #tpu.memory_space<smem>>
    %92 = vector.broadcast %91 : f32 to vector<10x1xf32>
    %93 = arith.select %90, %92, %88 : vector<10x1xi1>, vector<10x1xf32>
    %c8_i32_35 = arith.constant 8 : i32
    %94 = vector.broadcast %c8_i32_35 : i32 to vector<10x1xi32>
    %95 = arith.cmpi eq, %1, %94 : vector<10x1xi32>
    %c1_36 = arith.constant 1 : index
    %c8_37 = arith.constant 8 : index
    %96 = memref.load %arg4[%c1_36, %c8_37] : memref<3x10xf32, #tpu.memory_space<smem>>
    %97 = vector.broadcast %96 : f32 to vector<10x1xf32>
    %98 = arith.select %95, %97, %93 : vector<10x1xi1>, vector<10x1xf32>
    %c9_i32_38 = arith.constant 9 : i32
    %99 = vector.broadcast %c9_i32_38 : i32 to vector<10x1xi32>
    %100 = arith.cmpi eq, %1, %99 : vector<10x1xi32>
    %c1_39 = arith.constant 1 : index
    %c9_40 = arith.constant 9 : index
    %101 = memref.load %arg4[%c1_39, %c9_40] : memref<3x10xf32, #tpu.memory_space<smem>>
    %102 = vector.broadcast %101 : f32 to vector<10x1xf32>
    %103 = arith.select %100, %102, %98 : vector<10x1xi1>, vector<10x1xf32>
    %cst_41 = arith.constant 0.000000e+00 : f32
    %104 = vector.broadcast %cst_41 : f32 to vector<10x1xf32>
    %c0_i32_42 = arith.constant 0 : i32
    %105 = vector.broadcast %c0_i32_42 : i32 to vector<10x1xi32>
    %106 = arith.cmpi eq, %1, %105 : vector<10x1xi32>
    %c2_43 = arith.constant 2 : index
    %c0_44 = arith.constant 0 : index
    %107 = memref.load %arg4[%c2_43, %c0_44] : memref<3x10xf32, #tpu.memory_space<smem>>
    %108 = vector.broadcast %107 : f32 to vector<10x1xf32>
    %109 = arith.select %106, %108, %104 : vector<10x1xi1>, vector<10x1xf32>
    %c1_i32_45 = arith.constant 1 : i32
    %110 = vector.broadcast %c1_i32_45 : i32 to vector<10x1xi32>
    %111 = arith.cmpi eq, %1, %110 : vector<10x1xi32>
    %c2_46 = arith.constant 2 : index
    %c1_47 = arith.constant 1 : index
    %112 = memref.load %arg4[%c2_46, %c1_47] : memref<3x10xf32, #tpu.memory_space<smem>>
    %113 = vector.broadcast %112 : f32 to vector<10x1xf32>
    %114 = arith.select %111, %113, %109 : vector<10x1xi1>, vector<10x1xf32>
    %c2_i32_48 = arith.constant 2 : i32
    %115 = vector.broadcast %c2_i32_48 : i32 to vector<10x1xi32>
    %116 = arith.cmpi eq, %1, %115 : vector<10x1xi32>
    %c2_49 = arith.constant 2 : index
    %c2_50 = arith.constant 2 : index
    %117 = memref.load %arg4[%c2_49, %c2_50] : memref<3x10xf32, #tpu.memory_space<smem>>
    %118 = vector.broadcast %117 : f32 to vector<10x1xf32>
    %119 = arith.select %116, %118, %114 : vector<10x1xi1>, vector<10x1xf32>
    %c3_i32_51 = arith.constant 3 : i32
    %120 = vector.broadcast %c3_i32_51 : i32 to vector<10x1xi32>
    %121 = arith.cmpi eq, %1, %120 : vector<10x1xi32>
    %c2_52 = arith.constant 2 : index
    %c3_53 = arith.constant 3 : index
    %122 = memref.load %arg4[%c2_52, %c3_53] : memref<3x10xf32, #tpu.memory_space<smem>>
    %123 = vector.broadcast %122 : f32 to vector<10x1xf32>
    %124 = arith.select %121, %123, %119 : vector<10x1xi1>, vector<10x1xf32>
    %c4_i32_54 = arith.constant 4 : i32
    %125 = vector.broadcast %c4_i32_54 : i32 to vector<10x1xi32>
    %126 = arith.cmpi eq, %1, %125 : vector<10x1xi32>
    %c2_55 = arith.constant 2 : index
    %c4_56 = arith.constant 4 : index
    %127 = memref.load %arg4[%c2_55, %c4_56] : memref<3x10xf32, #tpu.memory_space<smem>>
    %128 = vector.broadcast %127 : f32 to vector<10x1xf32>
    %129 = arith.select %126, %128, %124 : vector<10x1xi1>, vector<10x1xf32>
    %c5_i32_57 = arith.constant 5 : i32
    %130 = vector.broadcast %c5_i32_57 : i32 to vector<10x1xi32>
    %131 = arith.cmpi eq, %1, %130 : vector<10x1xi32>
    %c2_58 = arith.constant 2 : index
    %c5_59 = arith.constant 5 : index
    %132 = memref.load %arg4[%c2_58, %c5_59] : memref<3x10xf32, #tpu.memory_space<smem>>
    %133 = vector.broadcast %132 : f32 to vector<10x1xf32>
    %134 = arith.select %131, %133, %129 : vector<10x1xi1>, vector<10x1xf32>
    %c6_i32_60 = arith.constant 6 : i32
    %135 = vector.broadcast %c6_i32_60 : i32 to vector<10x1xi32>
    %136 = arith.cmpi eq, %1, %135 : vector<10x1xi32>
    %c2_61 = arith.constant 2 : index
    %c6_62 = arith.constant 6 : index
    %137 = memref.load %arg4[%c2_61, %c6_62] : memref<3x10xf32, #tpu.memory_space<smem>>
    %138 = vector.broadcast %137 : f32 to vector<10x1xf32>
    %139 = arith.select %136, %138, %134 : vector<10x1xi1>, vector<10x1xf32>
    %c7_i32_63 = arith.constant 7 : i32
    %140 = vector.broadcast %c7_i32_63 : i32 to vector<10x1xi32>
    %141 = arith.cmpi eq, %1, %140 : vector<10x1xi32>
    %c2_64 = arith.constant 2 : index
    %c7_65 = arith.constant 7 : index
    %142 = memref.load %arg4[%c2_64, %c7_65] : memref<3x10xf32, #tpu.memory_space<smem>>
    %143 = vector.broadcast %142 : f32 to vector<10x1xf32>
    %144 = arith.select %141, %143, %139 : vector<10x1xi1>, vector<10x1xf32>
    %c8_i32_66 = arith.constant 8 : i32
    %145 = vector.broadcast %c8_i32_66 : i32 to vector<10x1xi32>
    %146 = arith.cmpi eq, %1, %145 : vector<10x1xi32>
    %c2_67 = arith.constant 2 : index
    %c8_68 = arith.constant 8 : index
    %147 = memref.load %arg4[%c2_67, %c8_68] : memref<3x10xf32, #tpu.memory_space<smem>>
    %148 = vector.broadcast %147 : f32 to vector<10x1xf32>
    %149 = arith.select %146, %148, %144 : vector<10x1xi1>, vector<10x1xf32>
    %c9_i32_69 = arith.constant 9 : i32
    %150 = vector.broadcast %c9_i32_69 : i32 to vector<10x1xi32>
    %151 = arith.cmpi eq, %1, %150 : vector<10x1xi32>
    %c2_70 = arith.constant 2 : index
    %c9_71 = arith.constant 9 : index
    %152 = memref.load %arg4[%c2_70, %c9_71] : memref<3x10xf32, #tpu.memory_space<smem>>
    %153 = vector.broadcast %152 : f32 to vector<10x1xf32>
    %154 = arith.select %151, %153, %149 : vector<10x1xi1>, vector<10x1xf32>
    %c0_72 = arith.constant 0 : index
    %c0_73 = arith.constant 0 : index
    %155 = memref.load %arg0[%c0_72, %c0_73] : memref<3x3xf32, #tpu.memory_space<smem>>
    %c0_74 = arith.constant 0 : index
    %c1_75 = arith.constant 1 : index
    %156 = memref.load %arg0[%c0_74, %c1_75] : memref<3x3xf32, #tpu.memory_space<smem>>
    %c0_76 = arith.constant 0 : index
    %c2_77 = arith.constant 2 : index
    %157 = memref.load %arg0[%c0_76, %c2_77] : memref<3x3xf32, #tpu.memory_space<smem>>
    %c1_78 = arith.constant 1 : index
    %c1_79 = arith.constant 1 : index
    %158 = memref.load %arg0[%c1_78, %c1_79] : memref<3x3xf32, #tpu.memory_space<smem>>
    %c1_80 = arith.constant 1 : index
    %c2_81 = arith.constant 2 : index
    %159 = memref.load %arg0[%c1_80, %c2_81] : memref<3x3xf32, #tpu.memory_space<smem>>
    %c2_82 = arith.constant 2 : index
    %c2_83 = arith.constant 2 : index
    %160 = memref.load %arg0[%c2_82, %c2_83] : memref<3x3xf32, #tpu.memory_space<smem>>
    %c0_84 = arith.constant 0 : index
    %c0_85 = arith.constant 0 : index
    %161 = memref.load %arg1[%c0_84, %c0_85] : memref<1x3xf32, #tpu.memory_space<smem>>
    %c0_86 = arith.constant 0 : index
    %c1_87 = arith.constant 1 : index
    %162 = memref.load %arg1[%c0_86, %c1_87] : memref<1x3xf32, #tpu.memory_space<smem>>
    %c0_88 = arith.constant 0 : index
    %c2_89 = arith.constant 2 : index
    %163 = memref.load %arg1[%c0_88, %c2_89] : memref<1x3xf32, #tpu.memory_space<smem>>
    %c0_90 = arith.constant 0 : index
    %164 = memref.load %arg2[%c0_90] : memref<1xf32, #tpu.memory_space<smem>>
    %165 = arith.mulf %158, %160 : f32
    %166 = arith.mulf %159, %159 : f32
    %167 = arith.subf %165, %166 : f32
    %168 = arith.mulf %157, %159 : f32
    %169 = arith.mulf %156, %160 : f32
    %170 = arith.subf %168, %169 : f32
    %171 = arith.mulf %156, %159 : f32
    %172 = arith.mulf %157, %158 : f32
    %173 = arith.subf %171, %172 : f32
    %174 = arith.mulf %155, %160 : f32
    %175 = arith.mulf %157, %157 : f32
    %176 = arith.subf %174, %175 : f32
    %177 = arith.mulf %156, %157 : f32
    %178 = arith.mulf %155, %159 : f32
    %179 = arith.subf %177, %178 : f32
    %180 = arith.mulf %155, %158 : f32
    %181 = arith.mulf %156, %156 : f32
    %182 = arith.subf %180, %181 : f32
    %183 = arith.mulf %155, %167 : f32
    %184 = arith.mulf %156, %170 : f32
    %185 = arith.addf %183, %184 : f32
    %186 = arith.mulf %157, %173 : f32
    %187 = arith.addf %185, %186 : f32
    %cst_91 = arith.constant 1.000000e+00 : f32
    %188 = arith.divf %cst_91, %187 : f32
    %189 = arith.mulf %167, %188 : f32
    %190 = arith.mulf %170, %188 : f32
    %191 = arith.mulf %173, %188 : f32
    %192 = arith.mulf %170, %188 : f32
    %193 = arith.mulf %176, %188 : f32
    %194 = arith.mulf %179, %188 : f32
    %195 = arith.mulf %173, %188 : f32
    %196 = arith.mulf %179, %188 : f32
    %197 = arith.mulf %182, %188 : f32
    %198 = arith.mulf %161, %189 : f32
    %199 = arith.mulf %162, %192 : f32
    %200 = arith.addf %198, %199 : f32
    %201 = arith.mulf %163, %195 : f32
    %202 = arith.addf %200, %201 : f32
    %203 = arith.mulf %161, %190 : f32
    %204 = arith.mulf %162, %193 : f32
    %205 = arith.addf %203, %204 : f32
    %206 = arith.mulf %163, %196 : f32
    %207 = arith.addf %205, %206 : f32
    %208 = arith.mulf %161, %191 : f32
    %209 = arith.mulf %162, %194 : f32
    %210 = arith.addf %208, %209 : f32
    %211 = arith.mulf %163, %197 : f32
    %212 = arith.addf %210, %211 : f32
    %213 = arith.mulf %202, %161 : f32
    %214 = arith.mulf %207, %162 : f32
    %215 = arith.addf %213, %214 : f32
    %216 = arith.mulf %212, %163 : f32
    %217 = arith.addf %215, %216 : f32
    %cst_92 = arith.constant 9.99999968E-21 : f32
    %218 = arith.maximumf %217, %cst_92 : f32
    %cst_93 = arith.constant 1.000000e+00 : f32
    %219 = arith.divf %cst_93, %218 : f32
    %220 = vector.broadcast %189 : f32 to vector<10x1xf32>
    %221 = arith.mulf %52, %220 : vector<10x1xf32>
    %222 = vector.broadcast %192 : f32 to vector<10x1xf32>
    %223 = arith.mulf %103, %222 : vector<10x1xf32>
    %224 = arith.addf %221, %223 : vector<10x1xf32>
    %225 = vector.broadcast %195 : f32 to vector<10x1xf32>
    %226 = arith.mulf %154, %225 : vector<10x1xf32>
    %227 = arith.addf %224, %226 : vector<10x1xf32>
    %cst_94 = arith.constant 0.000000e+00 : f32
    %228 = vector.broadcast %cst_94 : f32 to vector<10x1xf32>
    %229 = arith.subf %228, %227 : vector<10x1xf32>
    %230 = vector.broadcast %190 : f32 to vector<10x1xf32>
    %231 = arith.mulf %52, %230 : vector<10x1xf32>
    %232 = vector.broadcast %193 : f32 to vector<10x1xf32>
    %233 = arith.mulf %103, %232 : vector<10x1xf32>
    %234 = arith.addf %231, %233 : vector<10x1xf32>
    %235 = vector.broadcast %196 : f32 to vector<10x1xf32>
    %236 = arith.mulf %154, %235 : vector<10x1xf32>
    %237 = arith.addf %234, %236 : vector<10x1xf32>
    %cst_95 = arith.constant 0.000000e+00 : f32
    %238 = vector.broadcast %cst_95 : f32 to vector<10x1xf32>
    %239 = arith.subf %238, %237 : vector<10x1xf32>
    %240 = vector.broadcast %191 : f32 to vector<10x1xf32>
    %241 = arith.mulf %52, %240 : vector<10x1xf32>
    %242 = vector.broadcast %194 : f32 to vector<10x1xf32>
    %243 = arith.mulf %103, %242 : vector<10x1xf32>
    %244 = arith.addf %241, %243 : vector<10x1xf32>
    %245 = vector.broadcast %197 : f32 to vector<10x1xf32>
    %246 = arith.mulf %154, %245 : vector<10x1xf32>
    %247 = arith.addf %244, %246 : vector<10x1xf32>
    %cst_96 = arith.constant 0.000000e+00 : f32
    %248 = vector.broadcast %cst_96 : f32 to vector<10x1xf32>
    %249 = arith.subf %248, %247 : vector<10x1xf32>
    %250 = vector.broadcast %161 : f32 to vector<10x1xf32>
    %251 = arith.mulf %250, %229 : vector<10x1xf32>
    %252 = vector.broadcast %162 : f32 to vector<10x1xf32>
    %253 = arith.mulf %252, %239 : vector<10x1xf32>
    %254 = arith.addf %251, %253 : vector<10x1xf32>
    %255 = vector.broadcast %163 : f32 to vector<10x1xf32>
    %256 = arith.mulf %255, %249 : vector<10x1xf32>
    %257 = arith.addf %254, %256 : vector<10x1xf32>
    %258 = vector.broadcast %164 : f32 to vector<10x1xf32>
    %259 = arith.subf %257, %258 : vector<10x1xf32>
    %cst_97 = arith.constant 0.000000e+00 : f32
    %260 = vector.broadcast %cst_97 : f32 to vector<10x1xf32>
    %261 = arith.maximumf %259, %260 : vector<10x1xf32>
    %262 = vector.broadcast %219 : f32 to vector<10x1xf32>
    %263 = arith.mulf %261, %262 : vector<10x1xf32>
    %264 = vector.broadcast %202 : f32 to vector<10x1xf32>
    %265 = arith.mulf %263, %264 : vector<10x1xf32>
    %266 = arith.subf %229, %265 : vector<10x1xf32>
    %267 = vector.broadcast %207 : f32 to vector<10x1xf32>
    %268 = arith.mulf %263, %267 : vector<10x1xf32>
    %269 = arith.subf %239, %268 : vector<10x1xf32>
    %270 = vector.broadcast %212 : f32 to vector<10x1xf32>
    %271 = arith.mulf %263, %270 : vector<10x1xf32>
    %272 = arith.subf %249, %271 : vector<10x1xf32>
    %273 = arith.maximumf %266, %269 : vector<10x1xf32>
    %274 = arith.maximumf %273, %272 : vector<10x1xf32>
    %275 = arith.subf %266, %274 : vector<10x1xf32>
    %276 = math.exp %275 : vector<10x1xf32>
    %277 = arith.subf %269, %274 : vector<10x1xf32>
    %278 = math.exp %277 : vector<10x1xf32>
    %279 = arith.addf %276, %278 : vector<10x1xf32>
    %280 = arith.subf %272, %274 : vector<10x1xf32>
    %281 = math.exp %280 : vector<10x1xf32>
    %282 = arith.addf %279, %281 : vector<10x1xf32>
    %283 = math.log %282 : vector<10x1xf32>
    %284 = arith.addf %283, %274 : vector<10x1xf32>
    %285 = arith.subf %284, %266 : vector<10x1xf32>
    %286 = arith.subf %284, %269 : vector<10x1xf32>
    %287 = arith.subf %284, %272 : vector<10x1xf32>
    %288 = arith.maximumf %285, %286 : vector<10x1xf32>
    %289 = arith.maximumf %288, %287 : vector<10x1xf32>
    %290 = vector.shape_cast %289 : vector<10x1xf32> to vector<1x10x1xf32>
    %cst_98 = arith.constant dense<0xFF800000> : vector<1xf32>
    %291 = vector.multi_reduction <maximumf>, %290, %cst_98 [1, 2] : vector<1x10x1xf32> to vector<1xf32>
    %292 = vector.shape_cast %291 : vector<1xf32> to vector<1x1x1xf32>
    %293 = vector.extract %292[0, 0, 0] : f32 from vector<1x1x1xf32>
    %294 = vector.broadcast %293 : f32 to vector<1x1xf32>
    %295 = vector.broadcast %294 : vector<1x1xf32> to vector<10x1xf32>
    %296 = arith.divf %285, %295 : vector<10x1xf32>
    %297 = vector.broadcast %294 : vector<1x1xf32> to vector<10x1xf32>
    %298 = arith.divf %286, %297 : vector<10x1xf32>
    %299 = vector.broadcast %294 : vector<1x1xf32> to vector<10x1xf32>
    %300 = arith.divf %287, %299 : vector<10x1xf32>
    %cst_99 = arith.constant 0.000000e+00 : f32
    %301 = vector.broadcast %cst_99 : f32 to vector<10x100xf32>
    %c0_100 = arith.constant 0 : index
    %c0_101 = arith.constant 0 : index
    %302 = memref.load %arg3[%c0_100, %c0_101] : memref<3x2xi32, #tpu.memory_space<smem>>
    %c1_i32_102 = arith.constant 1 : i32
    %303 = arith.subi %302, %c1_i32_102 : i32
    %c10_i32 = arith.constant 10 : i32
    %304 = arith.muli %303, %c10_i32 : i32
    %c0_103 = arith.constant 0 : index
    %c1_104 = arith.constant 1 : index
    %305 = memref.load %arg3[%c0_103, %c1_104] : memref<3x2xi32, #tpu.memory_space<smem>>
    %c1_i32_105 = arith.constant 1 : i32
    %306 = arith.subi %305, %c1_i32_105 : i32
    %307 = arith.addi %304, %306 : i32
    %308 = vector.broadcast %307 : i32 to vector<10x100xi32>
    %309 = arith.cmpi eq, %0, %308 : vector<10x100xi32>
    %310 = vector.shape_cast %296 : vector<10x1xf32> to vector<10x1xf32>
    %311 = vector.broadcast %310 : vector<10x1xf32> to vector<10x100xf32>
    %312 = arith.select %309, %311, %301 : vector<10x100xi1>, vector<10x100xf32>
    %c1_106 = arith.constant 1 : index
    %c0_107 = arith.constant 0 : index
    %313 = memref.load %arg3[%c1_106, %c0_107] : memref<3x2xi32, #tpu.memory_space<smem>>
    %c1_i32_108 = arith.constant 1 : i32
    %314 = arith.subi %313, %c1_i32_108 : i32
    %c10_i32_109 = arith.constant 10 : i32
    %315 = arith.muli %314, %c10_i32_109 : i32
    %c1_110 = arith.constant 1 : index
    %c1_111 = arith.constant 1 : index
    %316 = memref.load %arg3[%c1_110, %c1_111] : memref<3x2xi32, #tpu.memory_space<smem>>
    %c1_i32_112 = arith.constant 1 : i32
    %317 = arith.subi %316, %c1_i32_112 : i32
    %318 = arith.addi %315, %317 : i32
    %319 = vector.broadcast %318 : i32 to vector<10x100xi32>
    %320 = arith.cmpi eq, %0, %319 : vector<10x100xi32>
    %321 = vector.shape_cast %298 : vector<10x1xf32> to vector<10x1xf32>
    %322 = vector.broadcast %321 : vector<10x1xf32> to vector<10x100xf32>
    %323 = arith.select %320, %322, %312 : vector<10x100xi1>, vector<10x100xf32>
    %c2_113 = arith.constant 2 : index
    %c0_114 = arith.constant 0 : index
    %324 = memref.load %arg3[%c2_113, %c0_114] : memref<3x2xi32, #tpu.memory_space<smem>>
    %c1_i32_115 = arith.constant 1 : i32
    %325 = arith.subi %324, %c1_i32_115 : i32
    %c10_i32_116 = arith.constant 10 : i32
    %326 = arith.muli %325, %c10_i32_116 : i32
    %c2_117 = arith.constant 2 : index
    %c1_118 = arith.constant 1 : index
    %327 = memref.load %arg3[%c2_117, %c1_118] : memref<3x2xi32, #tpu.memory_space<smem>>
    %c1_i32_119 = arith.constant 1 : i32
    %328 = arith.subi %327, %c1_i32_119 : i32
    %329 = arith.addi %326, %328 : i32
    %330 = vector.broadcast %329 : i32 to vector<10x100xi32>
    %331 = arith.cmpi eq, %0, %330 : vector<10x100xi32>
    %332 = vector.shape_cast %300 : vector<10x1xf32> to vector<10x1xf32>
    %333 = vector.broadcast %332 : vector<10x1xf32> to vector<10x100xf32>
    %334 = arith.select %331, %333, %323 : vector<10x100xi1>, vector<10x100xf32>
    %cst_120 = arith.constant 0.000000e+00 : f32
    %335 = vector.broadcast %cst_120 : f32 to vector<10x1xf32>
    %c0_i32_121 = arith.constant 0 : i32
    %336 = vector.broadcast %c0_i32_121 : i32 to vector<10x1xi32>
    %337 = arith.cmpi eq, %1, %336 : vector<10x1xi32>
    %c0_122 = arith.constant 0 : index
    %c0_123 = arith.constant 0 : index
    %338 = memref.load %arg9[%c0_122, %c0_123] : memref<3x10xf32, #tpu.memory_space<smem>>
    %339 = vector.broadcast %338 : f32 to vector<10x1xf32>
    %340 = arith.select %337, %339, %335 : vector<10x1xi1>, vector<10x1xf32>
    %c1_i32_124 = arith.constant 1 : i32
    %341 = vector.broadcast %c1_i32_124 : i32 to vector<10x1xi32>
    %342 = arith.cmpi eq, %1, %341 : vector<10x1xi32>
    %c0_125 = arith.constant 0 : index
    %c1_126 = arith.constant 1 : index
    %343 = memref.load %arg9[%c0_125, %c1_126] : memref<3x10xf32, #tpu.memory_space<smem>>
    %344 = vector.broadcast %343 : f32 to vector<10x1xf32>
    %345 = arith.select %342, %344, %340 : vector<10x1xi1>, vector<10x1xf32>
    %c2_i32_127 = arith.constant 2 : i32
    %346 = vector.broadcast %c2_i32_127 : i32 to vector<10x1xi32>
    %347 = arith.cmpi eq, %1, %346 : vector<10x1xi32>
    %c0_128 = arith.constant 0 : index
    %c2_129 = arith.constant 2 : index
    %348 = memref.load %arg9[%c0_128, %c2_129] : memref<3x10xf32, #tpu.memory_space<smem>>
    %349 = vector.broadcast %348 : f32 to vector<10x1xf32>
    %350 = arith.select %347, %349, %345 : vector<10x1xi1>, vector<10x1xf32>
    %c3_i32_130 = arith.constant 3 : i32
    %351 = vector.broadcast %c3_i32_130 : i32 to vector<10x1xi32>
    %352 = arith.cmpi eq, %1, %351 : vector<10x1xi32>
    %c0_131 = arith.constant 0 : index
    %c3_132 = arith.constant 3 : index
    %353 = memref.load %arg9[%c0_131, %c3_132] : memref<3x10xf32, #tpu.memory_space<smem>>
    %354 = vector.broadcast %353 : f32 to vector<10x1xf32>
    %355 = arith.select %352, %354, %350 : vector<10x1xi1>, vector<10x1xf32>
    %c4_i32_133 = arith.constant 4 : i32
    %356 = vector.broadcast %c4_i32_133 : i32 to vector<10x1xi32>
    %357 = arith.cmpi eq, %1, %356 : vector<10x1xi32>
    %c0_134 = arith.constant 0 : index
    %c4_135 = arith.constant 4 : index
    %358 = memref.load %arg9[%c0_134, %c4_135] : memref<3x10xf32, #tpu.memory_space<smem>>
    %359 = vector.broadcast %358 : f32 to vector<10x1xf32>
    %360 = arith.select %357, %359, %355 : vector<10x1xi1>, vector<10x1xf32>
    %c5_i32_136 = arith.constant 5 : i32
    %361 = vector.broadcast %c5_i32_136 : i32 to vector<10x1xi32>
    %362 = arith.cmpi eq, %1, %361 : vector<10x1xi32>
    %c0_137 = arith.constant 0 : index
    %c5_138 = arith.constant 5 : index
    %363 = memref.load %arg9[%c0_137, %c5_138] : memref<3x10xf32, #tpu.memory_space<smem>>
    %364 = vector.broadcast %363 : f32 to vector<10x1xf32>
    %365 = arith.select %362, %364, %360 : vector<10x1xi1>, vector<10x1xf32>
    %c6_i32_139 = arith.constant 6 : i32
    %366 = vector.broadcast %c6_i32_139 : i32 to vector<10x1xi32>
    %367 = arith.cmpi eq, %1, %366 : vector<10x1xi32>
    %c0_140 = arith.constant 0 : index
    %c6_141 = arith.constant 6 : index
    %368 = memref.load %arg9[%c0_140, %c6_141] : memref<3x10xf32, #tpu.memory_space<smem>>
    %369 = vector.broadcast %368 : f32 to vector<10x1xf32>
    %370 = arith.select %367, %369, %365 : vector<10x1xi1>, vector<10x1xf32>
    %c7_i32_142 = arith.constant 7 : i32
    %371 = vector.broadcast %c7_i32_142 : i32 to vector<10x1xi32>
    %372 = arith.cmpi eq, %1, %371 : vector<10x1xi32>
    %c0_143 = arith.constant 0 : index
    %c7_144 = arith.constant 7 : index
    %373 = memref.load %arg9[%c0_143, %c7_144] : memref<3x10xf32, #tpu.memory_space<smem>>
    %374 = vector.broadcast %373 : f32 to vector<10x1xf32>
    %375 = arith.select %372, %374, %370 : vector<10x1xi1>, vector<10x1xf32>
    %c8_i32_145 = arith.constant 8 : i32
    %376 = vector.broadcast %c8_i32_145 : i32 to vector<10x1xi32>
    %377 = arith.cmpi eq, %1, %376 : vector<10x1xi32>
    %c0_146 = arith.constant 0 : index
    %c8_147 = arith.constant 8 : index
    %378 = memref.load %arg9[%c0_146, %c8_147] : memref<3x10xf32, #tpu.memory_space<smem>>
    %379 = vector.broadcast %378 : f32 to vector<10x1xf32>
    %380 = arith.select %377, %379, %375 : vector<10x1xi1>, vector<10x1xf32>
    %c9_i32_148 = arith.constant 9 : i32
    %381 = vector.broadcast %c9_i32_148 : i32 to vector<10x1xi32>
    %382 = arith.cmpi eq, %1, %381 : vector<10x1xi32>
    %c0_149 = arith.constant 0 : index
    %c9_150 = arith.constant 9 : index
    %383 = memref.load %arg9[%c0_149, %c9_150] : memref<3x10xf32, #tpu.memory_space<smem>>
    %384 = vector.broadcast %383 : f32 to vector<10x1xf32>
    %385 = arith.select %382, %384, %380 : vector<10x1xi1>, vector<10x1xf32>
    %cst_151 = arith.constant 0.000000e+00 : f32
    %386 = vector.broadcast %cst_151 : f32 to vector<10x1xf32>
    %c0_i32_152 = arith.constant 0 : i32
    %387 = vector.broadcast %c0_i32_152 : i32 to vector<10x1xi32>
    %388 = arith.cmpi eq, %1, %387 : vector<10x1xi32>
    %c1_153 = arith.constant 1 : index
    %c0_154 = arith.constant 0 : index
    %389 = memref.load %arg9[%c1_153, %c0_154] : memref<3x10xf32, #tpu.memory_space<smem>>
    %390 = vector.broadcast %389 : f32 to vector<10x1xf32>
    %391 = arith.select %388, %390, %386 : vector<10x1xi1>, vector<10x1xf32>
    %c1_i32_155 = arith.constant 1 : i32
    %392 = vector.broadcast %c1_i32_155 : i32 to vector<10x1xi32>
    %393 = arith.cmpi eq, %1, %392 : vector<10x1xi32>
    %c1_156 = arith.constant 1 : index
    %c1_157 = arith.constant 1 : index
    %394 = memref.load %arg9[%c1_156, %c1_157] : memref<3x10xf32, #tpu.memory_space<smem>>
    %395 = vector.broadcast %394 : f32 to vector<10x1xf32>
    %396 = arith.select %393, %395, %391 : vector<10x1xi1>, vector<10x1xf32>
    %c2_i32_158 = arith.constant 2 : i32
    %397 = vector.broadcast %c2_i32_158 : i32 to vector<10x1xi32>
    %398 = arith.cmpi eq, %1, %397 : vector<10x1xi32>
    %c1_159 = arith.constant 1 : index
    %c2_160 = arith.constant 2 : index
    %399 = memref.load %arg9[%c1_159, %c2_160] : memref<3x10xf32, #tpu.memory_space<smem>>
    %400 = vector.broadcast %399 : f32 to vector<10x1xf32>
    %401 = arith.select %398, %400, %396 : vector<10x1xi1>, vector<10x1xf32>
    %c3_i32_161 = arith.constant 3 : i32
    %402 = vector.broadcast %c3_i32_161 : i32 to vector<10x1xi32>
    %403 = arith.cmpi eq, %1, %402 : vector<10x1xi32>
    %c1_162 = arith.constant 1 : index
    %c3_163 = arith.constant 3 : index
    %404 = memref.load %arg9[%c1_162, %c3_163] : memref<3x10xf32, #tpu.memory_space<smem>>
    %405 = vector.broadcast %404 : f32 to vector<10x1xf32>
    %406 = arith.select %403, %405, %401 : vector<10x1xi1>, vector<10x1xf32>
    %c4_i32_164 = arith.constant 4 : i32
    %407 = vector.broadcast %c4_i32_164 : i32 to vector<10x1xi32>
    %408 = arith.cmpi eq, %1, %407 : vector<10x1xi32>
    %c1_165 = arith.constant 1 : index
    %c4_166 = arith.constant 4 : index
    %409 = memref.load %arg9[%c1_165, %c4_166] : memref<3x10xf32, #tpu.memory_space<smem>>
    %410 = vector.broadcast %409 : f32 to vector<10x1xf32>
    %411 = arith.select %408, %410, %406 : vector<10x1xi1>, vector<10x1xf32>
    %c5_i32_167 = arith.constant 5 : i32
    %412 = vector.broadcast %c5_i32_167 : i32 to vector<10x1xi32>
    %413 = arith.cmpi eq, %1, %412 : vector<10x1xi32>
    %c1_168 = arith.constant 1 : index
    %c5_169 = arith.constant 5 : index
    %414 = memref.load %arg9[%c1_168, %c5_169] : memref<3x10xf32, #tpu.memory_space<smem>>
    %415 = vector.broadcast %414 : f32 to vector<10x1xf32>
    %416 = arith.select %413, %415, %411 : vector<10x1xi1>, vector<10x1xf32>
    %c6_i32_170 = arith.constant 6 : i32
    %417 = vector.broadcast %c6_i32_170 : i32 to vector<10x1xi32>
    %418 = arith.cmpi eq, %1, %417 : vector<10x1xi32>
    %c1_171 = arith.constant 1 : index
    %c6_172 = arith.constant 6 : index
    %419 = memref.load %arg9[%c1_171, %c6_172] : memref<3x10xf32, #tpu.memory_space<smem>>
    %420 = vector.broadcast %419 : f32 to vector<10x1xf32>
    %421 = arith.select %418, %420, %416 : vector<10x1xi1>, vector<10x1xf32>
    %c7_i32_173 = arith.constant 7 : i32
    %422 = vector.broadcast %c7_i32_173 : i32 to vector<10x1xi32>
    %423 = arith.cmpi eq, %1, %422 : vector<10x1xi32>
    %c1_174 = arith.constant 1 : index
    %c7_175 = arith.constant 7 : index
    %424 = memref.load %arg9[%c1_174, %c7_175] : memref<3x10xf32, #tpu.memory_space<smem>>
    %425 = vector.broadcast %424 : f32 to vector<10x1xf32>
    %426 = arith.select %423, %425, %421 : vector<10x1xi1>, vector<10x1xf32>
    %c8_i32_176 = arith.constant 8 : i32
    %427 = vector.broadcast %c8_i32_176 : i32 to vector<10x1xi32>
    %428 = arith.cmpi eq, %1, %427 : vector<10x1xi32>
    %c1_177 = arith.constant 1 : index
    %c8_178 = arith.constant 8 : index
    %429 = memref.load %arg9[%c1_177, %c8_178] : memref<3x10xf32, #tpu.memory_space<smem>>
    %430 = vector.broadcast %429 : f32 to vector<10x1xf32>
    %431 = arith.select %428, %430, %426 : vector<10x1xi1>, vector<10x1xf32>
    %c9_i32_179 = arith.constant 9 : i32
    %432 = vector.broadcast %c9_i32_179 : i32 to vector<10x1xi32>
    %433 = arith.cmpi eq, %1, %432 : vector<10x1xi32>
    %c1_180 = arith.constant 1 : index
    %c9_181 = arith.constant 9 : index
    %434 = memref.load %arg9[%c1_180, %c9_181] : memref<3x10xf32, #tpu.memory_space<smem>>
    %435 = vector.broadcast %434 : f32 to vector<10x1xf32>
    %436 = arith.select %433, %435, %431 : vector<10x1xi1>, vector<10x1xf32>
    %cst_182 = arith.constant 0.000000e+00 : f32
    %437 = vector.broadcast %cst_182 : f32 to vector<10x1xf32>
    %c0_i32_183 = arith.constant 0 : i32
    %438 = vector.broadcast %c0_i32_183 : i32 to vector<10x1xi32>
    %439 = arith.cmpi eq, %1, %438 : vector<10x1xi32>
    %c2_184 = arith.constant 2 : index
    %c0_185 = arith.constant 0 : index
    %440 = memref.load %arg9[%c2_184, %c0_185] : memref<3x10xf32, #tpu.memory_space<smem>>
    %441 = vector.broadcast %440 : f32 to vector<10x1xf32>
    %442 = arith.select %439, %441, %437 : vector<10x1xi1>, vector<10x1xf32>
    %c1_i32_186 = arith.constant 1 : i32
    %443 = vector.broadcast %c1_i32_186 : i32 to vector<10x1xi32>
    %444 = arith.cmpi eq, %1, %443 : vector<10x1xi32>
    %c2_187 = arith.constant 2 : index
    %c1_188 = arith.constant 1 : index
    %445 = memref.load %arg9[%c2_187, %c1_188] : memref<3x10xf32, #tpu.memory_space<smem>>
    %446 = vector.broadcast %445 : f32 to vector<10x1xf32>
    %447 = arith.select %444, %446, %442 : vector<10x1xi1>, vector<10x1xf32>
    %c2_i32_189 = arith.constant 2 : i32
    %448 = vector.broadcast %c2_i32_189 : i32 to vector<10x1xi32>
    %449 = arith.cmpi eq, %1, %448 : vector<10x1xi32>
    %c2_190 = arith.constant 2 : index
    %c2_191 = arith.constant 2 : index
    %450 = memref.load %arg9[%c2_190, %c2_191] : memref<3x10xf32, #tpu.memory_space<smem>>
    %451 = vector.broadcast %450 : f32 to vector<10x1xf32>
    %452 = arith.select %449, %451, %447 : vector<10x1xi1>, vector<10x1xf32>
    %c3_i32_192 = arith.constant 3 : i32
    %453 = vector.broadcast %c3_i32_192 : i32 to vector<10x1xi32>
    %454 = arith.cmpi eq, %1, %453 : vector<10x1xi32>
    %c2_193 = arith.constant 2 : index
    %c3_194 = arith.constant 3 : index
    %455 = memref.load %arg9[%c2_193, %c3_194] : memref<3x10xf32, #tpu.memory_space<smem>>
    %456 = vector.broadcast %455 : f32 to vector<10x1xf32>
    %457 = arith.select %454, %456, %452 : vector<10x1xi1>, vector<10x1xf32>
    %c4_i32_195 = arith.constant 4 : i32
    %458 = vector.broadcast %c4_i32_195 : i32 to vector<10x1xi32>
    %459 = arith.cmpi eq, %1, %458 : vector<10x1xi32>
    %c2_196 = arith.constant 2 : index
    %c4_197 = arith.constant 4 : index
    %460 = memref.load %arg9[%c2_196, %c4_197] : memref<3x10xf32, #tpu.memory_space<smem>>
    %461 = vector.broadcast %460 : f32 to vector<10x1xf32>
    %462 = arith.select %459, %461, %457 : vector<10x1xi1>, vector<10x1xf32>
    %c5_i32_198 = arith.constant 5 : i32
    %463 = vector.broadcast %c5_i32_198 : i32 to vector<10x1xi32>
    %464 = arith.cmpi eq, %1, %463 : vector<10x1xi32>
    %c2_199 = arith.constant 2 : index
    %c5_200 = arith.constant 5 : index
    %465 = memref.load %arg9[%c2_199, %c5_200] : memref<3x10xf32, #tpu.memory_space<smem>>
    %466 = vector.broadcast %465 : f32 to vector<10x1xf32>
    %467 = arith.select %464, %466, %462 : vector<10x1xi1>, vector<10x1xf32>
    %c6_i32_201 = arith.constant 6 : i32
    %468 = vector.broadcast %c6_i32_201 : i32 to vector<10x1xi32>
    %469 = arith.cmpi eq, %1, %468 : vector<10x1xi32>
    %c2_202 = arith.constant 2 : index
    %c6_203 = arith.constant 6 : index
    %470 = memref.load %arg9[%c2_202, %c6_203] : memref<3x10xf32, #tpu.memory_space<smem>>
    %471 = vector.broadcast %470 : f32 to vector<10x1xf32>
    %472 = arith.select %469, %471, %467 : vector<10x1xi1>, vector<10x1xf32>
    %c7_i32_204 = arith.constant 7 : i32
    %473 = vector.broadcast %c7_i32_204 : i32 to vector<10x1xi32>
    %474 = arith.cmpi eq, %1, %473 : vector<10x1xi32>
    %c2_205 = arith.constant 2 : index
    %c7_206 = arith.constant 7 : index
    %475 = memref.load %arg9[%c2_205, %c7_206] : memref<3x10xf32, #tpu.memory_space<smem>>
    %476 = vector.broadcast %475 : f32 to vector<10x1xf32>
    %477 = arith.select %474, %476, %472 : vector<10x1xi1>, vector<10x1xf32>
    %c8_i32_207 = arith.constant 8 : i32
    %478 = vector.broadcast %c8_i32_207 : i32 to vector<10x1xi32>
    %479 = arith.cmpi eq, %1, %478 : vector<10x1xi32>
    %c2_208 = arith.constant 2 : index
    %c8_209 = arith.constant 8 : index
    %480 = memref.load %arg9[%c2_208, %c8_209] : memref<3x10xf32, #tpu.memory_space<smem>>
    %481 = vector.broadcast %480 : f32 to vector<10x1xf32>
    %482 = arith.select %479, %481, %477 : vector<10x1xi1>, vector<10x1xf32>
    %c9_i32_210 = arith.constant 9 : i32
    %483 = vector.broadcast %c9_i32_210 : i32 to vector<10x1xi32>
    %484 = arith.cmpi eq, %1, %483 : vector<10x1xi32>
    %c2_211 = arith.constant 2 : index
    %c9_212 = arith.constant 9 : index
    %485 = memref.load %arg9[%c2_211, %c9_212] : memref<3x10xf32, #tpu.memory_space<smem>>
    %486 = vector.broadcast %485 : f32 to vector<10x1xf32>
    %487 = arith.select %484, %486, %482 : vector<10x1xi1>, vector<10x1xf32>
    %c0_213 = arith.constant 0 : index
    %c0_214 = arith.constant 0 : index
    %488 = memref.load %arg5[%c0_213, %c0_214] : memref<3x3xf32, #tpu.memory_space<smem>>
    %c0_215 = arith.constant 0 : index
    %c1_216 = arith.constant 1 : index
    %489 = memref.load %arg5[%c0_215, %c1_216] : memref<3x3xf32, #tpu.memory_space<smem>>
    %c0_217 = arith.constant 0 : index
    %c2_218 = arith.constant 2 : index
    %490 = memref.load %arg5[%c0_217, %c2_218] : memref<3x3xf32, #tpu.memory_space<smem>>
    %c1_219 = arith.constant 1 : index
    %c1_220 = arith.constant 1 : index
    %491 = memref.load %arg5[%c1_219, %c1_220] : memref<3x3xf32, #tpu.memory_space<smem>>
    %c1_221 = arith.constant 1 : index
    %c2_222 = arith.constant 2 : index
    %492 = memref.load %arg5[%c1_221, %c2_222] : memref<3x3xf32, #tpu.memory_space<smem>>
    %c2_223 = arith.constant 2 : index
    %c2_224 = arith.constant 2 : index
    %493 = memref.load %arg5[%c2_223, %c2_224] : memref<3x3xf32, #tpu.memory_space<smem>>
    %c0_225 = arith.constant 0 : index
    %c0_226 = arith.constant 0 : index
    %494 = memref.load %arg6[%c0_225, %c0_226] : memref<1x3xf32, #tpu.memory_space<smem>>
    %c0_227 = arith.constant 0 : index
    %c1_228 = arith.constant 1 : index
    %495 = memref.load %arg6[%c0_227, %c1_228] : memref<1x3xf32, #tpu.memory_space<smem>>
    %c0_229 = arith.constant 0 : index
    %c2_230 = arith.constant 2 : index
    %496 = memref.load %arg6[%c0_229, %c2_230] : memref<1x3xf32, #tpu.memory_space<smem>>
    %c0_231 = arith.constant 0 : index
    %497 = memref.load %arg7[%c0_231] : memref<1xf32, #tpu.memory_space<smem>>
    %498 = arith.mulf %491, %493 : f32
    %499 = arith.mulf %492, %492 : f32
    %500 = arith.subf %498, %499 : f32
    %501 = arith.mulf %490, %492 : f32
    %502 = arith.mulf %489, %493 : f32
    %503 = arith.subf %501, %502 : f32
    %504 = arith.mulf %489, %492 : f32
    %505 = arith.mulf %490, %491 : f32
    %506 = arith.subf %504, %505 : f32
    %507 = arith.mulf %488, %493 : f32
    %508 = arith.mulf %490, %490 : f32
    %509 = arith.subf %507, %508 : f32
    %510 = arith.mulf %489, %490 : f32
    %511 = arith.mulf %488, %492 : f32
    %512 = arith.subf %510, %511 : f32
    %513 = arith.mulf %488, %491 : f32
    %514 = arith.mulf %489, %489 : f32
    %515 = arith.subf %513, %514 : f32
    %516 = arith.mulf %488, %500 : f32
    %517 = arith.mulf %489, %503 : f32
    %518 = arith.addf %516, %517 : f32
    %519 = arith.mulf %490, %506 : f32
    %520 = arith.addf %518, %519 : f32
    %cst_232 = arith.constant 1.000000e+00 : f32
    %521 = arith.divf %cst_232, %520 : f32
    %522 = arith.mulf %500, %521 : f32
    %523 = arith.mulf %503, %521 : f32
    %524 = arith.mulf %506, %521 : f32
    %525 = arith.mulf %503, %521 : f32
    %526 = arith.mulf %509, %521 : f32
    %527 = arith.mulf %512, %521 : f32
    %528 = arith.mulf %506, %521 : f32
    %529 = arith.mulf %512, %521 : f32
    %530 = arith.mulf %515, %521 : f32
    %531 = arith.mulf %494, %522 : f32
    %532 = arith.mulf %495, %525 : f32
    %533 = arith.addf %531, %532 : f32
    %534 = arith.mulf %496, %528 : f32
    %535 = arith.addf %533, %534 : f32
    %536 = arith.mulf %494, %523 : f32
    %537 = arith.mulf %495, %526 : f32
    %538 = arith.addf %536, %537 : f32
    %539 = arith.mulf %496, %529 : f32
    %540 = arith.addf %538, %539 : f32
    %541 = arith.mulf %494, %524 : f32
    %542 = arith.mulf %495, %527 : f32
    %543 = arith.addf %541, %542 : f32
    %544 = arith.mulf %496, %530 : f32
    %545 = arith.addf %543, %544 : f32
    %546 = arith.mulf %535, %494 : f32
    %547 = arith.mulf %540, %495 : f32
    %548 = arith.addf %546, %547 : f32
    %549 = arith.mulf %545, %496 : f32
    %550 = arith.addf %548, %549 : f32
    %cst_233 = arith.constant 9.99999968E-21 : f32
    %551 = arith.maximumf %550, %cst_233 : f32
    %cst_234 = arith.constant 1.000000e+00 : f32
    %552 = arith.divf %cst_234, %551 : f32
    %553 = vector.broadcast %522 : f32 to vector<10x1xf32>
    %554 = arith.mulf %385, %553 : vector<10x1xf32>
    %555 = vector.broadcast %525 : f32 to vector<10x1xf32>
    %556 = arith.mulf %436, %555 : vector<10x1xf32>
    %557 = arith.addf %554, %556 : vector<10x1xf32>
    %558 = vector.broadcast %528 : f32 to vector<10x1xf32>
    %559 = arith.mulf %487, %558 : vector<10x1xf32>
    %560 = arith.addf %557, %559 : vector<10x1xf32>
    %cst_235 = arith.constant 0.000000e+00 : f32
    %561 = vector.broadcast %cst_235 : f32 to vector<10x1xf32>
    %562 = arith.subf %561, %560 : vector<10x1xf32>
    %563 = vector.broadcast %523 : f32 to vector<10x1xf32>
    %564 = arith.mulf %385, %563 : vector<10x1xf32>
    %565 = vector.broadcast %526 : f32 to vector<10x1xf32>
    %566 = arith.mulf %436, %565 : vector<10x1xf32>
    %567 = arith.addf %564, %566 : vector<10x1xf32>
    %568 = vector.broadcast %529 : f32 to vector<10x1xf32>
    %569 = arith.mulf %487, %568 : vector<10x1xf32>
    %570 = arith.addf %567, %569 : vector<10x1xf32>
    %cst_236 = arith.constant 0.000000e+00 : f32
    %571 = vector.broadcast %cst_236 : f32 to vector<10x1xf32>
    %572 = arith.subf %571, %570 : vector<10x1xf32>
    %573 = vector.broadcast %524 : f32 to vector<10x1xf32>
    %574 = arith.mulf %385, %573 : vector<10x1xf32>
    %575 = vector.broadcast %527 : f32 to vector<10x1xf32>
    %576 = arith.mulf %436, %575 : vector<10x1xf32>
    %577 = arith.addf %574, %576 : vector<10x1xf32>
    %578 = vector.broadcast %530 : f32 to vector<10x1xf32>
    %579 = arith.mulf %487, %578 : vector<10x1xf32>
    %580 = arith.addf %577, %579 : vector<10x1xf32>
    %cst_237 = arith.constant 0.000000e+00 : f32
    %581 = vector.broadcast %cst_237 : f32 to vector<10x1xf32>
    %582 = arith.subf %581, %580 : vector<10x1xf32>
    %583 = vector.broadcast %494 : f32 to vector<10x1xf32>
    %584 = arith.mulf %583, %562 : vector<10x1xf32>
    %585 = vector.broadcast %495 : f32 to vector<10x1xf32>
    %586 = arith.mulf %585, %572 : vector<10x1xf32>
    %587 = arith.addf %584, %586 : vector<10x1xf32>
    %588 = vector.broadcast %496 : f32 to vector<10x1xf32>
    %589 = arith.mulf %588, %582 : vector<10x1xf32>
    %590 = arith.addf %587, %589 : vector<10x1xf32>
    %591 = vector.broadcast %497 : f32 to vector<10x1xf32>
    %592 = arith.subf %590, %591 : vector<10x1xf32>
    %cst_238 = arith.constant 0.000000e+00 : f32
    %593 = vector.broadcast %cst_238 : f32 to vector<10x1xf32>
    %594 = arith.maximumf %592, %593 : vector<10x1xf32>
    %595 = vector.broadcast %552 : f32 to vector<10x1xf32>
    %596 = arith.mulf %594, %595 : vector<10x1xf32>
    %597 = vector.broadcast %535 : f32 to vector<10x1xf32>
    %598 = arith.mulf %596, %597 : vector<10x1xf32>
    %599 = arith.subf %562, %598 : vector<10x1xf32>
    %600 = vector.broadcast %540 : f32 to vector<10x1xf32>
    %601 = arith.mulf %596, %600 : vector<10x1xf32>
    %602 = arith.subf %572, %601 : vector<10x1xf32>
    %603 = vector.broadcast %545 : f32 to vector<10x1xf32>
    %604 = arith.mulf %596, %603 : vector<10x1xf32>
    %605 = arith.subf %582, %604 : vector<10x1xf32>
    %606 = arith.maximumf %599, %602 : vector<10x1xf32>
    %607 = arith.maximumf %606, %605 : vector<10x1xf32>
    %608 = arith.subf %599, %607 : vector<10x1xf32>
    %609 = math.exp %608 : vector<10x1xf32>
    %610 = arith.subf %602, %607 : vector<10x1xf32>
    %611 = math.exp %610 : vector<10x1xf32>
    %612 = arith.addf %609, %611 : vector<10x1xf32>
    %613 = arith.subf %605, %607 : vector<10x1xf32>
    %614 = math.exp %613 : vector<10x1xf32>
    %615 = arith.addf %612, %614 : vector<10x1xf32>
    %616 = math.log %615 : vector<10x1xf32>
    %617 = arith.addf %616, %607 : vector<10x1xf32>
    %618 = arith.subf %617, %599 : vector<10x1xf32>
    %619 = arith.subf %617, %602 : vector<10x1xf32>
    %620 = arith.subf %617, %605 : vector<10x1xf32>
    %621 = arith.maximumf %618, %619 : vector<10x1xf32>
    %622 = arith.maximumf %621, %620 : vector<10x1xf32>
    %623 = vector.shape_cast %622 : vector<10x1xf32> to vector<1x10x1xf32>
    %cst_239 = arith.constant dense<0xFF800000> : vector<1xf32>
    %624 = vector.multi_reduction <maximumf>, %623, %cst_239 [1, 2] : vector<1x10x1xf32> to vector<1xf32>
    %625 = vector.shape_cast %624 : vector<1xf32> to vector<1x1x1xf32>
    %626 = vector.extract %625[0, 0, 0] : f32 from vector<1x1x1xf32>
    %627 = vector.broadcast %626 : f32 to vector<1x1xf32>
    %628 = vector.broadcast %627 : vector<1x1xf32> to vector<10x1xf32>
    %629 = arith.divf %618, %628 : vector<10x1xf32>
    %630 = vector.broadcast %627 : vector<1x1xf32> to vector<10x1xf32>
    %631 = arith.divf %619, %630 : vector<10x1xf32>
    %632 = vector.broadcast %627 : vector<1x1xf32> to vector<10x1xf32>
    %633 = arith.divf %620, %632 : vector<10x1xf32>
    %cst_240 = arith.constant 0.000000e+00 : f32
    %634 = vector.broadcast %cst_240 : f32 to vector<10x100xf32>
    %c0_241 = arith.constant 0 : index
    %c0_242 = arith.constant 0 : index
    %635 = memref.load %arg8[%c0_241, %c0_242] : memref<3x2xi32, #tpu.memory_space<smem>>
    %c1_i32_243 = arith.constant 1 : i32
    %636 = arith.subi %635, %c1_i32_243 : i32
    %c10_i32_244 = arith.constant 10 : i32
    %637 = arith.muli %636, %c10_i32_244 : i32
    %c0_245 = arith.constant 0 : index
    %c1_246 = arith.constant 1 : index
    %638 = memref.load %arg8[%c0_245, %c1_246] : memref<3x2xi32, #tpu.memory_space<smem>>
    %c1_i32_247 = arith.constant 1 : i32
    %639 = arith.subi %638, %c1_i32_247 : i32
    %640 = arith.addi %637, %639 : i32
    %641 = vector.broadcast %640 : i32 to vector<10x100xi32>
    %642 = arith.cmpi eq, %0, %641 : vector<10x100xi32>
    %643 = vector.shape_cast %629 : vector<10x1xf32> to vector<10x1xf32>
    %644 = vector.broadcast %643 : vector<10x1xf32> to vector<10x100xf32>
    %645 = arith.select %642, %644, %634 : vector<10x100xi1>, vector<10x100xf32>
    %c1_248 = arith.constant 1 : index
    %c0_249 = arith.constant 0 : index
    %646 = memref.load %arg8[%c1_248, %c0_249] : memref<3x2xi32, #tpu.memory_space<smem>>
    %c1_i32_250 = arith.constant 1 : i32
    %647 = arith.subi %646, %c1_i32_250 : i32
    %c10_i32_251 = arith.constant 10 : i32
    %648 = arith.muli %647, %c10_i32_251 : i32
    %c1_252 = arith.constant 1 : index
    %c1_253 = arith.constant 1 : index
    %649 = memref.load %arg8[%c1_252, %c1_253] : memref<3x2xi32, #tpu.memory_space<smem>>
    %c1_i32_254 = arith.constant 1 : i32
    %650 = arith.subi %649, %c1_i32_254 : i32
    %651 = arith.addi %648, %650 : i32
    %652 = vector.broadcast %651 : i32 to vector<10x100xi32>
    %653 = arith.cmpi eq, %0, %652 : vector<10x100xi32>
    %654 = vector.shape_cast %631 : vector<10x1xf32> to vector<10x1xf32>
    %655 = vector.broadcast %654 : vector<10x1xf32> to vector<10x100xf32>
    %656 = arith.select %653, %655, %645 : vector<10x100xi1>, vector<10x100xf32>
    %c2_255 = arith.constant 2 : index
    %c0_256 = arith.constant 0 : index
    %657 = memref.load %arg8[%c2_255, %c0_256] : memref<3x2xi32, #tpu.memory_space<smem>>
    %c1_i32_257 = arith.constant 1 : i32
    %658 = arith.subi %657, %c1_i32_257 : i32
    %c10_i32_258 = arith.constant 10 : i32
    %659 = arith.muli %658, %c10_i32_258 : i32
    %c2_259 = arith.constant 2 : index
    %c1_260 = arith.constant 1 : index
    %660 = memref.load %arg8[%c2_259, %c1_260] : memref<3x2xi32, #tpu.memory_space<smem>>
    %c1_i32_261 = arith.constant 1 : i32
    %661 = arith.subi %660, %c1_i32_261 : i32
    %662 = arith.addi %659, %661 : i32
    %663 = vector.broadcast %662 : i32 to vector<10x100xi32>
    %664 = arith.cmpi eq, %0, %663 : vector<10x100xi32>
    %665 = vector.shape_cast %633 : vector<10x1xf32> to vector<10x1xf32>
    %666 = vector.broadcast %665 : vector<10x1xf32> to vector<10x100xf32>
    %667 = arith.select %664, %666, %656 : vector<10x100xi1>, vector<10x100xf32>
    %c0_262 = arith.constant 0 : index
    %c0_263 = arith.constant 0 : index
    %c0_264 = arith.constant 0 : index
    %668 = vector.load %arg10[%c0_262, %c0_263, %c0_264] : memref<2x10x100xf32, #tpu.memory_space<vmem>>, vector<1x10x100xf32>
    %669 = vector.shape_cast %668 : vector<1x10x100xf32> to vector<10x100xf32>
    %670 = vector.shape_cast %334 : vector<10x100xf32> to vector<1x10x100xf32>
    tpu.vector_store %arg10[%c0_262, %c0_263, %c0_264], %670 {strides = array<i32>} : memref<2x10x100xf32, #tpu.memory_space<vmem>>, vector<1x10x100xf32>,
    %c1_265 = arith.constant 1 : index
    %c0_266 = arith.constant 0 : index
    %c0_267 = arith.constant 0 : index
    %671 = vector.load %arg10[%c1_265, %c0_266, %c0_267] : memref<2x10x100xf32, #tpu.memory_space<vmem>>, vector<1x10x100xf32>
    %672 = vector.shape_cast %671 : vector<1x10x100xf32> to vector<10x100xf32>
    %673 = vector.shape_cast %667 : vector<10x100xf32> to vector<1x10x100xf32>
    tpu.vector_store %arg10[%c1_265, %c0_266, %c0_267], %673 {strides = array<i32>} : memref<2x10x100xf32, #tpu.memory_space<vmem>>, vector<1x10x100xf32>,
    %674 = vector.extract_strided_slice %334 {offsets = [0, 0], sizes = [10, 1], strides = [1, 1]} : vector<10x100xf32> to vector<10x1xf32>
    %675 = vector.extract_strided_slice %667 {offsets = [0, 0], sizes = [10, 1], strides = [1, 1]} : vector<10x100xf32> to vector<10x1xf32>
    %676 = vector.extract_strided_slice %334 {offsets = [0, 50], sizes = [10, 1], strides = [1, 1]} : vector<10x100xf32> to vector<10x1xf32>
    %677 = vector.extract_strided_slice %667 {offsets = [0, 50], sizes = [10, 1], strides = [1, 1]} : vector<10x100xf32> to vector<10x1xf32>
    %cst_268 = arith.constant dense<0.000000e+00> : vector<10xf32>
    %678 = vector.multi_reduction <add>, %334, %cst_268 [1] : vector<10x100xf32> to vector<10xf32>
    %679 = vector.shape_cast %678 : vector<10xf32> to vector<10x1xf32>
    %cst_269 = arith.constant dense<0.000000e+00> : vector<10xf32>
    %680 = vector.multi_reduction <add>, %667, %cst_269 [1] : vector<10x100xf32> to vector<10xf32>
    %681 = vector.shape_cast %680 : vector<10xf32> to vector<10x1xf32>
    %cst_270 = arith.constant 0.000000e+00 : f32
    %682 = vector.broadcast %cst_270 : f32 to vector<1x100xf32>
    %c0_i32_271 = arith.constant 0 : i32
    %683 = arith.subf %674, %676 : vector<10x1xf32>
    %684 = arith.subf %675, %677 : vector<10x1xf32>
    %685 = arith.addf %674, %676 : vector<10x1xf32>
    %686 = arith.mulf %683, %685 : vector<10x1xf32>
    %687 = vector.shape_cast %686 : vector<10x1xf32> to vector<1x10x1xf32>
    %cst_272 = arith.constant dense<0.000000e+00> : vector<1xf32>
    %688 = vector.multi_reduction <add>, %687, %cst_272 [1, 2] : vector<1x10x1xf32> to vector<1xf32>
    %689 = vector.shape_cast %688 : vector<1xf32> to vector<1x1x1xf32>
    %690 = vector.extract %689[0, 0, 0] : f32 from vector<1x1x1xf32>
    %691 = vector.broadcast %690 : f32 to vector<1x1xf32>
    %692 = arith.addf %675, %677 : vector<10x1xf32>
    %693 = arith.mulf %684, %692 : vector<10x1xf32>
    %694 = vector.shape_cast %693 : vector<10x1xf32> to vector<1x10x1xf32>
    %cst_273 = arith.constant dense<0.000000e+00> : vector<1xf32>
    %695 = vector.multi_reduction <add>, %694, %cst_273 [1, 2] : vector<1x10x1xf32> to vector<1xf32>
    %696 = vector.shape_cast %695 : vector<1xf32> to vector<1x1x1xf32>
    %697 = vector.extract %696[0, 0, 0] : f32 from vector<1x1x1xf32>
    %698 = vector.broadcast %697 : f32 to vector<1x1xf32>
    %699 = arith.addf %691, %698 : vector<1x1xf32>
    %cst_274 = arith.constant 5.000000e-01 : f32
    %700 = vector.broadcast %cst_274 : f32 to vector<1x1xf32>
    %701 = arith.mulf %700, %699 : vector<1x1xf32>
    %702 = vector.broadcast %683 : vector<10x1xf32> to vector<10x100xf32>
    %703 = arith.mulf %334, %702 : vector<10x100xf32>
    %cst_275 = arith.constant dense<0.000000e+00> : vector<100xf32>
    %704 = vector.multi_reduction <add>, %703, %cst_275 [0] : vector<10x100xf32> to vector<100xf32>
    %705 = vector.shape_cast %704 : vector<100xf32> to vector<1x100xf32>
    %706 = vector.broadcast %684 : vector<10x1xf32> to vector<10x100xf32>
    %707 = arith.mulf %667, %706 : vector<10x100xf32>
    %cst_276 = arith.constant dense<0.000000e+00> : vector<100xf32>
    %708 = vector.multi_reduction <add>, %707, %cst_276 [0] : vector<10x100xf32> to vector<100xf32>
    %709 = vector.shape_cast %708 : vector<100xf32> to vector<1x100xf32>
    %710 = arith.addf %705, %709 : vector<1x100xf32>
    %711 = vector.broadcast %701 : vector<1x1xf32> to vector<1x100xf32>
    %712 = arith.cmpf olt, %710, %711 : vector<1x100xf32>
    %713 = arith.extui %712 : vector<1x100xi1> to vector<1x100xi32>
    %714 = arith.sitofp %713 : vector<1x100xi32> to vector<1x100xf32>
    %715 = vector.shape_cast %714 : vector<1x100xf32> to vector<1x1x100xf32>
    %cst_277 = arith.constant dense<0.000000e+00> : vector<1xf32>
    %716 = vector.multi_reduction <add>, %715, %cst_277 [1, 2] : vector<1x1x100xf32> to vector<1xf32>
    %717 = vector.shape_cast %716 : vector<1xf32> to vector<1x1x1xf32>
    %718 = vector.extract %717[0, 0, 0] : f32 from vector<1x1x1xf32>
    %719 = vector.broadcast %718 : f32 to vector<1x1xf32>
    %cst_278 = arith.constant 1.000000e+02 : f32
    %720 = vector.broadcast %cst_278 : f32 to vector<1x1xf32>
    %721 = arith.subf %720, %719 : vector<1x1xf32>
    %722 = vector.broadcast %714 : vector<1x100xf32> to vector<10x100xf32>
    %723 = arith.mulf %334, %722 : vector<10x100xf32>
    %cst_279 = arith.constant dense<0.000000e+00> : vector<10xf32>
    %724 = vector.multi_reduction <add>, %723, %cst_279 [1] : vector<10x100xf32> to vector<10xf32>
    %725 = vector.shape_cast %724 : vector<10xf32> to vector<10x1xf32>
    %726 = vector.broadcast %714 : vector<1x100xf32> to vector<10x100xf32>
    %727 = arith.mulf %667, %726 : vector<10x100xf32>
    %cst_280 = arith.constant dense<0.000000e+00> : vector<10xf32>
    %728 = vector.multi_reduction <add>, %727, %cst_280 [1] : vector<10x100xf32> to vector<10xf32>
    %729 = vector.shape_cast %728 : vector<10xf32> to vector<10x1xf32>
    %730 = arith.subf %679, %725 : vector<10x1xf32>
    %731 = arith.subf %681, %729 : vector<10x1xf32>
    %cst_281 = arith.constant 1.000000e+00 : f32
    %732 = vector.broadcast %cst_281 : f32 to vector<1x1xf32>
    %733 = arith.maximumf %719, %732 : vector<1x1xf32>
    %734 = tpu.reciprocal %733 {approx = true} : vector<1x1xf32> -> vector<1x1xf32>
    %cst_282 = arith.constant 1.000000e+00 : f32
    %735 = vector.broadcast %cst_282 : f32 to vector<1x1xf32>
    %736 = arith.maximumf %721, %735 : vector<1x1xf32>
    %737 = tpu.reciprocal %736 {approx = true} : vector<1x1xf32> -> vector<1x1xf32>
    %cst_283 = arith.constant 0.000000e+00 : f32
    %738 = vector.broadcast %cst_283 : f32 to vector<1x1xf32>
    %739 = arith.cmpf ogt, %721, %738 : vector<1x1xf32>
    %cst_284 = arith.constant 0.000000e+00 : f32
    %740 = vector.broadcast %cst_284 : f32 to vector<1x1xf32>
    %741 = arith.cmpf ogt, %719, %740 : vector<1x1xf32>
    %742 = vector.broadcast %737 : vector<1x1xf32> to vector<10x1xf32>
    %743 = arith.mulf %730, %742 : vector<10x1xf32>
    %744 = vector.shape_cast %739 : vector<1x1xi1> to vector<1x1xi1>
    %745 = vector.broadcast %744 : vector<1x1xi1> to vector<10x1xi1>
    %746 = arith.select %745, %743, %674 : vector<10x1xi1>, vector<10x1xf32>
    %747 = vector.broadcast %737 : vector<1x1xf32> to vector<10x1xf32>
    %748 = arith.mulf %731, %747 : vector<10x1xf32>
    %749 = vector.shape_cast %739 : vector<1x1xi1> to vector<1x1xi1>
    %750 = vector.broadcast %749 : vector<1x1xi1> to vector<10x1xi1>
    %751 = arith.select %750, %748, %675 : vector<10x1xi1>, vector<10x1xf32>
    %752 = vector.broadcast %734 : vector<1x1xf32> to vector<10x1xf32>
    %753 = arith.mulf %725, %752 : vector<10x1xf32>
    %754 = vector.shape_cast %741 : vector<1x1xi1> to vector<1x1xi1>
    %755 = vector.broadcast %754 : vector<1x1xi1> to vector<10x1xi1>
    %756 = arith.select %755, %753, %676 : vector<10x1xi1>, vector<10x1xf32>
    %757 = vector.broadcast %734 : vector<1x1xf32> to vector<10x1xf32>
    %758 = arith.mulf %729, %757 : vector<10x1xf32>
    %759 = vector.shape_cast %741 : vector<1x1xi1> to vector<1x1xi1>
    %760 = vector.broadcast %759 : vector<1x1xi1> to vector<10x1xi1>
    %761 = arith.select %760, %758, %677 : vector<10x1xi1>, vector<10x1xf32>
    %c1_i32_285 = arith.constant 1 : i32
    %762 = arith.subf %746, %756 : vector<10x1xf32>
    %763 = arith.subf %751, %761 : vector<10x1xf32>
    %764 = arith.addf %746, %756 : vector<10x1xf32>
    %765 = arith.mulf %762, %764 : vector<10x1xf32>
    %766 = vector.shape_cast %765 : vector<10x1xf32> to vector<1x10x1xf32>
    %cst_286 = arith.constant dense<0.000000e+00> : vector<1xf32>
    %767 = vector.multi_reduction <add>, %766, %cst_286 [1, 2] : vector<1x10x1xf32> to vector<1xf32>
    %768 = vector.shape_cast %767 : vector<1xf32> to vector<1x1x1xf32>
    %769 = vector.extract %768[0, 0, 0] : f32 from vector<1x1x1xf32>
    %770 = vector.broadcast %769 : f32 to vector<1x1xf32>
    %771 = arith.addf %751, %761 : vector<10x1xf32>
    %772 = arith.mulf %763, %771 : vector<10x1xf32>
    %773 = vector.shape_cast %772 : vector<10x1xf32> to vector<1x10x1xf32>
    %cst_287 = arith.constant dense<0.000000e+00> : vector<1xf32>
    %774 = vector.multi_reduction <add>, %773, %cst_287 [1, 2] : vector<1x10x1xf32> to vector<1xf32>
    %775 = vector.shape_cast %774 : vector<1xf32> to vector<1x1x1xf32>
    %776 = vector.extract %775[0, 0, 0] : f32 from vector<1x1x1xf32>
    %777 = vector.broadcast %776 : f32 to vector<1x1xf32>
    %778 = arith.addf %770, %777 : vector<1x1xf32>
    %cst_288 = arith.constant 5.000000e-01 : f32
    %779 = vector.broadcast %cst_288 : f32 to vector<1x1xf32>
    %780 = arith.mulf %779, %778 : vector<1x1xf32>
    %781 = vector.broadcast %762 : vector<10x1xf32> to vector<10x100xf32>
    %782 = arith.mulf %334, %781 : vector<10x100xf32>
    %cst_289 = arith.constant dense<0.000000e+00> : vector<100xf32>
    %783 = vector.multi_reduction <add>, %782, %cst_289 [0] : vector<10x100xf32> to vector<100xf32>
    %784 = vector.shape_cast %783 : vector<100xf32> to vector<1x100xf32>
    %785 = vector.broadcast %763 : vector<10x1xf32> to vector<10x100xf32>
    %786 = arith.mulf %667, %785 : vector<10x100xf32>
    %cst_290 = arith.constant dense<0.000000e+00> : vector<100xf32>
    %787 = vector.multi_reduction <add>, %786, %cst_290 [0] : vector<10x100xf32> to vector<100xf32>
    %788 = vector.shape_cast %787 : vector<100xf32> to vector<1x100xf32>
    %789 = arith.addf %784, %788 : vector<1x100xf32>
    %790 = vector.broadcast %780 : vector<1x1xf32> to vector<1x100xf32>
    %791 = arith.cmpf olt, %789, %790 : vector<1x100xf32>
    %792 = arith.extui %791 : vector<1x100xi1> to vector<1x100xi32>
    %793 = arith.sitofp %792 : vector<1x100xi32> to vector<1x100xf32>
    %794 = vector.shape_cast %793 : vector<1x100xf32> to vector<1x1x100xf32>
    %cst_291 = arith.constant dense<0.000000e+00> : vector<1xf32>
    %795 = vector.multi_reduction <add>, %794, %cst_291 [1, 2] : vector<1x1x100xf32> to vector<1xf32>
    %796 = vector.shape_cast %795 : vector<1xf32> to vector<1x1x1xf32>
    %797 = vector.extract %796[0, 0, 0] : f32 from vector<1x1x1xf32>
    %798 = vector.broadcast %797 : f32 to vector<1x1xf32>
    %cst_292 = arith.constant 1.000000e+02 : f32
    %799 = vector.broadcast %cst_292 : f32 to vector<1x1xf32>
    %800 = arith.subf %799, %798 : vector<1x1xf32>
    %801 = vector.broadcast %793 : vector<1x100xf32> to vector<10x100xf32>
    %802 = arith.mulf %334, %801 : vector<10x100xf32>
    %cst_293 = arith.constant dense<0.000000e+00> : vector<10xf32>
    %803 = vector.multi_reduction <add>, %802, %cst_293 [1] : vector<10x100xf32> to vector<10xf32>
    %804 = vector.shape_cast %803 : vector<10xf32> to vector<10x1xf32>
    %805 = vector.broadcast %793 : vector<1x100xf32> to vector<10x100xf32>
    %806 = arith.mulf %667, %805 : vector<10x100xf32>
    %cst_294 = arith.constant dense<0.000000e+00> : vector<10xf32>
    %807 = vector.multi_reduction <add>, %806, %cst_294 [1] : vector<10x100xf32> to vector<10xf32>
    %808 = vector.shape_cast %807 : vector<10xf32> to vector<10x1xf32>
    %809 = arith.subf %679, %804 : vector<10x1xf32>
    %810 = arith.subf %681, %808 : vector<10x1xf32>
    %cst_295 = arith.constant 1.000000e+00 : f32
    %811 = vector.broadcast %cst_295 : f32 to vector<1x1xf32>
    %812 = arith.maximumf %798, %811 : vector<1x1xf32>
    %813 = tpu.reciprocal %812 {approx = true} : vector<1x1xf32> -> vector<1x1xf32>
    %cst_296 = arith.constant 1.000000e+00 : f32
    %814 = vector.broadcast %cst_296 : f32 to vector<1x1xf32>
    %815 = arith.maximumf %800, %814 : vector<1x1xf32>
    %816 = tpu.reciprocal %815 {approx = true} : vector<1x1xf32> -> vector<1x1xf32>
    %cst_297 = arith.constant 0.000000e+00 : f32
    %817 = vector.broadcast %cst_297 : f32 to vector<1x1xf32>
    %818 = arith.cmpf ogt, %800, %817 : vector<1x1xf32>
    %cst_298 = arith.constant 0.000000e+00 : f32
    %819 = vector.broadcast %cst_298 : f32 to vector<1x1xf32>
    %820 = arith.cmpf ogt, %798, %819 : vector<1x1xf32>
    %821 = vector.broadcast %816 : vector<1x1xf32> to vector<10x1xf32>
    %822 = arith.mulf %809, %821 : vector<10x1xf32>
    %823 = vector.shape_cast %818 : vector<1x1xi1> to vector<1x1xi1>
    %824 = vector.broadcast %823 : vector<1x1xi1> to vector<10x1xi1>
    %825 = arith.select %824, %822, %746 : vector<10x1xi1>, vector<10x1xf32>
    %826 = vector.broadcast %816 : vector<1x1xf32> to vector<10x1xf32>
    %827 = arith.mulf %810, %826 : vector<10x1xf32>
    %828 = vector.shape_cast %818 : vector<1x1xi1> to vector<1x1xi1>
    %829 = vector.broadcast %828 : vector<1x1xi1> to vector<10x1xi1>
    %830 = arith.select %829, %827, %751 : vector<10x1xi1>, vector<10x1xf32>
    %831 = vector.broadcast %813 : vector<1x1xf32> to vector<10x1xf32>
    %832 = arith.mulf %804, %831 : vector<10x1xf32>
    %833 = vector.shape_cast %820 : vector<1x1xi1> to vector<1x1xi1>
    %834 = vector.broadcast %833 : vector<1x1xi1> to vector<10x1xi1>
    %835 = arith.select %834, %832, %756 : vector<10x1xi1>, vector<10x1xf32>
    %836 = vector.broadcast %813 : vector<1x1xf32> to vector<10x1xf32>
    %837 = arith.mulf %808, %836 : vector<10x1xf32>
    %838 = vector.shape_cast %820 : vector<1x1xi1> to vector<1x1xi1>
    %839 = vector.broadcast %838 : vector<1x1xi1> to vector<10x1xi1>
    %840 = arith.select %839, %837, %761 : vector<10x1xi1>, vector<10x1xf32>
    %c2_i32_299 = arith.constant 2 : i32
    %841 = arith.subf %825, %835 : vector<10x1xf32>
    %842 = arith.subf %830, %840 : vector<10x1xf32>
    %843 = arith.addf %825, %835 : vector<10x1xf32>
    %844 = arith.mulf %841, %843 : vector<10x1xf32>
    %845 = vector.shape_cast %844 : vector<10x1xf32> to vector<1x10x1xf32>
    %cst_300 = arith.constant dense<0.000000e+00> : vector<1xf32>
    %846 = vector.multi_reduction <add>, %845, %cst_300 [1, 2] : vector<1x10x1xf32> to vector<1xf32>
    %847 = vector.shape_cast %846 : vector<1xf32> to vector<1x1x1xf32>
    %848 = vector.extract %847[0, 0, 0] : f32 from vector<1x1x1xf32>
    %849 = vector.broadcast %848 : f32 to vector<1x1xf32>
    %850 = arith.addf %830, %840 : vector<10x1xf32>
    %851 = arith.mulf %842, %850 : vector<10x1xf32>
    %852 = vector.shape_cast %851 : vector<10x1xf32> to vector<1x10x1xf32>
    %cst_301 = arith.constant dense<0.000000e+00> : vector<1xf32>
    %853 = vector.multi_reduction <add>, %852, %cst_301 [1, 2] : vector<1x10x1xf32> to vector<1xf32>
    %854 = vector.shape_cast %853 : vector<1xf32> to vector<1x1x1xf32>
    %855 = vector.extract %854[0, 0, 0] : f32 from vector<1x1x1xf32>
    %856 = vector.broadcast %855 : f32 to vector<1x1xf32>
    %857 = arith.addf %849, %856 : vector<1x1xf32>
    %cst_302 = arith.constant 5.000000e-01 : f32
    %858 = vector.broadcast %cst_302 : f32 to vector<1x1xf32>
    %859 = arith.mulf %858, %857 : vector<1x1xf32>
    %860 = vector.broadcast %841 : vector<10x1xf32> to vector<10x100xf32>
    %861 = arith.mulf %334, %860 : vector<10x100xf32>
    %cst_303 = arith.constant dense<0.000000e+00> : vector<100xf32>
    %862 = vector.multi_reduction <add>, %861, %cst_303 [0] : vector<10x100xf32> to vector<100xf32>
    %863 = vector.shape_cast %862 : vector<100xf32> to vector<1x100xf32>
    %864 = vector.broadcast %842 : vector<10x1xf32> to vector<10x100xf32>
    %865 = arith.mulf %667, %864 : vector<10x100xf32>
    %cst_304 = arith.constant dense<0.000000e+00> : vector<100xf32>
    %866 = vector.multi_reduction <add>, %865, %cst_304 [0] : vector<10x100xf32> to vector<100xf32>
    %867 = vector.shape_cast %866 : vector<100xf32> to vector<1x100xf32>
    %868 = arith.addf %863, %867 : vector<1x100xf32>
    %869 = vector.broadcast %859 : vector<1x1xf32> to vector<1x100xf32>
    %870 = arith.cmpf olt, %868, %869 : vector<1x100xf32>
    %871 = arith.extui %870 : vector<1x100xi1> to vector<1x100xi32>
    %872 = arith.sitofp %871 : vector<1x100xi32> to vector<1x100xf32>
    %873 = vector.shape_cast %872 : vector<1x100xf32> to vector<1x1x100xf32>
    %cst_305 = arith.constant dense<0.000000e+00> : vector<1xf32>
    %874 = vector.multi_reduction <add>, %873, %cst_305 [1, 2] : vector<1x1x100xf32> to vector<1xf32>
    %875 = vector.shape_cast %874 : vector<1xf32> to vector<1x1x1xf32>
    %876 = vector.extract %875[0, 0, 0] : f32 from vector<1x1x1xf32>
    %877 = vector.broadcast %876 : f32 to vector<1x1xf32>
    %cst_306 = arith.constant 1.000000e+02 : f32
    %878 = vector.broadcast %cst_306 : f32 to vector<1x1xf32>
    %879 = arith.subf %878, %877 : vector<1x1xf32>
    %880 = vector.broadcast %872 : vector<1x100xf32> to vector<10x100xf32>
    %881 = arith.mulf %334, %880 : vector<10x100xf32>
    %cst_307 = arith.constant dense<0.000000e+00> : vector<10xf32>
    %882 = vector.multi_reduction <add>, %881, %cst_307 [1] : vector<10x100xf32> to vector<10xf32>
    %883 = vector.shape_cast %882 : vector<10xf32> to vector<10x1xf32>
    %884 = vector.broadcast %872 : vector<1x100xf32> to vector<10x100xf32>
    %885 = arith.mulf %667, %884 : vector<10x100xf32>
    %cst_308 = arith.constant dense<0.000000e+00> : vector<10xf32>
    %886 = vector.multi_reduction <add>, %885, %cst_308 [1] : vector<10x100xf32> to vector<10xf32>
    %887 = vector.shape_cast %886 : vector<10xf32> to vector<10x1xf32>
    %888 = arith.subf %679, %883 : vector<10x1xf32>
    %889 = arith.subf %681, %887 : vector<10x1xf32>
    %cst_309 = arith.constant 1.000000e+00 : f32
    %890 = vector.broadcast %cst_309 : f32 to vector<1x1xf32>
    %891 = arith.maximumf %877, %890 : vector<1x1xf32>
    %892 = tpu.reciprocal %891 {approx = true} : vector<1x1xf32> -> vector<1x1xf32>
    %cst_310 = arith.constant 1.000000e+00 : f32
    %893 = vector.broadcast %cst_310 : f32 to vector<1x1xf32>
    %894 = arith.maximumf %879, %893 : vector<1x1xf32>
    %895 = tpu.reciprocal %894 {approx = true} : vector<1x1xf32> -> vector<1x1xf32>
    %cst_311 = arith.constant 0.000000e+00 : f32
    %896 = vector.broadcast %cst_311 : f32 to vector<1x1xf32>
    %897 = arith.cmpf ogt, %879, %896 : vector<1x1xf32>
    %cst_312 = arith.constant 0.000000e+00 : f32
    %898 = vector.broadcast %cst_312 : f32 to vector<1x1xf32>
    %899 = arith.cmpf ogt, %877, %898 : vector<1x1xf32>
    %900 = vector.broadcast %895 : vector<1x1xf32> to vector<10x1xf32>
    %901 = arith.mulf %888, %900 : vector<10x1xf32>
    %902 = vector.shape_cast %897 : vector<1x1xi1> to vector<1x1xi1>
    %903 = vector.broadcast %902 : vector<1x1xi1> to vector<10x1xi1>
    %904 = arith.select %903, %901, %825 : vector<10x1xi1>, vector<10x1xf32>
    %905 = vector.broadcast %895 : vector<1x1xf32> to vector<10x1xf32>
    %906 = arith.mulf %889, %905 : vector<10x1xf32>
    %907 = vector.shape_cast %897 : vector<1x1xi1> to vector<1x1xi1>
    %908 = vector.broadcast %907 : vector<1x1xi1> to vector<10x1xi1>
    %909 = arith.select %908, %906, %830 : vector<10x1xi1>, vector<10x1xf32>
    %910 = vector.broadcast %892 : vector<1x1xf32> to vector<10x1xf32>
    %911 = arith.mulf %883, %910 : vector<10x1xf32>
    %912 = vector.shape_cast %899 : vector<1x1xi1> to vector<1x1xi1>
    %913 = vector.broadcast %912 : vector<1x1xi1> to vector<10x1xi1>
    %914 = arith.select %913, %911, %835 : vector<10x1xi1>, vector<10x1xf32>
    %915 = vector.broadcast %892 : vector<1x1xf32> to vector<10x1xf32>
    %916 = arith.mulf %887, %915 : vector<10x1xf32>
    %917 = vector.shape_cast %899 : vector<1x1xi1> to vector<1x1xi1>
    %918 = vector.broadcast %917 : vector<1x1xi1> to vector<10x1xi1>
    %919 = arith.select %918, %916, %840 : vector<10x1xi1>, vector<10x1xf32>
    %c3_i32_313 = arith.constant 3 : i32
    %920 = arith.subf %904, %914 : vector<10x1xf32>
    %921 = arith.subf %909, %919 : vector<10x1xf32>
    %922 = arith.addf %904, %914 : vector<10x1xf32>
    %923 = arith.mulf %920, %922 : vector<10x1xf32>
    %924 = vector.shape_cast %923 : vector<10x1xf32> to vector<1x10x1xf32>
    %cst_314 = arith.constant dense<0.000000e+00> : vector<1xf32>
    %925 = vector.multi_reduction <add>, %924, %cst_314 [1, 2] : vector<1x10x1xf32> to vector<1xf32>
    %926 = vector.shape_cast %925 : vector<1xf32> to vector<1x1x1xf32>
    %927 = vector.extract %926[0, 0, 0] : f32 from vector<1x1x1xf32>
    %928 = vector.broadcast %927 : f32 to vector<1x1xf32>
    %929 = arith.addf %909, %919 : vector<10x1xf32>
    %930 = arith.mulf %921, %929 : vector<10x1xf32>
    %931 = vector.shape_cast %930 : vector<10x1xf32> to vector<1x10x1xf32>
    %cst_315 = arith.constant dense<0.000000e+00> : vector<1xf32>
    %932 = vector.multi_reduction <add>, %931, %cst_315 [1, 2] : vector<1x10x1xf32> to vector<1xf32>
    %933 = vector.shape_cast %932 : vector<1xf32> to vector<1x1x1xf32>
    %934 = vector.extract %933[0, 0, 0] : f32 from vector<1x1x1xf32>
    %935 = vector.broadcast %934 : f32 to vector<1x1xf32>
    %936 = arith.addf %928, %935 : vector<1x1xf32>
    %cst_316 = arith.constant 5.000000e-01 : f32
    %937 = vector.broadcast %cst_316 : f32 to vector<1x1xf32>
    %938 = arith.mulf %937, %936 : vector<1x1xf32>
    %939 = vector.broadcast %920 : vector<10x1xf32> to vector<10x100xf32>
    %940 = arith.mulf %334, %939 : vector<10x100xf32>
    %cst_317 = arith.constant dense<0.000000e+00> : vector<100xf32>
    %941 = vector.multi_reduction <add>, %940, %cst_317 [0] : vector<10x100xf32> to vector<100xf32>
    %942 = vector.shape_cast %941 : vector<100xf32> to vector<1x100xf32>
    %943 = vector.broadcast %921 : vector<10x1xf32> to vector<10x100xf32>
    %944 = arith.mulf %667, %943 : vector<10x100xf32>
    %cst_318 = arith.constant dense<0.000000e+00> : vector<100xf32>
    %945 = vector.multi_reduction <add>, %944, %cst_318 [0] : vector<10x100xf32> to vector<100xf32>
    %946 = vector.shape_cast %945 : vector<100xf32> to vector<1x100xf32>
    %947 = arith.addf %942, %946 : vector<1x100xf32>
    %948 = vector.broadcast %938 : vector<1x1xf32> to vector<1x100xf32>
    %949 = arith.cmpf olt, %947, %948 : vector<1x100xf32>
    %950 = arith.extui %949 : vector<1x100xi1> to vector<1x100xi32>
    %951 = arith.sitofp %950 : vector<1x100xi32> to vector<1x100xf32>
    %952 = vector.shape_cast %951 : vector<1x100xf32> to vector<1x1x100xf32>
    %cst_319 = arith.constant dense<0.000000e+00> : vector<1xf32>
    %953 = vector.multi_reduction <add>, %952, %cst_319 [1, 2] : vector<1x1x100xf32> to vector<1xf32>
    %954 = vector.shape_cast %953 : vector<1xf32> to vector<1x1x1xf32>
    %955 = vector.extract %954[0, 0, 0] : f32 from vector<1x1x1xf32>
    %956 = vector.broadcast %955 : f32 to vector<1x1xf32>
    %cst_320 = arith.constant 1.000000e+02 : f32
    %957 = vector.broadcast %cst_320 : f32 to vector<1x1xf32>
    %958 = arith.subf %957, %956 : vector<1x1xf32>
    %959 = vector.broadcast %951 : vector<1x100xf32> to vector<10x100xf32>
    %960 = arith.mulf %334, %959 : vector<10x100xf32>
    %cst_321 = arith.constant dense<0.000000e+00> : vector<10xf32>
    %961 = vector.multi_reduction <add>, %960, %cst_321 [1] : vector<10x100xf32> to vector<10xf32>
    %962 = vector.shape_cast %961 : vector<10xf32> to vector<10x1xf32>
    %963 = vector.broadcast %951 : vector<1x100xf32> to vector<10x100xf32>
    %964 = arith.mulf %667, %963 : vector<10x100xf32>
    %cst_322 = arith.constant dense<0.000000e+00> : vector<10xf32>
    %965 = vector.multi_reduction <add>, %964, %cst_322 [1] : vector<10x100xf32> to vector<10xf32>
    %966 = vector.shape_cast %965 : vector<10xf32> to vector<10x1xf32>
    %967 = arith.subf %679, %962 : vector<10x1xf32>
    %968 = arith.subf %681, %966 : vector<10x1xf32>
    %cst_323 = arith.constant 1.000000e+00 : f32
    %969 = vector.broadcast %cst_323 : f32 to vector<1x1xf32>
    %970 = arith.maximumf %956, %969 : vector<1x1xf32>
    %971 = tpu.reciprocal %970 {approx = true} : vector<1x1xf32> -> vector<1x1xf32>
    %cst_324 = arith.constant 1.000000e+00 : f32
    %972 = vector.broadcast %cst_324 : f32 to vector<1x1xf32>
    %973 = arith.maximumf %958, %972 : vector<1x1xf32>
    %974 = tpu.reciprocal %973 {approx = true} : vector<1x1xf32> -> vector<1x1xf32>
    %cst_325 = arith.constant 0.000000e+00 : f32
    %975 = vector.broadcast %cst_325 : f32 to vector<1x1xf32>
    %976 = arith.cmpf ogt, %958, %975 : vector<1x1xf32>
    %cst_326 = arith.constant 0.000000e+00 : f32
    %977 = vector.broadcast %cst_326 : f32 to vector<1x1xf32>
    %978 = arith.cmpf ogt, %956, %977 : vector<1x1xf32>
    %979 = vector.broadcast %974 : vector<1x1xf32> to vector<10x1xf32>
    %980 = arith.mulf %967, %979 : vector<10x1xf32>
    %981 = vector.shape_cast %976 : vector<1x1xi1> to vector<1x1xi1>
    %982 = vector.broadcast %981 : vector<1x1xi1> to vector<10x1xi1>
    %983 = arith.select %982, %980, %904 : vector<10x1xi1>, vector<10x1xf32>
    %984 = vector.broadcast %974 : vector<1x1xf32> to vector<10x1xf32>
    %985 = arith.mulf %968, %984 : vector<10x1xf32>
    %986 = vector.shape_cast %976 : vector<1x1xi1> to vector<1x1xi1>
    %987 = vector.broadcast %986 : vector<1x1xi1> to vector<10x1xi1>
    %988 = arith.select %987, %985, %909 : vector<10x1xi1>, vector<10x1xf32>
    %989 = vector.broadcast %971 : vector<1x1xf32> to vector<10x1xf32>
    %990 = arith.mulf %962, %989 : vector<10x1xf32>
    %991 = vector.shape_cast %978 : vector<1x1xi1> to vector<1x1xi1>
    %992 = vector.broadcast %991 : vector<1x1xi1> to vector<10x1xi1>
    %993 = arith.select %992, %990, %914 : vector<10x1xi1>, vector<10x1xf32>
    %994 = vector.broadcast %971 : vector<1x1xf32> to vector<10x1xf32>
    %995 = arith.mulf %966, %994 : vector<10x1xf32>
    %996 = vector.shape_cast %978 : vector<1x1xi1> to vector<1x1xi1>
    %997 = vector.broadcast %996 : vector<1x1xi1> to vector<10x1xi1>
    %998 = arith.select %997, %995, %919 : vector<10x1xi1>, vector<10x1xf32>
    %c4_i32_327 = arith.constant 4 : i32
    %999 = arith.subf %983, %993 : vector<10x1xf32>
    %1000 = arith.subf %988, %998 : vector<10x1xf32>
    %1001 = arith.addf %983, %993 : vector<10x1xf32>
    %1002 = arith.mulf %999, %1001 : vector<10x1xf32>
    %1003 = vector.shape_cast %1002 : vector<10x1xf32> to vector<1x10x1xf32>
    %cst_328 = arith.constant dense<0.000000e+00> : vector<1xf32>
    %1004 = vector.multi_reduction <add>, %1003, %cst_328 [1, 2] : vector<1x10x1xf32> to vector<1xf32>
    %1005 = vector.shape_cast %1004 : vector<1xf32> to vector<1x1x1xf32>
    %1006 = vector.extract %1005[0, 0, 0] : f32 from vector<1x1x1xf32>
    %1007 = vector.broadcast %1006 : f32 to vector<1x1xf32>
    %1008 = arith.addf %988, %998 : vector<10x1xf32>
    %1009 = arith.mulf %1000, %1008 : vector<10x1xf32>
    %1010 = vector.shape_cast %1009 : vector<10x1xf32> to vector<1x10x1xf32>
    %cst_329 = arith.constant dense<0.000000e+00> : vector<1xf32>
    %1011 = vector.multi_reduction <add>, %1010, %cst_329 [1, 2] : vector<1x10x1xf32> to vector<1xf32>
    %1012 = vector.shape_cast %1011 : vector<1xf32> to vector<1x1x1xf32>
    %1013 = vector.extract %1012[0, 0, 0] : f32 from vector<1x1x1xf32>
    %1014 = vector.broadcast %1013 : f32 to vector<1x1xf32>
    %1015 = arith.addf %1007, %1014 : vector<1x1xf32>
    %cst_330 = arith.constant 5.000000e-01 : f32
    %1016 = vector.broadcast %cst_330 : f32 to vector<1x1xf32>
    %1017 = arith.mulf %1016, %1015 : vector<1x1xf32>
    %1018 = vector.broadcast %999 : vector<10x1xf32> to vector<10x100xf32>
    %1019 = arith.mulf %334, %1018 : vector<10x100xf32>
    %cst_331 = arith.constant dense<0.000000e+00> : vector<100xf32>
    %1020 = vector.multi_reduction <add>, %1019, %cst_331 [0] : vector<10x100xf32> to vector<100xf32>
    %1021 = vector.shape_cast %1020 : vector<100xf32> to vector<1x100xf32>
    %1022 = vector.broadcast %1000 : vector<10x1xf32> to vector<10x100xf32>
    %1023 = arith.mulf %667, %1022 : vector<10x100xf32>
    %cst_332 = arith.constant dense<0.000000e+00> : vector<100xf32>
    %1024 = vector.multi_reduction <add>, %1023, %cst_332 [0] : vector<10x100xf32> to vector<100xf32>
    %1025 = vector.shape_cast %1024 : vector<100xf32> to vector<1x100xf32>
    %1026 = arith.addf %1021, %1025 : vector<1x100xf32>
    %1027 = vector.broadcast %1017 : vector<1x1xf32> to vector<1x100xf32>
    %1028 = arith.cmpf olt, %1026, %1027 : vector<1x100xf32>
    %1029 = arith.extui %1028 : vector<1x100xi1> to vector<1x100xi32>
    %1030 = arith.sitofp %1029 : vector<1x100xi32> to vector<1x100xf32>
    %1031 = vector.shape_cast %1030 : vector<1x100xf32> to vector<1x1x100xf32>
    %cst_333 = arith.constant dense<0.000000e+00> : vector<1xf32>
    %1032 = vector.multi_reduction <add>, %1031, %cst_333 [1, 2] : vector<1x1x100xf32> to vector<1xf32>
    %1033 = vector.shape_cast %1032 : vector<1xf32> to vector<1x1x1xf32>
    %1034 = vector.extract %1033[0, 0, 0] : f32 from vector<1x1x1xf32>
    %1035 = vector.broadcast %1034 : f32 to vector<1x1xf32>
    %cst_334 = arith.constant 1.000000e+02 : f32
    %1036 = vector.broadcast %cst_334 : f32 to vector<1x1xf32>
    %1037 = arith.subf %1036, %1035 : vector<1x1xf32>
    %1038 = vector.broadcast %1030 : vector<1x100xf32> to vector<10x100xf32>
    %1039 = arith.mulf %334, %1038 : vector<10x100xf32>
    %cst_335 = arith.constant dense<0.000000e+00> : vector<10xf32>
    %1040 = vector.multi_reduction <add>, %1039, %cst_335 [1] : vector<10x100xf32> to vector<10xf32>
    %1041 = vector.shape_cast %1040 : vector<10xf32> to vector<10x1xf32>
    %1042 = vector.broadcast %1030 : vector<1x100xf32> to vector<10x100xf32>
    %1043 = arith.mulf %667, %1042 : vector<10x100xf32>
    %cst_336 = arith.constant dense<0.000000e+00> : vector<10xf32>
    %1044 = vector.multi_reduction <add>, %1043, %cst_336 [1] : vector<10x100xf32> to vector<10xf32>
    %1045 = vector.shape_cast %1044 : vector<10xf32> to vector<10x1xf32>
    %1046 = arith.subf %679, %1041 : vector<10x1xf32>
    %1047 = arith.subf %681, %1045 : vector<10x1xf32>
    %cst_337 = arith.constant 1.000000e+00 : f32
    %1048 = vector.broadcast %cst_337 : f32 to vector<1x1xf32>
    %1049 = arith.maximumf %1035, %1048 : vector<1x1xf32>
    %1050 = tpu.reciprocal %1049 {approx = true} : vector<1x1xf32> -> vector<1x1xf32>
    %cst_338 = arith.constant 1.000000e+00 : f32
    %1051 = vector.broadcast %cst_338 : f32 to vector<1x1xf32>
    %1052 = arith.maximumf %1037, %1051 : vector<1x1xf32>
    %1053 = tpu.reciprocal %1052 {approx = true} : vector<1x1xf32> -> vector<1x1xf32>
    %cst_339 = arith.constant 0.000000e+00 : f32
    %1054 = vector.broadcast %cst_339 : f32 to vector<1x1xf32>
    %1055 = arith.cmpf ogt, %1037, %1054 : vector<1x1xf32>
    %cst_340 = arith.constant 0.000000e+00 : f32
    %1056 = vector.broadcast %cst_340 : f32 to vector<1x1xf32>
    %1057 = arith.cmpf ogt, %1035, %1056 : vector<1x1xf32>
    %1058 = vector.broadcast %1053 : vector<1x1xf32> to vector<10x1xf32>
    %1059 = arith.mulf %1046, %1058 : vector<10x1xf32>
    %1060 = vector.shape_cast %1055 : vector<1x1xi1> to vector<1x1xi1>
    %1061 = vector.broadcast %1060 : vector<1x1xi1> to vector<10x1xi1>
    %1062 = arith.select %1061, %1059, %983 : vector<10x1xi1>, vector<10x1xf32>
    %1063 = vector.broadcast %1053 : vector<1x1xf32> to vector<10x1xf32>
    %1064 = arith.mulf %1047, %1063 : vector<10x1xf32>
    %1065 = vector.shape_cast %1055 : vector<1x1xi1> to vector<1x1xi1>
    %1066 = vector.broadcast %1065 : vector<1x1xi1> to vector<10x1xi1>
    %1067 = arith.select %1066, %1064, %988 : vector<10x1xi1>, vector<10x1xf32>
    %1068 = vector.broadcast %1050 : vector<1x1xf32> to vector<10x1xf32>
    %1069 = arith.mulf %1041, %1068 : vector<10x1xf32>
    %1070 = vector.shape_cast %1057 : vector<1x1xi1> to vector<1x1xi1>
    %1071 = vector.broadcast %1070 : vector<1x1xi1> to vector<10x1xi1>
    %1072 = arith.select %1071, %1069, %993 : vector<10x1xi1>, vector<10x1xf32>
    %1073 = vector.broadcast %1050 : vector<1x1xf32> to vector<10x1xf32>
    %1074 = arith.mulf %1045, %1073 : vector<10x1xf32>
    %1075 = vector.shape_cast %1057 : vector<1x1xi1> to vector<1x1xi1>
    %1076 = vector.broadcast %1075 : vector<1x1xi1> to vector<10x1xi1>
    %1077 = arith.select %1076, %1074, %998 : vector<10x1xi1>, vector<10x1xf32>
    %c5_i32_341 = arith.constant 5 : i32
    %1078 = arith.subf %1062, %1072 : vector<10x1xf32>
    %1079 = arith.subf %1067, %1077 : vector<10x1xf32>
    %1080 = arith.addf %1062, %1072 : vector<10x1xf32>
    %1081 = arith.mulf %1078, %1080 : vector<10x1xf32>
    %1082 = vector.shape_cast %1081 : vector<10x1xf32> to vector<1x10x1xf32>
    %cst_342 = arith.constant dense<0.000000e+00> : vector<1xf32>
    %1083 = vector.multi_reduction <add>, %1082, %cst_342 [1, 2] : vector<1x10x1xf32> to vector<1xf32>
    %1084 = vector.shape_cast %1083 : vector<1xf32> to vector<1x1x1xf32>
    %1085 = vector.extract %1084[0, 0, 0] : f32 from vector<1x1x1xf32>
    %1086 = vector.broadcast %1085 : f32 to vector<1x1xf32>
    %1087 = arith.addf %1067, %1077 : vector<10x1xf32>
    %1088 = arith.mulf %1079, %1087 : vector<10x1xf32>
    %1089 = vector.shape_cast %1088 : vector<10x1xf32> to vector<1x10x1xf32>
    %cst_343 = arith.constant dense<0.000000e+00> : vector<1xf32>
    %1090 = vector.multi_reduction <add>, %1089, %cst_343 [1, 2] : vector<1x10x1xf32> to vector<1xf32>
    %1091 = vector.shape_cast %1090 : vector<1xf32> to vector<1x1x1xf32>
    %1092 = vector.extract %1091[0, 0, 0] : f32 from vector<1x1x1xf32>
    %1093 = vector.broadcast %1092 : f32 to vector<1x1xf32>
    %1094 = arith.addf %1086, %1093 : vector<1x1xf32>
    %cst_344 = arith.constant 5.000000e-01 : f32
    %1095 = vector.broadcast %cst_344 : f32 to vector<1x1xf32>
    %1096 = arith.mulf %1095, %1094 : vector<1x1xf32>
    %1097 = vector.broadcast %1078 : vector<10x1xf32> to vector<10x100xf32>
    %1098 = arith.mulf %334, %1097 : vector<10x100xf32>
    %cst_345 = arith.constant dense<0.000000e+00> : vector<100xf32>
    %1099 = vector.multi_reduction <add>, %1098, %cst_345 [0] : vector<10x100xf32> to vector<100xf32>
    %1100 = vector.shape_cast %1099 : vector<100xf32> to vector<1x100xf32>
    %1101 = vector.broadcast %1079 : vector<10x1xf32> to vector<10x100xf32>
    %1102 = arith.mulf %667, %1101 : vector<10x100xf32>
    %cst_346 = arith.constant dense<0.000000e+00> : vector<100xf32>
    %1103 = vector.multi_reduction <add>, %1102, %cst_346 [0] : vector<10x100xf32> to vector<100xf32>
    %1104 = vector.shape_cast %1103 : vector<100xf32> to vector<1x100xf32>
    %1105 = arith.addf %1100, %1104 : vector<1x100xf32>
    %1106 = vector.broadcast %1096 : vector<1x1xf32> to vector<1x100xf32>
    %1107 = arith.cmpf olt, %1105, %1106 : vector<1x100xf32>
    %1108 = arith.extui %1107 : vector<1x100xi1> to vector<1x100xi32>
    %1109 = arith.sitofp %1108 : vector<1x100xi32> to vector<1x100xf32>
    %1110 = vector.shape_cast %1109 : vector<1x100xf32> to vector<1x1x100xf32>
    %cst_347 = arith.constant dense<0.000000e+00> : vector<1xf32>
    %1111 = vector.multi_reduction <add>, %1110, %cst_347 [1, 2] : vector<1x1x100xf32> to vector<1xf32>
    %1112 = vector.shape_cast %1111 : vector<1xf32> to vector<1x1x1xf32>
    %1113 = vector.extract %1112[0, 0, 0] : f32 from vector<1x1x1xf32>
    %1114 = vector.broadcast %1113 : f32 to vector<1x1xf32>
    %cst_348 = arith.constant 1.000000e+02 : f32
    %1115 = vector.broadcast %cst_348 : f32 to vector<1x1xf32>
    %1116 = arith.subf %1115, %1114 : vector<1x1xf32>
    %1117 = vector.broadcast %1109 : vector<1x100xf32> to vector<10x100xf32>
    %1118 = arith.mulf %334, %1117 : vector<10x100xf32>
    %cst_349 = arith.constant dense<0.000000e+00> : vector<10xf32>
    %1119 = vector.multi_reduction <add>, %1118, %cst_349 [1] : vector<10x100xf32> to vector<10xf32>
    %1120 = vector.shape_cast %1119 : vector<10xf32> to vector<10x1xf32>
    %1121 = vector.broadcast %1109 : vector<1x100xf32> to vector<10x100xf32>
    %1122 = arith.mulf %667, %1121 : vector<10x100xf32>
    %cst_350 = arith.constant dense<0.000000e+00> : vector<10xf32>
    %1123 = vector.multi_reduction <add>, %1122, %cst_350 [1] : vector<10x100xf32> to vector<10xf32>
    %1124 = vector.shape_cast %1123 : vector<10xf32> to vector<10x1xf32>
    %1125 = arith.subf %679, %1120 : vector<10x1xf32>
    %1126 = arith.subf %681, %1124 : vector<10x1xf32>
    %cst_351 = arith.constant 1.000000e+00 : f32
    %1127 = vector.broadcast %cst_351 : f32 to vector<1x1xf32>
    %1128 = arith.maximumf %1114, %1127 : vector<1x1xf32>
    %1129 = tpu.reciprocal %1128 {approx = true} : vector<1x1xf32> -> vector<1x1xf32>
    %cst_352 = arith.constant 1.000000e+00 : f32
    %1130 = vector.broadcast %cst_352 : f32 to vector<1x1xf32>
    %1131 = arith.maximumf %1116, %1130 : vector<1x1xf32>
    %1132 = tpu.reciprocal %1131 {approx = true} : vector<1x1xf32> -> vector<1x1xf32>
    %cst_353 = arith.constant 0.000000e+00 : f32
    %1133 = vector.broadcast %cst_353 : f32 to vector<1x1xf32>
    %1134 = arith.cmpf ogt, %1116, %1133 : vector<1x1xf32>
    %cst_354 = arith.constant 0.000000e+00 : f32
    %1135 = vector.broadcast %cst_354 : f32 to vector<1x1xf32>
    %1136 = arith.cmpf ogt, %1114, %1135 : vector<1x1xf32>
    %1137 = vector.broadcast %1132 : vector<1x1xf32> to vector<10x1xf32>
    %1138 = arith.mulf %1125, %1137 : vector<10x1xf32>
    %1139 = vector.shape_cast %1134 : vector<1x1xi1> to vector<1x1xi1>
    %1140 = vector.broadcast %1139 : vector<1x1xi1> to vector<10x1xi1>
    %1141 = arith.select %1140, %1138, %1062 : vector<10x1xi1>, vector<10x1xf32>
    %1142 = vector.broadcast %1132 : vector<1x1xf32> to vector<10x1xf32>
    %1143 = arith.mulf %1126, %1142 : vector<10x1xf32>
    %1144 = vector.shape_cast %1134 : vector<1x1xi1> to vector<1x1xi1>
    %1145 = vector.broadcast %1144 : vector<1x1xi1> to vector<10x1xi1>
    %1146 = arith.select %1145, %1143, %1067 : vector<10x1xi1>, vector<10x1xf32>
    %1147 = vector.broadcast %1129 : vector<1x1xf32> to vector<10x1xf32>
    %1148 = arith.mulf %1120, %1147 : vector<10x1xf32>
    %1149 = vector.shape_cast %1136 : vector<1x1xi1> to vector<1x1xi1>
    %1150 = vector.broadcast %1149 : vector<1x1xi1> to vector<10x1xi1>
    %1151 = arith.select %1150, %1148, %1072 : vector<10x1xi1>, vector<10x1xf32>
    %1152 = vector.broadcast %1129 : vector<1x1xf32> to vector<10x1xf32>
    %1153 = arith.mulf %1124, %1152 : vector<10x1xf32>
    %1154 = vector.shape_cast %1136 : vector<1x1xi1> to vector<1x1xi1>
    %1155 = vector.broadcast %1154 : vector<1x1xi1> to vector<10x1xi1>
    %1156 = arith.select %1155, %1153, %1077 : vector<10x1xi1>, vector<10x1xf32>
    %c6_i32_355 = arith.constant 6 : i32
    %1157 = arith.subf %1141, %1151 : vector<10x1xf32>
    %1158 = arith.subf %1146, %1156 : vector<10x1xf32>
    %1159 = arith.addf %1141, %1151 : vector<10x1xf32>
    %1160 = arith.mulf %1157, %1159 : vector<10x1xf32>
    %1161 = vector.shape_cast %1160 : vector<10x1xf32> to vector<1x10x1xf32>
    %cst_356 = arith.constant dense<0.000000e+00> : vector<1xf32>
    %1162 = vector.multi_reduction <add>, %1161, %cst_356 [1, 2] : vector<1x10x1xf32> to vector<1xf32>
    %1163 = vector.shape_cast %1162 : vector<1xf32> to vector<1x1x1xf32>
    %1164 = vector.extract %1163[0, 0, 0] : f32 from vector<1x1x1xf32>
    %1165 = vector.broadcast %1164 : f32 to vector<1x1xf32>
    %1166 = arith.addf %1146, %1156 : vector<10x1xf32>
    %1167 = arith.mulf %1158, %1166 : vector<10x1xf32>
    %1168 = vector.shape_cast %1167 : vector<10x1xf32> to vector<1x10x1xf32>
    %cst_357 = arith.constant dense<0.000000e+00> : vector<1xf32>
    %1169 = vector.multi_reduction <add>, %1168, %cst_357 [1, 2] : vector<1x10x1xf32> to vector<1xf32>
    %1170 = vector.shape_cast %1169 : vector<1xf32> to vector<1x1x1xf32>
    %1171 = vector.extract %1170[0, 0, 0] : f32 from vector<1x1x1xf32>
    %1172 = vector.broadcast %1171 : f32 to vector<1x1xf32>
    %1173 = arith.addf %1165, %1172 : vector<1x1xf32>
    %cst_358 = arith.constant 5.000000e-01 : f32
    %1174 = vector.broadcast %cst_358 : f32 to vector<1x1xf32>
    %1175 = arith.mulf %1174, %1173 : vector<1x1xf32>
    %1176 = vector.broadcast %1157 : vector<10x1xf32> to vector<10x100xf32>
    %1177 = arith.mulf %334, %1176 : vector<10x100xf32>
    %cst_359 = arith.constant dense<0.000000e+00> : vector<100xf32>
    %1178 = vector.multi_reduction <add>, %1177, %cst_359 [0] : vector<10x100xf32> to vector<100xf32>
    %1179 = vector.shape_cast %1178 : vector<100xf32> to vector<1x100xf32>
    %1180 = vector.broadcast %1158 : vector<10x1xf32> to vector<10x100xf32>
    %1181 = arith.mulf %667, %1180 : vector<10x100xf32>
    %cst_360 = arith.constant dense<0.000000e+00> : vector<100xf32>
    %1182 = vector.multi_reduction <add>, %1181, %cst_360 [0] : vector<10x100xf32> to vector<100xf32>
    %1183 = vector.shape_cast %1182 : vector<100xf32> to vector<1x100xf32>
    %1184 = arith.addf %1179, %1183 : vector<1x100xf32>
    %1185 = vector.broadcast %1175 : vector<1x1xf32> to vector<1x100xf32>
    %1186 = arith.cmpf olt, %1184, %1185 : vector<1x100xf32>
    %1187 = arith.extui %1186 : vector<1x100xi1> to vector<1x100xi32>
    %1188 = arith.sitofp %1187 : vector<1x100xi32> to vector<1x100xf32>
    %1189 = vector.shape_cast %1188 : vector<1x100xf32> to vector<1x1x100xf32>
    %cst_361 = arith.constant dense<0.000000e+00> : vector<1xf32>
    %1190 = vector.multi_reduction <add>, %1189, %cst_361 [1, 2] : vector<1x1x100xf32> to vector<1xf32>
    %1191 = vector.shape_cast %1190 : vector<1xf32> to vector<1x1x1xf32>
    %1192 = vector.extract %1191[0, 0, 0] : f32 from vector<1x1x1xf32>
    %1193 = vector.broadcast %1192 : f32 to vector<1x1xf32>
    %cst_362 = arith.constant 1.000000e+02 : f32
    %1194 = vector.broadcast %cst_362 : f32 to vector<1x1xf32>
    %1195 = arith.subf %1194, %1193 : vector<1x1xf32>
    %1196 = vector.broadcast %1188 : vector<1x100xf32> to vector<10x100xf32>
    %1197 = arith.mulf %334, %1196 : vector<10x100xf32>
    %cst_363 = arith.constant dense<0.000000e+00> : vector<10xf32>
    %1198 = vector.multi_reduction <add>, %1197, %cst_363 [1] : vector<10x100xf32> to vector<10xf32>
    %1199 = vector.shape_cast %1198 : vector<10xf32> to vector<10x1xf32>
    %1200 = vector.broadcast %1188 : vector<1x100xf32> to vector<10x100xf32>
    %1201 = arith.mulf %667, %1200 : vector<10x100xf32>
    %cst_364 = arith.constant dense<0.000000e+00> : vector<10xf32>
    %1202 = vector.multi_reduction <add>, %1201, %cst_364 [1] : vector<10x100xf32> to vector<10xf32>
    %1203 = vector.shape_cast %1202 : vector<10xf32> to vector<10x1xf32>
    %1204 = arith.subf %679, %1199 : vector<10x1xf32>
    %1205 = arith.subf %681, %1203 : vector<10x1xf32>
    %cst_365 = arith.constant 1.000000e+00 : f32
    %1206 = vector.broadcast %cst_365 : f32 to vector<1x1xf32>
    %1207 = arith.maximumf %1193, %1206 : vector<1x1xf32>
    %1208 = tpu.reciprocal %1207 {approx = true} : vector<1x1xf32> -> vector<1x1xf32>
    %cst_366 = arith.constant 1.000000e+00 : f32
    %1209 = vector.broadcast %cst_366 : f32 to vector<1x1xf32>
    %1210 = arith.maximumf %1195, %1209 : vector<1x1xf32>
    %1211 = tpu.reciprocal %1210 {approx = true} : vector<1x1xf32> -> vector<1x1xf32>
    %cst_367 = arith.constant 0.000000e+00 : f32
    %1212 = vector.broadcast %cst_367 : f32 to vector<1x1xf32>
    %1213 = arith.cmpf ogt, %1195, %1212 : vector<1x1xf32>
    %cst_368 = arith.constant 0.000000e+00 : f32
    %1214 = vector.broadcast %cst_368 : f32 to vector<1x1xf32>
    %1215 = arith.cmpf ogt, %1193, %1214 : vector<1x1xf32>
    %1216 = vector.broadcast %1211 : vector<1x1xf32> to vector<10x1xf32>
    %1217 = arith.mulf %1204, %1216 : vector<10x1xf32>
    %1218 = vector.shape_cast %1213 : vector<1x1xi1> to vector<1x1xi1>
    %1219 = vector.broadcast %1218 : vector<1x1xi1> to vector<10x1xi1>
    %1220 = arith.select %1219, %1217, %1141 : vector<10x1xi1>, vector<10x1xf32>
    %1221 = vector.broadcast %1211 : vector<1x1xf32> to vector<10x1xf32>
    %1222 = arith.mulf %1205, %1221 : vector<10x1xf32>
    %1223 = vector.shape_cast %1213 : vector<1x1xi1> to vector<1x1xi1>
    %1224 = vector.broadcast %1223 : vector<1x1xi1> to vector<10x1xi1>
    %1225 = arith.select %1224, %1222, %1146 : vector<10x1xi1>, vector<10x1xf32>
    %1226 = vector.broadcast %1208 : vector<1x1xf32> to vector<10x1xf32>
    %1227 = arith.mulf %1199, %1226 : vector<10x1xf32>
    %1228 = vector.shape_cast %1215 : vector<1x1xi1> to vector<1x1xi1>
    %1229 = vector.broadcast %1228 : vector<1x1xi1> to vector<10x1xi1>
    %1230 = arith.select %1229, %1227, %1151 : vector<10x1xi1>, vector<10x1xf32>
    %1231 = vector.broadcast %1208 : vector<1x1xf32> to vector<10x1xf32>
    %1232 = arith.mulf %1203, %1231 : vector<10x1xf32>
    %1233 = vector.shape_cast %1215 : vector<1x1xi1> to vector<1x1xi1>
    %1234 = vector.broadcast %1233 : vector<1x1xi1> to vector<10x1xi1>
    %1235 = arith.select %1234, %1232, %1156 : vector<10x1xi1>, vector<10x1xf32>
    %c7_i32_369 = arith.constant 7 : i32
    %1236 = arith.subf %1220, %1230 : vector<10x1xf32>
    %1237 = arith.subf %1225, %1235 : vector<10x1xf32>
    %1238 = arith.addf %1220, %1230 : vector<10x1xf32>
    %1239 = arith.mulf %1236, %1238 : vector<10x1xf32>
    %1240 = vector.shape_cast %1239 : vector<10x1xf32> to vector<1x10x1xf32>
    %cst_370 = arith.constant dense<0.000000e+00> : vector<1xf32>
    %1241 = vector.multi_reduction <add>, %1240, %cst_370 [1, 2] : vector<1x10x1xf32> to vector<1xf32>
    %1242 = vector.shape_cast %1241 : vector<1xf32> to vector<1x1x1xf32>
    %1243 = vector.extract %1242[0, 0, 0] : f32 from vector<1x1x1xf32>
    %1244 = vector.broadcast %1243 : f32 to vector<1x1xf32>
    %1245 = arith.addf %1225, %1235 : vector<10x1xf32>
    %1246 = arith.mulf %1237, %1245 : vector<10x1xf32>
    %1247 = vector.shape_cast %1246 : vector<10x1xf32> to vector<1x10x1xf32>
    %cst_371 = arith.constant dense<0.000000e+00> : vector<1xf32>
    %1248 = vector.multi_reduction <add>, %1247, %cst_371 [1, 2] : vector<1x10x1xf32> to vector<1xf32>
    %1249 = vector.shape_cast %1248 : vector<1xf32> to vector<1x1x1xf32>
    %1250 = vector.extract %1249[0, 0, 0] : f32 from vector<1x1x1xf32>
    %1251 = vector.broadcast %1250 : f32 to vector<1x1xf32>
    %1252 = arith.addf %1244, %1251 : vector<1x1xf32>
    %cst_372 = arith.constant 5.000000e-01 : f32
    %1253 = vector.broadcast %cst_372 : f32 to vector<1x1xf32>
    %1254 = arith.mulf %1253, %1252 : vector<1x1xf32>
    %1255 = vector.broadcast %1236 : vector<10x1xf32> to vector<10x100xf32>
    %1256 = arith.mulf %334, %1255 : vector<10x100xf32>
    %cst_373 = arith.constant dense<0.000000e+00> : vector<100xf32>
    %1257 = vector.multi_reduction <add>, %1256, %cst_373 [0] : vector<10x100xf32> to vector<100xf32>
    %1258 = vector.shape_cast %1257 : vector<100xf32> to vector<1x100xf32>
    %1259 = vector.broadcast %1237 : vector<10x1xf32> to vector<10x100xf32>
    %1260 = arith.mulf %667, %1259 : vector<10x100xf32>
    %cst_374 = arith.constant dense<0.000000e+00> : vector<100xf32>
    %1261 = vector.multi_reduction <add>, %1260, %cst_374 [0] : vector<10x100xf32> to vector<100xf32>
    %1262 = vector.shape_cast %1261 : vector<100xf32> to vector<1x100xf32>
    %1263 = arith.addf %1258, %1262 : vector<1x100xf32>
    %1264 = vector.broadcast %1254 : vector<1x1xf32> to vector<1x100xf32>
    %1265 = arith.cmpf olt, %1263, %1264 : vector<1x100xf32>
    %1266 = arith.extui %1265 : vector<1x100xi1> to vector<1x100xi32>
    %1267 = arith.sitofp %1266 : vector<1x100xi32> to vector<1x100xf32>
    %1268 = vector.shape_cast %1267 : vector<1x100xf32> to vector<1x1x100xf32>
    %cst_375 = arith.constant dense<0.000000e+00> : vector<1xf32>
    %1269 = vector.multi_reduction <add>, %1268, %cst_375 [1, 2] : vector<1x1x100xf32> to vector<1xf32>
    %1270 = vector.shape_cast %1269 : vector<1xf32> to vector<1x1x1xf32>
    %1271 = vector.extract %1270[0, 0, 0] : f32 from vector<1x1x1xf32>
    %1272 = vector.broadcast %1271 : f32 to vector<1x1xf32>
    %cst_376 = arith.constant 1.000000e+02 : f32
    %1273 = vector.broadcast %cst_376 : f32 to vector<1x1xf32>
    %1274 = arith.subf %1273, %1272 : vector<1x1xf32>
    %1275 = vector.broadcast %1267 : vector<1x100xf32> to vector<10x100xf32>
    %1276 = arith.mulf %334, %1275 : vector<10x100xf32>
    %cst_377 = arith.constant dense<0.000000e+00> : vector<10xf32>
    %1277 = vector.multi_reduction <add>, %1276, %cst_377 [1] : vector<10x100xf32> to vector<10xf32>
    %1278 = vector.shape_cast %1277 : vector<10xf32> to vector<10x1xf32>
    %1279 = vector.broadcast %1267 : vector<1x100xf32> to vector<10x100xf32>
    %1280 = arith.mulf %667, %1279 : vector<10x100xf32>
    %cst_378 = arith.constant dense<0.000000e+00> : vector<10xf32>
    %1281 = vector.multi_reduction <add>, %1280, %cst_378 [1] : vector<10x100xf32> to vector<10xf32>
    %1282 = vector.shape_cast %1281 : vector<10xf32> to vector<10x1xf32>
    %1283 = arith.subf %679, %1278 : vector<10x1xf32>
    %1284 = arith.subf %681, %1282 : vector<10x1xf32>
    %cst_379 = arith.constant 1.000000e+00 : f32
    %1285 = vector.broadcast %cst_379 : f32 to vector<1x1xf32>
    %1286 = arith.maximumf %1272, %1285 : vector<1x1xf32>
    %1287 = tpu.reciprocal %1286 {approx = true} : vector<1x1xf32> -> vector<1x1xf32>
    %cst_380 = arith.constant 1.000000e+00 : f32
    %1288 = vector.broadcast %cst_380 : f32 to vector<1x1xf32>
    %1289 = arith.maximumf %1274, %1288 : vector<1x1xf32>
    %1290 = tpu.reciprocal %1289 {approx = true} : vector<1x1xf32> -> vector<1x1xf32>
    %cst_381 = arith.constant 0.000000e+00 : f32
    %1291 = vector.broadcast %cst_381 : f32 to vector<1x1xf32>
    %1292 = arith.cmpf ogt, %1274, %1291 : vector<1x1xf32>
    %cst_382 = arith.constant 0.000000e+00 : f32
    %1293 = vector.broadcast %cst_382 : f32 to vector<1x1xf32>
    %1294 = arith.cmpf ogt, %1272, %1293 : vector<1x1xf32>
    %1295 = vector.broadcast %1290 : vector<1x1xf32> to vector<10x1xf32>
    %1296 = arith.mulf %1283, %1295 : vector<10x1xf32>
    %1297 = vector.shape_cast %1292 : vector<1x1xi1> to vector<1x1xi1>
    %1298 = vector.broadcast %1297 : vector<1x1xi1> to vector<10x1xi1>
    %1299 = arith.select %1298, %1296, %1220 : vector<10x1xi1>, vector<10x1xf32>
    %1300 = vector.broadcast %1290 : vector<1x1xf32> to vector<10x1xf32>
    %1301 = arith.mulf %1284, %1300 : vector<10x1xf32>
    %1302 = vector.shape_cast %1292 : vector<1x1xi1> to vector<1x1xi1>
    %1303 = vector.broadcast %1302 : vector<1x1xi1> to vector<10x1xi1>
    %1304 = arith.select %1303, %1301, %1225 : vector<10x1xi1>, vector<10x1xf32>
    %1305 = vector.broadcast %1287 : vector<1x1xf32> to vector<10x1xf32>
    %1306 = arith.mulf %1278, %1305 : vector<10x1xf32>
    %1307 = vector.shape_cast %1294 : vector<1x1xi1> to vector<1x1xi1>
    %1308 = vector.broadcast %1307 : vector<1x1xi1> to vector<10x1xi1>
    %1309 = arith.select %1308, %1306, %1230 : vector<10x1xi1>, vector<10x1xf32>
    %1310 = vector.broadcast %1287 : vector<1x1xf32> to vector<10x1xf32>
    %1311 = arith.mulf %1282, %1310 : vector<10x1xf32>
    %1312 = vector.shape_cast %1294 : vector<1x1xi1> to vector<1x1xi1>
    %1313 = vector.broadcast %1312 : vector<1x1xi1> to vector<10x1xi1>
    %1314 = arith.select %1313, %1311, %1235 : vector<10x1xi1>, vector<10x1xf32>
    %c8_i32_383 = arith.constant 8 : i32
    %1315 = arith.subf %1299, %1309 : vector<10x1xf32>
    %1316 = arith.subf %1304, %1314 : vector<10x1xf32>
    %1317 = arith.addf %1299, %1309 : vector<10x1xf32>
    %1318 = arith.mulf %1315, %1317 : vector<10x1xf32>
    %1319 = vector.shape_cast %1318 : vector<10x1xf32> to vector<1x10x1xf32>
    %cst_384 = arith.constant dense<0.000000e+00> : vector<1xf32>
    %1320 = vector.multi_reduction <add>, %1319, %cst_384 [1, 2] : vector<1x10x1xf32> to vector<1xf32>
    %1321 = vector.shape_cast %1320 : vector<1xf32> to vector<1x1x1xf32>
    %1322 = vector.extract %1321[0, 0, 0] : f32 from vector<1x1x1xf32>
    %1323 = vector.broadcast %1322 : f32 to vector<1x1xf32>
    %1324 = arith.addf %1304, %1314 : vector<10x1xf32>
    %1325 = arith.mulf %1316, %1324 : vector<10x1xf32>
    %1326 = vector.shape_cast %1325 : vector<10x1xf32> to vector<1x10x1xf32>
    %cst_385 = arith.constant dense<0.000000e+00> : vector<1xf32>
    %1327 = vector.multi_reduction <add>, %1326, %cst_385 [1, 2] : vector<1x10x1xf32> to vector<1xf32>
    %1328 = vector.shape_cast %1327 : vector<1xf32> to vector<1x1x1xf32>
    %1329 = vector.extract %1328[0, 0, 0] : f32 from vector<1x1x1xf32>
    %1330 = vector.broadcast %1329 : f32 to vector<1x1xf32>
    %1331 = arith.addf %1323, %1330 : vector<1x1xf32>
    %cst_386 = arith.constant 5.000000e-01 : f32
    %1332 = vector.broadcast %cst_386 : f32 to vector<1x1xf32>
    %1333 = arith.mulf %1332, %1331 : vector<1x1xf32>
    %1334 = vector.broadcast %1315 : vector<10x1xf32> to vector<10x100xf32>
    %1335 = arith.mulf %334, %1334 : vector<10x100xf32>
    %cst_387 = arith.constant dense<0.000000e+00> : vector<100xf32>
    %1336 = vector.multi_reduction <add>, %1335, %cst_387 [0] : vector<10x100xf32> to vector<100xf32>
    %1337 = vector.shape_cast %1336 : vector<100xf32> to vector<1x100xf32>
    %1338 = vector.broadcast %1316 : vector<10x1xf32> to vector<10x100xf32>
    %1339 = arith.mulf %667, %1338 : vector<10x100xf32>
    %cst_388 = arith.constant dense<0.000000e+00> : vector<100xf32>
    %1340 = vector.multi_reduction <add>, %1339, %cst_388 [0] : vector<10x100xf32> to vector<100xf32>
    %1341 = vector.shape_cast %1340 : vector<100xf32> to vector<1x100xf32>
    %1342 = arith.addf %1337, %1341 : vector<1x100xf32>
    %1343 = vector.broadcast %1333 : vector<1x1xf32> to vector<1x100xf32>
    %1344 = arith.cmpf olt, %1342, %1343 : vector<1x100xf32>
    %1345 = arith.extui %1344 : vector<1x100xi1> to vector<1x100xi32>
    %1346 = arith.sitofp %1345 : vector<1x100xi32> to vector<1x100xf32>
    %1347 = vector.shape_cast %1346 : vector<1x100xf32> to vector<1x1x100xf32>
    %cst_389 = arith.constant dense<0.000000e+00> : vector<1xf32>
    %1348 = vector.multi_reduction <add>, %1347, %cst_389 [1, 2] : vector<1x1x100xf32> to vector<1xf32>
    %1349 = vector.shape_cast %1348 : vector<1xf32> to vector<1x1x1xf32>
    %1350 = vector.extract %1349[0, 0, 0] : f32 from vector<1x1x1xf32>
    %1351 = vector.broadcast %1350 : f32 to vector<1x1xf32>
    %cst_390 = arith.constant 1.000000e+02 : f32
    %1352 = vector.broadcast %cst_390 : f32 to vector<1x1xf32>
    %1353 = arith.subf %1352, %1351 : vector<1x1xf32>
    %1354 = vector.broadcast %1346 : vector<1x100xf32> to vector<10x100xf32>
    %1355 = arith.mulf %334, %1354 : vector<10x100xf32>
    %cst_391 = arith.constant dense<0.000000e+00> : vector<10xf32>
    %1356 = vector.multi_reduction <add>, %1355, %cst_391 [1] : vector<10x100xf32> to vector<10xf32>
    %1357 = vector.shape_cast %1356 : vector<10xf32> to vector<10x1xf32>
    %1358 = vector.broadcast %1346 : vector<1x100xf32> to vector<10x100xf32>
    %1359 = arith.mulf %667, %1358 : vector<10x100xf32>
    %cst_392 = arith.constant dense<0.000000e+00> : vector<10xf32>
    %1360 = vector.multi_reduction <add>, %1359, %cst_392 [1] : vector<10x100xf32> to vector<10xf32>
    %1361 = vector.shape_cast %1360 : vector<10xf32> to vector<10x1xf32>
    %1362 = arith.subf %679, %1357 : vector<10x1xf32>
    %1363 = arith.subf %681, %1361 : vector<10x1xf32>
    %cst_393 = arith.constant 1.000000e+00 : f32
    %1364 = vector.broadcast %cst_393 : f32 to vector<1x1xf32>
    %1365 = arith.maximumf %1351, %1364 : vector<1x1xf32>
    %1366 = tpu.reciprocal %1365 {approx = true} : vector<1x1xf32> -> vector<1x1xf32>
    %cst_394 = arith.constant 1.000000e+00 : f32
    %1367 = vector.broadcast %cst_394 : f32 to vector<1x1xf32>
    %1368 = arith.maximumf %1353, %1367 : vector<1x1xf32>
    %1369 = tpu.reciprocal %1368 {approx = true} : vector<1x1xf32> -> vector<1x1xf32>
    %cst_395 = arith.constant 0.000000e+00 : f32
    %1370 = vector.broadcast %cst_395 : f32 to vector<1x1xf32>
    %1371 = arith.cmpf ogt, %1353, %1370 : vector<1x1xf32>
    %cst_396 = arith.constant 0.000000e+00 : f32
    %1372 = vector.broadcast %cst_396 : f32 to vector<1x1xf32>
    %1373 = arith.cmpf ogt, %1351, %1372 : vector<1x1xf32>
    %1374 = vector.broadcast %1369 : vector<1x1xf32> to vector<10x1xf32>
    %1375 = arith.mulf %1362, %1374 : vector<10x1xf32>
    %1376 = vector.shape_cast %1371 : vector<1x1xi1> to vector<1x1xi1>
    %1377 = vector.broadcast %1376 : vector<1x1xi1> to vector<10x1xi1>
    %1378 = arith.select %1377, %1375, %1299 : vector<10x1xi1>, vector<10x1xf32>
    %1379 = vector.broadcast %1369 : vector<1x1xf32> to vector<10x1xf32>
    %1380 = arith.mulf %1363, %1379 : vector<10x1xf32>
    %1381 = vector.shape_cast %1371 : vector<1x1xi1> to vector<1x1xi1>
    %1382 = vector.broadcast %1381 : vector<1x1xi1> to vector<10x1xi1>
    %1383 = arith.select %1382, %1380, %1304 : vector<10x1xi1>, vector<10x1xf32>
    %1384 = vector.broadcast %1366 : vector<1x1xf32> to vector<10x1xf32>
    %1385 = arith.mulf %1357, %1384 : vector<10x1xf32>
    %1386 = vector.shape_cast %1373 : vector<1x1xi1> to vector<1x1xi1>
    %1387 = vector.broadcast %1386 : vector<1x1xi1> to vector<10x1xi1>
    %1388 = arith.select %1387, %1385, %1309 : vector<10x1xi1>, vector<10x1xf32>
    %1389 = vector.broadcast %1366 : vector<1x1xf32> to vector<10x1xf32>
    %1390 = arith.mulf %1361, %1389 : vector<10x1xf32>
    %1391 = vector.shape_cast %1373 : vector<1x1xi1> to vector<1x1xi1>
    %1392 = vector.broadcast %1391 : vector<1x1xi1> to vector<10x1xi1>
    %1393 = arith.select %1392, %1390, %1314 : vector<10x1xi1>, vector<10x1xf32>
    %c9_i32_397 = arith.constant 9 : i32
    %1394 = arith.subf %1378, %1388 : vector<10x1xf32>
    %1395 = arith.subf %1383, %1393 : vector<10x1xf32>
    %1396 = arith.addf %1378, %1388 : vector<10x1xf32>
    %1397 = arith.mulf %1394, %1396 : vector<10x1xf32>
    %1398 = vector.shape_cast %1397 : vector<10x1xf32> to vector<1x10x1xf32>
    %cst_398 = arith.constant dense<0.000000e+00> : vector<1xf32>
    %1399 = vector.multi_reduction <add>, %1398, %cst_398 [1, 2] : vector<1x10x1xf32> to vector<1xf32>
    %1400 = vector.shape_cast %1399 : vector<1xf32> to vector<1x1x1xf32>
    %1401 = vector.extract %1400[0, 0, 0] : f32 from vector<1x1x1xf32>
    %1402 = vector.broadcast %1401 : f32 to vector<1x1xf32>
    %1403 = arith.addf %1383, %1393 : vector<10x1xf32>
    %1404 = arith.mulf %1395, %1403 : vector<10x1xf32>
    %1405 = vector.shape_cast %1404 : vector<10x1xf32> to vector<1x10x1xf32>
    %cst_399 = arith.constant dense<0.000000e+00> : vector<1xf32>
    %1406 = vector.multi_reduction <add>, %1405, %cst_399 [1, 2] : vector<1x10x1xf32> to vector<1xf32>
    %1407 = vector.shape_cast %1406 : vector<1xf32> to vector<1x1x1xf32>
    %1408 = vector.extract %1407[0, 0, 0] : f32 from vector<1x1x1xf32>
    %1409 = vector.broadcast %1408 : f32 to vector<1x1xf32>
    %1410 = arith.addf %1402, %1409 : vector<1x1xf32>
    %cst_400 = arith.constant 5.000000e-01 : f32
    %1411 = vector.broadcast %cst_400 : f32 to vector<1x1xf32>
    %1412 = arith.mulf %1411, %1410 : vector<1x1xf32>
    %1413 = vector.broadcast %1394 : vector<10x1xf32> to vector<10x100xf32>
    %1414 = arith.mulf %334, %1413 : vector<10x100xf32>
    %cst_401 = arith.constant dense<0.000000e+00> : vector<100xf32>
    %1415 = vector.multi_reduction <add>, %1414, %cst_401 [0] : vector<10x100xf32> to vector<100xf32>
    %1416 = vector.shape_cast %1415 : vector<100xf32> to vector<1x100xf32>
    %1417 = vector.broadcast %1395 : vector<10x1xf32> to vector<10x100xf32>
    %1418 = arith.mulf %667, %1417 : vector<10x100xf32>
    %cst_402 = arith.constant dense<0.000000e+00> : vector<100xf32>
    %1419 = vector.multi_reduction <add>, %1418, %cst_402 [0] : vector<10x100xf32> to vector<100xf32>
    %1420 = vector.shape_cast %1419 : vector<100xf32> to vector<1x100xf32>
    %1421 = arith.addf %1416, %1420 : vector<1x100xf32>
    %1422 = vector.broadcast %1412 : vector<1x1xf32> to vector<1x100xf32>
    %1423 = arith.cmpf olt, %1421, %1422 : vector<1x100xf32>
    %1424 = arith.extui %1423 : vector<1x100xi1> to vector<1x100xi32>
    %1425 = arith.sitofp %1424 : vector<1x100xi32> to vector<1x100xf32>
    %1426 = vector.shape_cast %1425 : vector<1x100xf32> to vector<1x1x100xf32>
    %cst_403 = arith.constant dense<0.000000e+00> : vector<1xf32>
    %1427 = vector.multi_reduction <add>, %1426, %cst_403 [1, 2] : vector<1x1x100xf32> to vector<1xf32>
    %1428 = vector.shape_cast %1427 : vector<1xf32> to vector<1x1x1xf32>
    %1429 = vector.extract %1428[0, 0, 0] : f32 from vector<1x1x1xf32>
    %1430 = vector.broadcast %1429 : f32 to vector<1x1xf32>
    %cst_404 = arith.constant 1.000000e+02 : f32
    %1431 = vector.broadcast %cst_404 : f32 to vector<1x1xf32>
    %1432 = arith.subf %1431, %1430 : vector<1x1xf32>
    %1433 = vector.broadcast %1425 : vector<1x100xf32> to vector<10x100xf32>
    %1434 = arith.mulf %334, %1433 : vector<10x100xf32>
    %cst_405 = arith.constant dense<0.000000e+00> : vector<10xf32>
    %1435 = vector.multi_reduction <add>, %1434, %cst_405 [1] : vector<10x100xf32> to vector<10xf32>
    %1436 = vector.shape_cast %1435 : vector<10xf32> to vector<10x1xf32>
    %1437 = vector.broadcast %1425 : vector<1x100xf32> to vector<10x100xf32>
    %1438 = arith.mulf %667, %1437 : vector<10x100xf32>
    %cst_406 = arith.constant dense<0.000000e+00> : vector<10xf32>
    %1439 = vector.multi_reduction <add>, %1438, %cst_406 [1] : vector<10x100xf32> to vector<10xf32>
    %1440 = vector.shape_cast %1439 : vector<10xf32> to vector<10x1xf32>
    %1441 = arith.subf %679, %1436 : vector<10x1xf32>
    %1442 = arith.subf %681, %1440 : vector<10x1xf32>
    %cst_407 = arith.constant 1.000000e+00 : f32
    %1443 = vector.broadcast %cst_407 : f32 to vector<1x1xf32>
    %1444 = arith.maximumf %1430, %1443 : vector<1x1xf32>
    %1445 = tpu.reciprocal %1444 {approx = true} : vector<1x1xf32> -> vector<1x1xf32>
    %cst_408 = arith.constant 1.000000e+00 : f32
    %1446 = vector.broadcast %cst_408 : f32 to vector<1x1xf32>
    %1447 = arith.maximumf %1432, %1446 : vector<1x1xf32>
    %1448 = tpu.reciprocal %1447 {approx = true} : vector<1x1xf32> -> vector<1x1xf32>
    %cst_409 = arith.constant 0.000000e+00 : f32
    %1449 = vector.broadcast %cst_409 : f32 to vector<1x1xf32>
    %1450 = arith.cmpf ogt, %1432, %1449 : vector<1x1xf32>
    %cst_410 = arith.constant 0.000000e+00 : f32
    %1451 = vector.broadcast %cst_410 : f32 to vector<1x1xf32>
    %1452 = arith.cmpf ogt, %1430, %1451 : vector<1x1xf32>
    %1453 = vector.broadcast %1448 : vector<1x1xf32> to vector<10x1xf32>
    %1454 = arith.mulf %1441, %1453 : vector<10x1xf32>
    %1455 = vector.shape_cast %1450 : vector<1x1xi1> to vector<1x1xi1>
    %1456 = vector.broadcast %1455 : vector<1x1xi1> to vector<10x1xi1>
    %1457 = arith.select %1456, %1454, %1378 : vector<10x1xi1>, vector<10x1xf32>
    %1458 = vector.broadcast %1448 : vector<1x1xf32> to vector<10x1xf32>
    %1459 = arith.mulf %1442, %1458 : vector<10x1xf32>
    %1460 = vector.shape_cast %1450 : vector<1x1xi1> to vector<1x1xi1>
    %1461 = vector.broadcast %1460 : vector<1x1xi1> to vector<10x1xi1>
    %1462 = arith.select %1461, %1459, %1383 : vector<10x1xi1>, vector<10x1xf32>
    %1463 = vector.broadcast %1445 : vector<1x1xf32> to vector<10x1xf32>
    %1464 = arith.mulf %1436, %1463 : vector<10x1xf32>
    %1465 = vector.shape_cast %1452 : vector<1x1xi1> to vector<1x1xi1>
    %1466 = vector.broadcast %1465 : vector<1x1xi1> to vector<10x1xi1>
    %1467 = arith.select %1466, %1464, %1388 : vector<10x1xi1>, vector<10x1xf32>
    %1468 = vector.broadcast %1445 : vector<1x1xf32> to vector<10x1xf32>
    %1469 = arith.mulf %1440, %1468 : vector<10x1xf32>
    %1470 = vector.shape_cast %1452 : vector<1x1xi1> to vector<1x1xi1>
    %1471 = vector.broadcast %1470 : vector<1x1xi1> to vector<10x1xi1>
    %1472 = arith.select %1471, %1469, %1393 : vector<10x1xi1>, vector<10x1xf32>
    %1473 = arith.fptosi %1425 : vector<1x100xf32> to vector<1x100xi32>
    %c0_411 = arith.constant 0 : index
    %c0_412 = arith.constant 0 : index
    %1474 = vector.load %arg11[%c0_411, %c0_412] : memref<1x100xi32, #tpu.memory_space<vmem>>, vector<1x100xi32>
    tpu.vector_store %arg11[%c0_411, %c0_412], %1473 {strides = array<i32>} : memref<1x100xi32, #tpu.memory_space<vmem>>, vector<1x100xi32>,
    return
  }
}

</mosaic_0001>

<bundles_post_ra>
// kernel: _ensemble_forward_jit.1
= control target key start
LH: loop header
LB: loop body
LE: loop exit
PB: predicated region body
PF: predicated region fallthrough
CT: control target
= control target key end

     0   :  { %s4334_s0 = inlined_call_operand.vmem [shape: f32[3,3], index: 0, kind: input, shape index: {}]   ;;  %s4335_s1 = inlined_call_operand.vmem [shape: f32[1,3], index: 1, kind: input, shape index: {}]   ;;  %s4336_s2 = inlined_call_operand.<no memory space> [shape: f32[1], index: 2, kind: input, shape index: {}]   ;;  %s4337_s3 = inlined_call_operand.vmem [shape: s32[3,2], index: 3, kind: input, shape index: {}]   ;;  %s4338_s4 = inlined_call_operand.vmem [shape: f32[3,10], index: 4, kind: input, shape index: {}]   ;;  %s4339_s5 = inlined_call_operand.vmem [shape: f32[3,3], index: 5, kind: input, shape index: {}]   ;;  %s4340_s6 = inlined_call_operand.vmem [shape: f32[1,3], index: 6, kind: input, shape index: {}]   ;;  %s4341_s7 = inlined_call_operand.<no memory space> [shape: f32[1], index: 7, kind: input, shape index: {}]   ;;  %s4342_s8 = inlined_call_operand.vmem [shape: s32[3,2], index: 8, kind: input, shape index: {}]   ;;  %s4343_s9 = inlined_call_operand.vmem [shape: f32[3,10], index: 9, kind: input, shape index: {}]   ;;  %s4344_s10 = inlined_call_operand.vmem [shape: f32[2,10,100], index: 10, kind: output, shape index: {0}]   ;;  %s4345_s11 = inlined_call_operand.hbm [shape: s32[1,100], index: 11, kind: output, shape index: {1}]  }
   0x1   :  { %4349 = sst [smem:[#allocation26_spill]] %s4341_s7 }
   0x2   :  { %4350 = sst [smem:[#allocation27_spill]] %s4344_s10 }
   0x3   :  { %4351 = sst [smem:[#allocation28_spill]] %s4345_s11 }
   0x4   :  { %19 = vsyncpa [#allocation6], 0 }
   0x5   :  { %20 = vsyncpa [#allocation8], 0 }
   0x6   :  { %21 = vsyncpa [#allocation11], 0 }
   0x7   :  { %22 = vsyncpa [#allocation14], 0 }
   0x8   :  { %23 = vsyncpa [#allocation17], 0  ;;  %s41_s19 = sshll.u32 %s4335_s1, 4  ;;  %s42_s19 = int_to_ptr.vmem [resolvable:$true] %s41_s19 }
   0x9   :  { %24 = vsyncpa [#allocation5], 0  ;;  %s63_s22 = sshll.u32 %s4338_s4, 4  ;;  %s2728_s23 = scalar_lea.vmem %s42_s19, 16  ;;  %s64_s22 = int_to_ptr.vmem [resolvable:$true] %s63_s22 }
   0xa   :  { %p2729_p0 = scmp.ne.s32.totalorder %s42_s19, %s2728_s23  ;;  %p2733_p1 = scmp.lt.s32.totalorder %s42_s19, %s42_s19 }
   0xb   :  { %p2734_p2 = scmp.lt.s32.totalorder %s2728_s23, %s2728_s23 }
   0xd   :  { %p2735_p3 = por %p2734_p2, %p2733_p1 }
   0xf   :  { %p2736_p4 = pnand %p2735_p3, %p2729_p0 }
  0x11   :  { %2739 = shalt.err (!%p2736_p4)
}
  0x12   :  { %s2858_s24 = smov [#allocation7]   ;;  %s2740_s25 = scalar_lea.vmem %s64_s22, 64 }
  0x13   :  { %44 = dma.vmem_to_smem %s42_s19, 16, %s2858_s24, [#allocation8]  }
  0x14   :  { %p2741_p5 = scmp.ne.s32.totalorder %s64_s22, %s2740_s25  ;;  %p2745_p6 = scmp.lt.s32.totalorder %s64_s22, %s64_s22 }
  0x15   :  { %p2746_p7 = scmp.lt.s32.totalorder %s2740_s25, %s2740_s25 }
  0x17   :  { %p2747_p8 = por %p2746_p7, %p2745_p6 }
  0x19   :  { %p2748_p9 = pnand %p2747_p8, %p2741_p5 }
  0x1b   :  { %2751 = shalt.err (!%p2748_p9)
}
  0x1c   :  { %s2859_s1 = smov [#allocation10]   ;;  %s83_s27 = sshll.u32 %s4340_s6, 4  ;;  %s84_s27 = int_to_ptr.vmem [resolvable:$true] %s83_s27 }
  0x1d   :  { %66 = dma.vmem_to_smem %s64_s22, 64, %s2859_s1, [#allocation11]  }
  0x1e   :  { %s31_s30 = sshll.u32 %s4334_s0, 4  ;;  %s2752_s12 = scalar_lea.vmem %s84_s27, 16  ;;  %s32_s30 = int_to_ptr.vmem [resolvable:$true] %s31_s30 }
  0x1f   :  { %p2753_p10 = scmp.ne.s32.totalorder %s84_s27, %s2752_s12  ;;  %p2757_p11 = scmp.lt.s32.totalorder %s84_s27, %s84_s27 }
  0x20   :  { %p2758_p12 = scmp.lt.s32.totalorder %s2752_s12, %s2752_s12 }
  0x22   :  { %p2759_p13 = por %p2758_p12, %p2757_p11 }
  0x24   :  { %p2760_p0 = pnand %p2759_p13, %p2753_p10 }
  0x26   :  { %2763 = shalt.err (!%p2760_p0)
}
  0x27   :  { %s2860_s13 = smov [#allocation13]   ;;  %s2764_s14 = scalar_lea.vmem %s32_s30, 64 }
  0x28   :  { %86 = dma.vmem_to_smem %s84_s27, 16, %s2860_s13, [#allocation14]  }
  0x29   :  { %p2765_p1 = scmp.ne.s32.totalorder %s32_s30, %s2764_s14  ;;  %p2769_p2 = scmp.lt.s32.totalorder %s32_s30, %s32_s30 }
  0x2a   :  { %p2770_p3 = scmp.lt.s32.totalorder %s2764_s14, %s2764_s14 }
  0x2c   :  { %p2771_p4 = por %p2770_p3, %p2769_p2 }
  0x2e   :  { %p2772_p5 = pnand %p2771_p4, %p2765_p1 }
  0x30   :  { %2775 = shalt.err (!%p2772_p5)
}
  0x31   :  { %s2861_s6 = smov [#allocation4]   ;;  %s53_s16 = sshll.u32 %s4337_s3, 4  ;;  %s54_s16 = int_to_ptr.vmem [resolvable:$true] %s53_s16 }
  0x32   :  { %34 = dma.vmem_to_smem %s32_s30, 64, %s2861_s6, [#allocation6]  }
  0x33   :  { %s73_s19 = sshll.u32 %s4339_s5, 4  ;;  %s2776_s20 = scalar_lea.vmem %s54_s16, 64  ;;  %s74_s19 = int_to_ptr.vmem [resolvable:$true] %s73_s19 }
  0x34   :  { %p2777_p6 = scmp.ne.s32.totalorder %s54_s16, %s2776_s20  ;;  %p2781_p7 = scmp.lt.s32.totalorder %s54_s16, %s54_s16 }
  0x35   :  { %p2782_p8 = scmp.lt.s32.totalorder %s2776_s20, %s2776_s20 }
  0x37   :  { %p2783_p9 = por %p2782_p8, %p2781_p7 }
  0x39   :  { %p2784_p10 = pnand %p2783_p9, %p2777_p6 }
  0x3b   :  { %2787 = shalt.err (!%p2784_p10)
}
  0x3c   :  { %s2862_s21 = smov [#allocation9]   ;;  %s2788_s22 = scalar_lea.vmem %s74_s19, 64 }
  0x3d   :  { %56 = dma.vmem_to_smem %s54_s16, 64, %s2862_s21, [#allocation8]  }
  0x3e   :  { %p2789_p11 = scmp.ne.s32.totalorder %s74_s19, %s2788_s22  ;;  %p2793_p12 = scmp.lt.s32.totalorder %s74_s19, %s74_s19 }
  0x3f   :  { %p2794_p13 = scmp.lt.s32.totalorder %s2788_s22, %s2788_s22 }
  0x41   :  { %p2795_p0 = por %p2794_p13, %p2793_p12 }
  0x43   :  { %p2796_p1 = pnand %p2795_p0, %p2789_p11 }
  0x45   :  { %2799 = shalt.err (!%p2796_p1)
}
  0x46   :  { %s2863_s3 = smov [#allocation12]   ;;  %s95_s24 = sshll.u32 %s4342_s8, 4  ;;  %s96_s24 = int_to_ptr.vmem [resolvable:$true] %s95_s24 }
  0x47   :  { %76 = dma.vmem_to_smem %s74_s19, 64, %s2863_s3, [#allocation11]  }
  0x48   :  { %s105_s4 = sshll.u32 %s4343_s9, 4  ;;  %s2800_s26 = scalar_lea.vmem %s96_s24, 64  ;;  %s106_s4 = int_to_ptr.vmem [resolvable:$true] %s105_s4 }
  0x49   :  { %p2801_p2 = scmp.ne.s32.totalorder %s96_s24, %s2800_s26  ;;  %p2805_p3 = scmp.lt.s32.totalorder %s96_s24, %s96_s24 }
  0x4a   :  { %p2806_p4 = scmp.lt.s32.totalorder %s2800_s26, %s2800_s26 }
  0x4c   :  { %p2807_p5 = por %p2806_p4, %p2805_p3 }
  0x4e   :  { %p2808_p6 = pnand %p2807_p5, %p2801_p2 }
  0x50   :  { %2811 = shalt.err (!%p2808_p6)
}
  0x51   :  { %s2864_s27 = smov [#allocation15]   ;;  %s2812_s28 = scalar_lea.vmem %s106_s4, 64 }
  0x52   :  { %98 = dma.vmem_to_smem %s96_s24, 64, %s2864_s27, [#allocation14]  }
  0x53   :  { %p2813_p7 = scmp.ne.s32.totalorder %s106_s4, %s2812_s28  ;;  %p2817_p8 = scmp.lt.s32.totalorder %s106_s4, %s106_s4 }
  0x54   :  { %p2818_p9 = scmp.lt.s32.totalorder %s2812_s28, %s2812_s28 }
  0x56   :  { %p2819_p10 = por %p2818_p9, %p2817_p8 }
  0x58   :  { %p2820_p11 = pnand %p2819_p10, %p2813_p7 }
  0x5a   :  { %2823 = shalt.err (!%p2820_p11)
}
  0x5b   :  { %s2865_s8 = smov [#allocation16]  }
  0x5c   :  { %108 = dma.vmem_to_smem %s106_s4, 64, %s2865_s8, [#allocation17]  }
  0x5d   :  { %2846 = dma.done.wait [#allocation6], 64  }
  0x5e   :  { %2847 = vsyncadd [#allocation6], 4294967232 }
  0x5f   :  { %2848 = dma.done.wait [#allocation8], 80  }
  0x60   :  { %2849 = vsyncadd [#allocation8], 4294967216 }
  0x61   :  { %2850 = dma.done.wait [#allocation11], 128  }
  0x62   :  { %2851 = vsyncadd [#allocation11], 4294967168 }
  0x63   :  { %2852 = dma.done.wait [#allocation14], 80  }
  0x64   :  { %2853 = vsyncadd [#allocation14], 4294967216 }
  0x65   :  { %2854 = dma.done.wait [#allocation17], 64  }
  0x66   :  { %2855 = vsyncadd [#allocation17], 4294967232 }
  0x67   :  { %133 = sfence }
  0x68   :  { %s2955_s9 = sld [smem:[#allocation4 + $0x1]]  ;;  %s2485_s29 = sld [smem:[#allocation4 + $0x2]]  ;;  %v134_v2 = vlaneseq  ;;  %vm465_vm10 = vcmask 1041408   ;;  %vm866_vm14 = vcmask 818176   ;;  %vm868_vm15 = vcmask 812032  }
  0x69   :  { %s2957_s30 = sld [smem:[#allocation4 + $0x81]]  ;;  %s2487_s12 = sld [smem:[#allocation4 + $0x82]] }
  0x6a   :  { %s2488_s13 = sld [smem:[#allocation4 + $0x102]]  ;;  %s279_s14 = sld [smem:[#allocation4]]  ;;  %v2984_v3 = vshrl.u32 %v134_v2, 7 }
  0x6c   :  { %vm139_vm0 = vcmp.eq.s32.totalorder %v2984_v3, 0  ;;  %vm145_vm1 = vcmp.eq.s32.totalorder %v2984_v3, 1  ;;  %vm151_vm2 = vcmp.eq.s32.totalorder %v2984_v3, 2  ;;  %vm157_vm3 = vcmp.eq.s32.totalorder %v2984_v3, 3 }
  0x6d   :  { %vm163_vm4 = vcmp.eq.s32.totalorder %v2984_v3, 4  ;;  %v3059_v29 = vadd.s32 8, %v2984_v3  ;;  %vm169_vm5 = vcmp.eq.s32.totalorder %v2984_v3, 5  ;;  %vm175_vm6 = vcmp.eq.s32.totalorder %v2984_v3, 6 }
  0x6e   :  { %s305_s6 = smul.f32 %s2955_s9, %s2955_s9  ;;  %vm181_vm8 = vcmp.eq.s32.totalorder %v2984_v3, 7 }
  0x6f   :  { %s296_s0 = smul.f32 %s2957_s30, %s2485_s29  ;;  %vm188_vm7 = vcmp.eq.s32.totalorder %v3059_v29, 8  ;;  %vm194_vm9 = vcmp.eq.s32.totalorder %v3059_v29, 9 }
  0x70   :  { %s289_s15 = smul.f32 %s2488_s13, %s2957_s30 }
  0x71   :  { %s290_s16 = smul.f32 %s2487_s12, %s2487_s12 }
  0x72   :  { %s292_s17 = smul.f32 %s2487_s12, %s2485_s29 }
  0x73   :  { %s2963_s18 = ssub.f32 %s289_s15, %s290_s16  ;;  %s293_s19 = smul.f32 %s2488_s13, %s2955_s9 }
  0x74   :  { %s295_s20 = smul.f32 %s2487_s12, %s2955_s9 }
  0x75   :  { %s2967_s21 = ssub.f32 %s292_s17, %s293_s19  ;;  %s307_s22 = smul.f32 %s2963_s18, %s279_s14 }
  0x76   :  { %s2970_s3 = ssub.f32 %s295_s20, %s296_s0  ;;  %s298_s5 = smul.f32 %s2488_s13, %s279_s14 }
  0x77   :  { %s308_s23 = smul.f32 %s2955_s9, %s2967_s21  ;;  %s141_s13 = sld [smem:[#allocation10]] }
  0x78   :  { %s310_s24 = smul.f32 %s2485_s29, %s2970_s3  ;;  %s2464_s0 = sld [smem:[#allocation10 + $0x80]] }
  0x79   :  { %s309_s25 = sadd.f32 %s308_s23, %s307_s22  ;;  %s299_s1 = smul.f32 %s2485_s29, %s2485_s29 }
  0x7a   :  { %s301_s4 = smul.f32 %s2485_s29, %s2955_s9  ;;  %s2474_s17 = sld [smem:[#allocation10 + $0x100]] }
  0x7b   :  { %s311_s26 = sadd.f32 %s310_s24, %s309_s25  ;;  %s302_s27 = smul.f32 %s2487_s12, %s279_s14 }
  0x7c   :  { %s2976_s28 = ssub.f32 %s298_s5, %s299_s1  ;;  %s304_s8 = smul.f32 %s2957_s30, %s279_s14 }
  0x7d   :  { %v312_v0 = vstv %s311_s26  ;;  %s2979_s15 = ssub.f32 %s301_s4, %s302_s27  ;;  %s2455_s19 = sld [smem:[#allocation10 + $0x1]]  ;;  %v142_v4 = vstv %s141_s13 }
  0x7e   :  { %2648 = vrcp.f32 %v312_v0  ;;  %s2981_s16 = ssub.f32 %s304_s8, %s305_s6  ;;  %s2465_s9 = sld [smem:[#allocation10 + $0x81]]  ;;  %v200_v5 = vstv %s2464_s0  ;;  %v143_v7 = vsel %vm139_vm0, %v142_v4, 0.0 }
  0x7f   :  { %s2475_s29 = sld [smem:[#allocation10 + $0x101]]  ;;  %s2456_s12 = sld [smem:[#allocation10 + $0x2]]  ;;  %v201_v9 = vsel %vm139_vm0, %v200_v5, 0.0 }
  0x80   :  { %s2986_s30 = sld [smem:[#allocation10 + $0x82]]  ;;  %s2991_s6 = sld [smem:[#allocation10 + $0x3]]  ;;  %v240_v6 = vstv %s2474_s17 }
  0x81   :  { %s2989_s14 = sld [smem:[#allocation10 + $0x102]]  ;;  %s2993_s20 = sld [smem:[#allocation10 + $0x83]]  ;;  %v241_v11 = vsel %vm139_vm0, %v240_v6, 0.0 }
  0x82   :  { %s2998_s22 = sld [smem:[#allocation10 + $0x103]]  ;;  %s3000_s5 = sld [smem:[#allocation10 + $0x4]] }
  0x83   :  { %v148_v8 = vstv %s2455_s19  ;;  %s3004_s23 = sld [smem:[#allocation10 + $0x84]]  ;;  %s3013_s25 = sld [smem:[#allocation10 + $0x5]] }
  0x84   :  { %v204_v10 = vstv %s2465_s9  ;;  %v149_v13 = vsel %vm145_vm1, %v148_v8, %v143_v7  ;;  %s3011_s24 = sld [smem:[#allocation10 + $0x104]]  ;;  %s3018_s1 = sld [smem:[#allocation10 + $0x85]] }
  0x85   :  { %v244_v12 = vstv %s2475_s29  ;;  %v154_v14 = vstv %s2456_s12  ;;  %v205_v15 = vsel %vm145_vm1, %v204_v10, %v201_v9  ;;  %s3027_s4 = sld [smem:[#allocation10 + $0x105]]  ;;  %s3029_s26 = sld [smem:[#allocation10 + $0x6]] }
  0x86   :  { %v208_v16 = vstv %s2986_s30  ;;  %v245_v17 = vsel %vm145_vm1, %v244_v12, %v241_v11  ;;  %v155_v19 = vsel %vm151_vm2, %v154_v14, %v149_v13  ;;  %v160_v20 = vstv %s2991_s6  ;;  %s3031_s27 = sld [smem:[#allocation10 + $0x8]]  ;;  %s3036_s8 = sld [smem:[#allocation10 + $0x86]] }
  0x87   :  { %v248_v18 = vstv %s2989_s14  ;;  %v209_v21 = vsel %vm151_vm2, %v208_v16, %v205_v15  ;;  %v212_v22 = vstv %s2993_s20  ;;  %s3038_s13 = sld [smem:[#allocation10 + $0x88]]  ;;  %v161_v25 = vsel %vm157_vm3, %v160_v20, %v155_v19  ;;  %s3047_s0 = sld [smem:[#allocation10 + $0x106]] }
  0x88   :  { %v2649_v1 = vpop.eup %2648  ;;  %v249_v23 = vsel %vm151_vm2, %v248_v18, %v245_v17  ;;  %v252_v24 = vstv %s2998_s22  ;;  %v166_v26 = vstv %s3000_s5  ;;  %s3049_s17 = sld [smem:[#allocation10 + $0x108]]  ;;  %s3051_s19 = sld [smem:[#allocation10 + $0x7]]  ;;  %v213_v27 = vsel %vm157_vm3, %v212_v22, %v209_v21 }
  0x89   :  { %2561 = vpush %v2649_v1  ;;  %s3053_s9 = sld [smem:[#allocation10 + $0x9]]  ;;  %v216_v28 = vstv %s3004_s23  ;;  %s3061_s29 = sld [smem:[#allocation10 + $0x87]]  ;;  %v253_v30 = vsel %vm157_vm3, %v252_v24, %v249_v23  ;;  %v167_v32 = vsel %vm163_vm4, %v166_v26, %v161_v25  ;;  %v172_v33 = vstv %s3013_s25 }
  0x8a   :  { %s3063_s12 = sld [smem:[#allocation10 + $0x89]]  ;;  %v256_v31 = vstv %s3011_s24  ;;  %s3072_s30 = sld [smem:[#allocation10 + $0x107]]  ;;  %v217_v34 = vsel %vm163_vm4, %v216_v28, %v213_v27  ;;  %v220_v35 = vstv %s3018_s1  ;;  %v173_v38 = vsel %vm169_vm5, %v172_v33, %v167_v32 }
  0x8b   :  { %s3074_s14 = sld [smem:[#allocation10 + $0x109]]  ;;  %v257_v36 = vsel %vm163_vm4, %v256_v31, %v253_v30  ;;  %v260_v37 = vstv %s3027_s4  ;;  %v178_v39 = vstv %s3029_s26  ;;  %v221_v41 = vsel %vm169_vm5, %v220_v35, %v217_v34  ;;  %s3093_s6 = sld [smem:[#allocation7]] }
  0x8c   :  { %v190_v40 = vstv %s3031_s27  ;;  %v224_v42 = vstv %s3036_s8  ;;  %v261_v44 = vsel %vm169_vm5, %v260_v37, %v257_v36  ;;  %s3100_s20 = sld [smem:[#allocation7 + $0x1]]  ;;  %v179_v47 = vsel %vm175_vm6, %v178_v39, %v173_v38  ;;  %s3120_s5 = sld [smem:[#allocation7 + $0x2]] }
  0x8d   :  { %v232_v43 = vstv %s3038_s13  ;;  %v264_v45 = vstv %s3047_s0  ;;  %v192_v49 = vsel %vm188_vm7, %v190_v40, 0.0  ;;  %v225_v51 = vsel %vm175_vm6, %v224_v42, %v221_v41 }
  0x8e   :  { %v272_v46 = vstv %s3049_s17  ;;  %v184_v48 = vstv %s3051_s19  ;;  %v234_v53 = vsel %vm188_vm7, %v232_v43, 0.0  ;;  %v265_v55 = vsel %vm175_vm6, %v264_v45, %v261_v44 }
  0x8f   :  { %v196_v50 = vstv %s3053_s9  ;;  %v228_v52 = vstv %s3061_s29  ;;  %v274_v57 = vsel %vm188_vm7, %v272_v46, 0.0  ;;  %v185_v59 = vsel %vm181_vm8, %v184_v48, %v179_v47 }
  0x90   :  { %v236_v54 = vstv %s3063_s12  ;;  %v268_v56 = vstv %s3072_s30  ;;  %v198_v60 = vsel %vm194_vm9, %v196_v50, %v192_v49  ;;  %v229_v61 = vsel %vm181_vm8, %v228_v52, %v225_v51 }
  0x91   :  { %v276_v58 = vstv %s3074_s14  ;;  %v238_v62 = vsel %vm194_vm9, %v236_v54, %v234_v53  ;;  %v269_v0 = vsel %vm181_vm8, %v268_v56, %v265_v55  ;;  %v387_v4 = vstv %s3093_s6 }
  0x92   :  { %v278_v1 = vsel %vm194_vm9, %v276_v58, %v274_v57  ;;  %v390_v8 = vstv %s3100_s20  ;;  %v395_v49 = vstv %s3120_s5 }
  0xba   :  { %s2562_s22 = spop %2561 }
  0xbb   :  { %s3123_s23 = smul.f32 %s2562_s22, %s2963_s18 }
  0xbc   :  { %s3130_s24 = smul.f32 %s2562_s22, %s2967_s21 }
  0xbd   :  { %s3137_s18 = smul.f32 %s2562_s22, %s2970_s3  ;;  %v345_v63 = vstv %s3123_s23 }
  0xbe   :  { %s3146_s21 = smul.f32 %s2562_s22, %s2976_s28  ;;  %v348_v5 = vstv %s3130_s24  ;;  %v346_v6 = vmul.f32 %v345_v63, %v185_v59  ;;  %v347_v7 = vmul.f32 %v345_v63, %v198_v60 }
  0xbf   :  { %s3151_s3 = smul.f32 %s2562_s22, %s2979_s15  ;;  %v353_v9 = vstv %s3137_s18  ;;  %v349_v10 = vmul.f32 %v348_v5, %v229_v61  ;;  %v350_v11 = vmul.f32 %v348_v5, %v238_v62  ;;  %v360_v12 = vmul.f32 %v348_v5, %v185_v59 }
  0xc0   :  { %s3155_s25 = smul.f32 %s2562_s22, %s2981_s16  ;;  %v362_v13 = vstv %s3146_s21  ;;  %v354_v14 = vmul.f32 %v353_v9, %v269_v0  ;;  %v355_v15 = vmul.f32 %v353_v9, %v278_v1  ;;  %v361_v16 = vmul.f32 %v348_v5, %v198_v60 }
  0xc1   :  { %s321_s28 = smul.f32 %s3123_s23, %s3093_s6  ;;  %v367_v17 = vstv %s3151_s3  ;;  %v351_v18 = vadd.f32 %v349_v10, %v346_v6  ;;  %v352_v19 = vadd.f32 %v350_v11, %v347_v7  ;;  %v363_v20 = vmul.f32 %v362_v13, %v229_v61 }
  0xc2   :  { %s322_s15 = smul.f32 %s3100_s20, %s3130_s24  ;;  %v364_v21 = vmul.f32 %v362_v13, %v238_v62  ;;  %v368_v22 = vmul.f32 %v367_v17, %v269_v0  ;;  %v369_v23 = vmul.f32 %v367_v17, %v278_v1  ;;  %v374_v24 = vmul.f32 %v353_v9, %v185_v59 }
  0xc3   :  { %s324_s16 = smul.f32 %s3120_s5, %s3137_s18  ;;  %v3165_v25 = vadd.f32 %v354_v14, %v351_v18  ;;  %v3167_v26 = vadd.f32 %v355_v15, %v352_v19  ;;  %v365_v27 = vadd.f32 %v363_v20, %v360_v12  ;;  %v375_v28 = vmul.f32 %v353_v9, %v198_v60 }
  0xc4   :  { %s323_s1 = sadd.f32 %s322_s15, %s321_s28  ;;  %s326_s4 = smul.f32 %s3130_s24, %s3093_s6  ;;  %v366_v30 = vadd.f32 %v364_v21, %v361_v16  ;;  %v376_v31 = vmul.f32 %v367_v17, %v229_v61  ;;  %v377_v32 = vmul.f32 %v367_v17, %v238_v62  ;;  %v380_v33 = vstv %s3155_s25 }
  0xc5   :  { %s327_s26 = smul.f32 %s3100_s20, %s3146_s21  ;;  %v358_v34 = vsub.f32 0.0, %v3165_v25  ;;  %v359_v35 = vsub.f32 0.0, %v3167_v26  ;;  %v3176_v36 = vadd.f32 %v368_v22, %v365_v27  ;;  %v381_v37 = vmul.f32 %v380_v33, %v269_v0  ;;  %s4346_s24 = smov 1e-20  }
  0xc6   :  { %s3178_s27 = sadd.f32 %s324_s16, %s323_s1  ;;  %s329_s8 = smul.f32 %s3120_s5, %s3151_s3  ;;  %v3182_v38 = vadd.f32 %v369_v23, %v366_v30  ;;  %v378_v39 = vadd.f32 %v376_v31, %v374_v24  ;;  %v379_v40 = vadd.f32 %v377_v32, %v375_v28  ;;  %v382_v41 = vmul.f32 %v380_v33, %v278_v1 }
  0xc7   :  { %s328_s13 = sadd.f32 %s327_s26, %s326_s4  ;;  %s331_s0 = smul.f32 %s3137_s18, %s3093_s6  ;;  %v372_v42 = vsub.f32 0.0, %v3176_v36  ;;  %v388_v43 = vmul.f32 %v387_v4, %v358_v34  ;;  %v389_v47 = vmul.f32 %v387_v4, %v359_v35  ;;  %v400_v61 = vstv %s4336_s2 }
  0xc8   :  { %s332_s17 = smul.f32 %s3100_s20, %s3151_s3  ;;  %v373_v44 = vsub.f32 0.0, %v3182_v38  ;;  %v3192_v45 = vadd.f32 %v381_v37, %v378_v39  ;;  %v3194_v46 = vadd.f32 %v382_v41, %v379_v40  ;;  %s3220_s21 = sld [smem:[#allocation12 + $0x102]]  ;;  %v408_v7 = vstv %s3178_s27 }
  0xc9   :  { %s3198_s19 = sadd.f32 %s329_s8, %s328_s13  ;;  %s334_s9 = smul.f32 %s3120_s5, %s3155_s25  ;;  %v391_v48 = vmul.f32 %v390_v8, %v372_v42 }
  0xca   :  { %s333_s29 = sadd.f32 %s332_s17, %s331_s0  ;;  %s336_s12 = smul.f32 %s3178_s27, %s3093_s6  ;;  %v385_v50 = vsub.f32 0.0, %v3192_v45  ;;  %v386_v51 = vsub.f32 0.0, %v3194_v46  ;;  %v392_v52 = vmul.f32 %v390_v8, %v373_v44 }
  0xcb   :  { %s337_s30 = smul.f32 %s3100_s20, %s3198_s19  ;;  %v393_v53 = vadd.f32 %v391_v48, %v388_v43  ;;  %s3218_s20 = sld [smem:[#allocation12]]  ;;  %v413_v8 = vstv %s3198_s19 }
  0xcc   :  { %s3213_s14 = sadd.f32 %s334_s9, %s333_s29  ;;  %v394_v54 = vadd.f32 %v392_v52, %v389_v47  ;;  %v396_v55 = vmul.f32 %v395_v49, %v385_v50  ;;  %v397_v56 = vmul.f32 %v395_v49, %v386_v51  ;;  %s3222_s3 = sld [smem:[#allocation12 + $0x2]] }
  0xcd   :  { %s338_s22 = sadd.f32 %s337_s30, %s336_s12  ;;  %s3226_s25 = sld [smem:[#allocation12 + $0x82]] }
  0xce   :  { %s339_s23 = smul.f32 %s3120_s5, %s3213_s14  ;;  %v398_v57 = vadd.f32 %v396_v55, %v393_v53  ;;  %v399_v58 = vadd.f32 %v397_v56, %v394_v54  ;;  %s3224_s5 = sld [smem:[#allocation12 + $0x1]]  ;;  %v418_v9 = vstv %s3213_s14 }
  0xcf   :  { %s3228_s28 = sld [smem:[#allocation12 + $0x81]] }
  0xd0   :  { %s340_s6 = sadd.f32 %s339_s23, %s338_s22  ;;  %v401_v62 = vsub.f32 %v398_v57, %v400_v61  ;;  %v402_v63 = vsub.f32 %v399_v58, %v400_v61  ;;  %s2502_s4 = sld [smem:[#allocation16 + $0x1]] }
  0xd1   :  { %s652_s15 = smul.f32 %s3220_s21, %s3218_s20 }
  0xd2   :  { %s341_s18 = smax.f32 %s4346_s24, %s340_s6  ;;  %s653_s16 = smul.f32 %s3222_s3, %s3222_s3  ;;  %v403_v0 = vmax.f32 %v401_v62, 0.0  ;;  %v404_v1 = vmax.f32 %v402_v63, 0.0 }
  0xd3   :  { %v342_v59 = vstv %s341_s18  ;;  %s656_s13 = smul.f32 %s3226_s25, %s3218_s20  ;;  %s3373_s24 = sld [smem:[#allocation16 + $0x86]] }
  0xd4   :  { %2650 = vrcp.f32 %v342_v59  ;;  %s655_s26 = smul.f32 %s3222_s3, %s3224_s5  ;;  %s3239_s8 = ssub.f32 %s652_s15, %s653_s16 }
  0xd5   :  { %s658_s0 = smul.f32 %s3228_s28, %s3218_s20 }
  0xd6   :  { %s3245_s17 = ssub.f32 %s655_s26, %s656_s13  ;;  %s659_s9 = smul.f32 %s3224_s5, %s3224_s5 }
  0xd7   :  { %s644_s2 = smul.f32 %s3226_s25, %s3226_s25  ;;  %s3305_s26 = sld [smem:[#allocation9 + $0x1]] }
  0xd8   :  { %s3249_s29 = ssub.f32 %s658_s0, %s659_s9  ;;  %s646_s27 = smul.f32 %s3226_s25, %s3222_s3 }
  0xd9   :  { %s643_s19 = smul.f32 %s3220_s21, %s3228_s28  ;;  %s2512_s13 = sld [smem:[#allocation16 + $0x81]] }
  0xda   :  { %4352 = sst [smem:[#allocation25_spill]] %s3249_s29  ;;  %s647_s30 = smul.f32 %s3220_s21, %s3224_s5 }
  0xdb   :  { %s3270_s14 = ssub.f32 %s643_s19, %s644_s2  ;;  %s649_s22 = smul.f32 %s3226_s25, %s3224_s5 }
  0xdc   :  { %s3274_s23 = ssub.f32 %s646_s27, %s647_s30  ;;  %s650_s6 = smul.f32 %s3228_s28, %s3222_s3 }
  0xdd   :  { %s661_s18 = smul.f32 %s3270_s14, %s3218_s20  ;;  %s483_s25 = sld [smem:[#allocation9]] }
  0xde   :  { %v2651_v60 = vpop.eup %2650  ;;  %s3280_s15 = ssub.f32 %s649_s22, %s650_s6  ;;  %s662_s16 = smul.f32 %s3224_s5, %s3274_s23 }
  0xdf   :  { %2563 = vpush %v2651_v60  ;;  %s2511_s5 = sld [smem:[#allocation16 + $0x80]]  ;;  %s3307_s0 = sld [smem:[#allocation16 + $0x101]] }
  0xe0   :  { %s663_s21 = sadd.f32 %s662_s16, %s661_s18  ;;  %s664_s1 = smul.f32 %s3222_s3, %s3280_s15 }
  0xe1   :  { %s513_s3 = sld [smem:[#allocation16]]  ;;  %s3313_s2 = sld [smem:[#allocation16 + $0x82]] }
  0xe2   :  { %s665_s20 = sadd.f32 %s664_s1, %s663_s21  ;;  %s2521_s28 = sld [smem:[#allocation16 + $0x100]] }
  0xe3   :  { %s3309_s9 = sld [smem:[#allocation9 + $0x80]]  ;;  %s3315_s27 = sld [smem:[#allocation16 + $0x102]] }
  0xe4   :  { %s3317_s19 = sld [smem:[#allocation16 + $0x3]]  ;;  %s2491_s30 = sadd.s32 4294967295, %s483_s25 }
  0xe5   :  { %s3319_s22 = sld [smem:[#allocation16 + $0x83]]  ;;  %s3321_s6 = sld [smem:[#allocation9 + $0x81]] }
  0xe6   :  { %s3325_s18 = sld [smem:[#allocation16 + $0x103]]  ;;  %s3328_s21 = sld [smem:[#allocation16 + $0x4]] }
  0xe7   :  { %s3332_s1 = smul.u32 10, %s2491_s30  ;;  %s3345_s25 = sld [smem:[#allocation9 + $0x100]] }
  0xe8   :  { %s3368_s30 = sld [smem:[#allocation16 + $0x8]]  ;;  %s3394_s16 = sld [smem:[#allocation16 + $0x89]] }
  0xe9   :  { %s4353_s7 = sadd.s32 4294967295, %s3305_s26 }
  0xea   :  { %s3410_s10 = sadd.s32 %s4353_s7, %s3332_s1  ;;  %s3430_s1 = sld [smem:[#allocation13]] }
  0xeb   :  { %s2497_s7 = sadd.s32 4294967295, %s3321_s6 }
  0xed   :  { %s2499_s11 = sadd.s32 4294967295, %s3345_s25  ;;  %s3436_s25 = sld [smem:[#allocation13 + $0x1]] }
  0xee   :  { %s505_s26 = smul.u32 10, %s2499_s11  ;;  %s3445_s11 = sld [smem:[#allocation13 + $0x2]] }
 0x110   :  { %s2564_s12 = spop %2563 }
 0x111   :  { %v405_v4 = vstv %s2564_s12  ;;  %s3311_s12 = sld [smem:[#allocation16 + $0x2]] }
 0x112   :  { %v406_v5 = vmul.f32 %v405_v4, %v403_v0  ;;  %v407_v6 = vmul.f32 %v405_v4, %v404_v1  ;;  %v666_v4 = vstv %s665_s20  ;;  %s3334_s20 = sld [smem:[#allocation16 + $0x84]] }
 0x114   :  { %v409_v10 = vmul.f32 %v408_v7, %v406_v5  ;;  %v410_v11 = vmul.f32 %v408_v7, %v407_v6  ;;  %v414_v12 = vmul.f32 %v413_v8, %v406_v5  ;;  %v415_v13 = vmul.f32 %v413_v8, %v407_v6 }
 0x115   :  { %v419_v14 = vmul.f32 %v418_v9, %v406_v5  ;;  %v420_v15 = vmul.f32 %v418_v9, %v407_v6 }
 0x116   :  { %v411_v16 = vsub.f32 %v358_v34, %v409_v10  ;;  %v412_v17 = vsub.f32 %v359_v35, %v410_v11  ;;  %v416_v18 = vsub.f32 %v372_v42, %v414_v12  ;;  %v417_v19 = vsub.f32 %v373_v44, %v415_v13 }
 0x117   :  { %v421_v20 = vsub.f32 %v385_v50, %v419_v14  ;;  %v422_v21 = vsub.f32 %v386_v51, %v420_v15  ;;  %v514_v13 = vstv %s513_s3  ;;  %v554_v14 = vstv %s2511_s5  ;;  %s3343_s5 = sld [smem:[#allocation16 + $0x104]]  ;;  %s3387_s3 = sld [smem:[#allocation16 + $0x9]] }
 0x118   :  { %v423_v22 = vmax.f32 %v411_v16, %v416_v18  ;;  %v424_v23 = vmax.f32 %v412_v17, %v417_v19  ;;  %v594_v15 = vstv %s2521_s28  ;;  %s3347_s28 = sld [smem:[#allocation16 + $0x5]] }
 0x11a   :  { %v425_v24 = vmax.f32 %v423_v22, %v421_v20  ;;  %v426_v27 = vmax.f32 %v424_v23, %v422_v21  ;;  %v522_v23 = vstv %s3311_s12  ;;  %s3364_s12 = sld [smem:[#allocation16 + $0x105]] }
 0x11c   :  { %v427_v28 = vsub.f32 %v411_v16, %v425_v24  ;;  %v428_v30 = vsub.f32 %v412_v17, %v426_v27  ;;  %v433_v31 = vsub.f32 %v416_v18, %v425_v24  ;;  %v434_v25 = vsub.f32 %v417_v19, %v426_v27 }
 0x11d   :  { %v441_v32 = vsub.f32 %v421_v20, %v425_v24  ;;  %v442_v33 = vsub.f32 %v422_v21, %v426_v27 }
 0x11e   :  { %v429_v26 = vmul.f32 1.442695, %v427_v28  ;;  %v431_v34 = vmul.f32 1.442695, %v428_v30  ;;  %v435_v35 = vmul.f32 1.442695, %v433_v31  ;;  %v602_v30 = vstv %s3315_s27 }
 0x11f   :  { %v437_v36 = vmul.f32 1.442695, %v434_v25  ;;  %v443_v37 = vmul.f32 1.442695, %v441_v32  ;;  %v445_v38 = vmul.f32 1.442695, %v442_v33  ;;  %v526_v25 = vstv %s3317_s19 }
 0x120   :  { %2652 = vpow2.f32 %v429_v26  ;;  %v566_v33 = vstv %s3319_s22  ;;  %s3375_s27 = sld [smem:[#allocation16 + $0x88]]  ;;  %s3383_s19 = sld [smem:[#allocation16 + $0x106]] }
 0x121   :  { %2654 = vpow2.f32 %v431_v34  ;;  %v606_v34 = vstv %s3325_s18  ;;  %s3385_s22 = sld [smem:[#allocation16 + $0x108]]  ;;  %s3392_s18 = sld [smem:[#allocation16 + $0x87]] }
 0x122   :  { %2656 = vpow2.f32 %v435_v35 }
 0x123   :  { %2658 = vpow2.f32 %v437_v36  ;;  %v530_v36 = vstv %s3328_s21  ;;  %s3399_s21 = sld [smem:[#allocation16 + $0x107]] }
 0x124   :  { %2660 = vpow2.f32 %v443_v37 }
 0x125   :  { %2662 = vpow2.f32 %v445_v38  ;;  %v570_v38 = vstv %s3334_s20  ;;  %s3405_s20 = sld [smem:[#allocation16 + $0x109]] }
 0x12a   :  { %v2653_v39 = vpop.eup %2652 }
 0x12b   :  { %v2655_v40 = vpop.eup %2654 }
 0x12c   :  { %v2657_v41 = vpop.eup %2656 }
 0x12d   :  { %v2659_v42 = vpop.eup %2658  ;;  %v439_v43 = vadd.f32 %v2657_v41, %v2653_v39 }
 0x12e   :  { %v2661_v44 = vpop.eup %2660  ;;  %v440_v45 = vadd.f32 %v2659_v42, %v2655_v40  ;;  %v610_v40 = vstv %s3343_s5  ;;  %v534_v42 = vstv %s3347_s28  ;;  %s4354_s5 = sadd.s32 4294967295, %s3309_s9 }
 0x12f   :  { %v2663_v46 = vpop.eup %2662  ;;  %v447_v47 = vadd.f32 %v2661_v44, %v439_v43  ;;  %s495_s29 = smul.u32 10, %s4354_s5 }
 0x130   :  { %v448_v48 = vadd.f32 %v2663_v46, %v440_v45  ;;  %v614_v46 = vstv %s3364_s12 }
 0x131   :  { %2664 = vlog2.f32 %v447_v47  ;;  %v3421_v47 = vand.u32 127, %v134_v2  ;;  %v586_v2 = vstv %s3375_s27 }
 0x132   :  { %2666 = vlog2.f32 %v448_v48 }
 0x133   :  { %2668 = vrcp.f32 %v666_v4  ;;  %v550_v4 = vstv %s3387_s3 }
 0x13b   :  { %v2665_v49 = vpop.eup %2664 }
 0x13c   :  { %v2667_v50 = vpop.eup %2666  ;;  %v450_v51 = vmul.f32 0.6931472, %v2665_v49 }
 0x13d   :  { %v452_v52 = vmul.f32 0.6931472, %v2667_v50  ;;  %v2669_v11 = vpop.eup %2668  ;;  %v546_v50 = vstv %s3368_s30 }
 0x13e   :  { %v453_v53 = vadd.f32 %v450_v51, %v425_v24  ;;  %v489_v51 = vstv %s3410_s10  ;;  %s3443_s10 = sadd.s32 %s2497_s7, %s495_s29 }
 0x13f   :  { %v454_v54 = vadd.f32 %v452_v52, %v426_v27  ;;  %v562_v27 = vstv %s3313_s2  ;;  %s3366_s2 = sld [smem:[#allocation16 + $0x7]]  ;;  %vm3488_vm11 = vcmp.eq.s32.totalorder %v3421_v47, %v489_v51 }
 0x140   :  { %v3286_v55 = vsub.f32 %v453_v53, %v411_v16  ;;  %v3288_v56 = vsub.f32 %v453_v53, %v416_v18  ;;  %v3290_v57 = vsub.f32 %v453_v53, %v421_v20  ;;  %v515_v16 = vsel %vm139_vm0, %v514_v13, 0.0 }
 0x141   :  { %v3292_v58 = vsub.f32 %v454_v54, %v412_v17  ;;  %v3294_v59 = vsub.f32 %v454_v54, %v417_v19  ;;  %v3296_v60 = vsub.f32 %v454_v54, %v422_v21  ;;  %v518_v17 = vstv %s2502_s4  ;;  %s3352_s4 = sld [smem:[#allocation9 + $0x101]] }
 0x142   :  { %v461_v61 = vmax.f32 %v3286_v55, %v3288_v56  ;;  %v555_v18 = vsel %vm139_vm0, %v554_v14, 0.0  ;;  %v558_v19 = vstv %s2512_s13  ;;  %v595_v20 = vsel %vm139_vm0, %v594_v15, 0.0  ;;  %s3354_s13 = sld [smem:[#allocation16 + $0x85]] }
 0x143   :  { %v462_v62 = vmax.f32 %v3292_v58, %v3294_v59  ;;  %v598_v21 = vstv %s3307_s0  ;;  %v519_v22 = vsel %vm145_vm1, %v518_v17, %v515_v16  ;;  %v559_v24 = vsel %vm145_vm1, %v558_v19, %v555_v18  ;;  %s3362_s0 = sld [smem:[#allocation16 + $0x6]] }
 0x144   :  { %v463_v63 = vmax.f32 %v461_v61, %v3290_v57  ;;  %v599_v28 = vsel %vm145_vm1, %v598_v21, %v595_v20  ;;  %v523_v31 = vsel %vm151_vm2, %v522_v23, %v519_v22  ;;  %v563_v32 = vsel %vm151_vm2, %v562_v27, %v559_v24 }
 0x145   :  { %v464_v0 = vmax.f32 %v462_v62, %v3296_v60  ;;  %v603_v26 = vsel %vm151_vm2, %v602_v30, %v599_v28  ;;  %v527_v35 = vsel %vm157_vm3, %v526_v25, %v523_v31  ;;  %v567_v37 = vsel %vm157_vm3, %v566_v33, %v563_v32 }
 0x146   :  { %v607_v39 = vsel %vm157_vm3, %v606_v34, %v603_v26  ;;  %v531_v41 = vsel %vm163_vm4, %v530_v36, %v527_v35  ;;  %v571_v43 = vsel %vm163_vm4, %v570_v38, %v567_v37  ;;  %v578_v53 = vstv %s3373_s24 }
 0x147   :  { %v466_v1 = vsel %vm465_vm10, %v464_v0, -inf  ;;  %v611_v45 = vsel %vm163_vm4, %v610_v40, %v607_v39  ;;  %v535_v48 = vsel %vm169_vm5, %v534_v42, %v531_v41  ;;  %s2501_s9 = sadd.s32 4294967295, %s3352_s4  ;;  %v542_v54 = vstv %s3366_s2 }
 0x148   :  { %v467_v5 = vmax.f32 %v463_v63, %v466_v1  ;;  %v574_v44 = vstv %s3354_s13  ;;  %v615_v61 = vsel %vm169_vm5, %v614_v46, %v611_v45  ;;  %v618_v62 = vstv %s3383_s19  ;;  %s3453_s24 = sadd.s32 %s2501_s9, %s505_s26 }
 0x149   :  { %v538_v49 = vstv %s3362_s0  ;;  %v575_v52 = vsel %vm169_vm5, %v574_v44, %v571_v43  ;;  %v626_v63 = vstv %s3385_s22  ;;  %v548_v1 = vsel %vm188_vm7, %v546_v50, 0.0 }
 0x14a   :  { %v468_v6 = vrot.slane %v467_v5, 4  ;;  %v539_v0 = vsel %vm175_vm6, %v538_v49, %v535_v48  ;;  %v630_v13 = vstv %s3405_s20  ;;  %v499_v14 = vstv %s3443_s10  ;;  %s4362_s10 = sld [smem:[#allocation27_spill]] }
 0x14b   :  { %v543_v15 = vsel %vm181_vm8, %v542_v54, %v539_v0  ;;  %v552_v16 = vsel %vm194_vm9, %v550_v4, %v548_v1  ;;  %v509_v17 = vstv %s3453_s24  ;;  %v741_v20 = vstv %s3430_s1 }
 0x14c   :  { %v469_v7 = vmax.f32 %v467_v5, %v468_v6  ;;  %v582_v5 = vstv %s3392_s18  ;;  %v579_v6 = vsel %vm175_vm6, %v578_v53, %v575_v52  ;;  %v744_v27 = vstv %s3436_s25 }
 0x14d   :  { %v583_v18 = vsel %vm181_vm8, %v582_v5, %v579_v6  ;;  %vm3505_vm12 = vcmp.eq.s32.totalorder %v3421_v47, %v499_v14  ;;  %v749_v25 = vstv %s3445_s11  ;;  %vm3516_vm13 = vcmp.eq.s32.totalorder %v3421_v47, %v509_v17 }
 0x14e   :  { %v470_v8 = vrot.slane %v469_v7, 2  ;;  %vm909_vm0 = vcmask 7168   ;;  %vm911_vm1 = vcmask 1024   ;;  %vm989_vm5 = vcmask 811008  }
 0x150   :  { %v471_v9 = vmax.f32 %v469_v7, %v470_v8  ;;  %v588_v7 = vsel %vm188_vm7, %v586_v2, 0.0  ;;  %v590_v8 = vstv %s3394_s16 }
 0x151   :  { %v592_v19 = vsel %vm194_vm9, %v590_v8, %v588_v7 }
 0x152   :  { %v472_v10 = vrot.slane %v471_v9, 1 }
 0x154   :  { %v473_v12 = vmax.f32 %v471_v9, %v472_v10  ;;  %v622_v9 = vstv %s3399_s21 }
 0x156   :  { %2565 = vpush %v473_v12  ;;  %v628_v12 = vsel %vm188_vm7, %v626_v63, 0.0 }
 0x157   :  { %2567 = vpush %v2669_v11  ;;  %v619_v11 = vsel %vm175_vm6, %v618_v62, %v615_v61  ;;  %v3501_v24 = vsel %vm194_vm9, %v630_v13, %v628_v12 }
 0x158   :  { %v623_v23 = vsel %vm181_vm8, %v622_v9, %v619_v11 }
 0x187   :  { %s2566_s6 = spop %2565 }
 0x188   :  { %v475_v10 = vstv %s2566_s6  ;;  %s3461_s29 = spop %2567 }
 0x189   :  { %2670 = vrcp.f32 %v475_v10  ;;  %s3471_s16 = smul.f32 %s3461_s29, %s3270_s14 }
 0x18a   :  { %s3480_s3 = smul.f32 %s3461_s29, %s3274_s23  ;;  %s4357_s23 = sld [smem:[#allocation25_spill]] }
 0x18b   :  { %s3494_s14 = smul.f32 %s3461_s29, %s3280_s15  ;;  %v699_v22 = vstv %s3471_s16 }
 0x18c   :  { %s3511_s28 = smul.f32 %s3461_s29, %s3239_s8  ;;  %v702_v30 = vstv %s3480_s3  ;;  %v700_v31 = vmul.f32 %v699_v22, %v543_v15  ;;  %v701_v3 = vmul.f32 %v699_v22, %v552_v16 }
 0x18d   :  { %s3522_s15 = smul.f32 %s3461_s29, %s3245_s17  ;;  %v707_v32 = vstv %s3494_s14  ;;  %v703_v33 = vmul.f32 %v702_v30, %v583_v18  ;;  %v704_v26 = vmul.f32 %v702_v30, %v592_v19  ;;  %v714_v34 = vmul.f32 %v702_v30, %v543_v15 }
 0x18e   :  { %v716_v35 = vstv %s3511_s28  ;;  %v708_v36 = vmul.f32 %v707_v32, %v623_v23  ;;  %v709_v37 = vmul.f32 %v707_v32, %v3501_v24  ;;  %v715_v38 = vmul.f32 %v702_v30, %v552_v16  ;;  %s675_s17 = smul.f32 %s3471_s16, %s3430_s1 }
 0x18f   :  { %v721_v39 = vstv %s3522_s15  ;;  %v705_v40 = vadd.f32 %v703_v33, %v700_v31  ;;  %v706_v41 = vadd.f32 %v704_v26, %v701_v3  ;;  %v717_v42 = vmul.f32 %v716_v35, %v583_v18  ;;  %s676_s4 = smul.f32 %s3436_s25, %s3480_s3 }
 0x190   :  { %s3527_s8 = smul.f32 %s3461_s29, %s4357_s23  ;;  %v718_v43 = vmul.f32 %v716_v35, %v592_v19  ;;  %v722_v44 = vmul.f32 %v721_v39, %v623_v23  ;;  %v723_v45 = vmul.f32 %v721_v39, %v3501_v24  ;;  %v728_v46 = vmul.f32 %v707_v32, %v543_v15  ;;  %s2867_s29 = smov 78  }
 0x191   :  { %s678_s13 = smul.f32 %s3445_s11, %s3494_s14  ;;  %v3539_v48 = vadd.f32 %v708_v36, %v705_v40  ;;  %v3541_v49 = vadd.f32 %v709_v37, %v706_v41  ;;  %v719_v50 = vadd.f32 %v717_v42, %v714_v34  ;;  %v729_v51 = vmul.f32 %v707_v32, %v552_v16  ;;  %s677_s0 = sadd.f32 %s676_s4, %s675_s17 }
 0x192   :  { %s680_s12 = smul.f32 %s3480_s3, %s3430_s1  ;;  %v720_v52 = vadd.f32 %v718_v43, %v715_v38  ;;  %v730_v53 = vmul.f32 %v721_v39, %v583_v18  ;;  %v731_v2 = vmul.f32 %v721_v39, %v592_v19  ;;  %v734_v54 = vstv %s3527_s8  ;;  %s4364_s17 = sld [smem:[#allocation26_spill]] }
 0x193   :  { %v2671_v61 = vpop.eup %2670  ;;  %s681_s2 = smul.f32 %s3436_s25, %s3511_s28  ;;  %v712_v62 = vsub.f32 0.0, %v3539_v48  ;;  %v713_v63 = vsub.f32 0.0, %v3541_v49  ;;  %v3550_v0 = vadd.f32 %v722_v44, %v719_v50  ;;  %v735_v1 = vmul.f32 %v734_v54, %v623_v23  ;;  %s3556_s30 = sadd.f32 %s678_s13, %s677_s0 }
 0x194   :  { %v477_v4 = vmul.f32 %v2671_v61, %v3286_v55  ;;  %v478_v5 = vmul.f32 %v2671_v61, %v3292_v58  ;;  %v479_v6 = vmul.f32 %v2671_v61, %v3288_v56  ;;  %v480_v7 = vmul.f32 %v2671_v61, %v3294_v59  ;;  %s683_s27 = smul.f32 %s3445_s11, %s3522_s15  ;;  %s836_s4 = sld [smem:[#allocation15]] }
 0x195   :  { %v481_v8 = vmul.f32 %v2671_v61, %v3290_v57  ;;  %v482_v9 = vmul.f32 %v2671_v61, %v3296_v60  ;;  %s682_s19 = sadd.f32 %s681_s2, %s680_s12  ;;  %s685_s22 = smul.f32 %s3494_s14, %s3430_s1  ;;  %v3564_v10 = vadd.f32 %v723_v45, %v720_v52  ;;  %v726_v55 = vsub.f32 0.0, %v3550_v0 }
 0x196   :  { %v491_v56 = vsel %vm3488_vm11, %v477_v4, 0.0  ;;  %v492_v58 = vsel %vm3488_vm11, %v478_v5, 0.0  ;;  %s686_s18 = smul.f32 %s3436_s25, %s3522_s15  ;;  %v732_v59 = vadd.f32 %v730_v53, %v728_v46  ;;  %v733_v57 = vadd.f32 %v731_v2, %v729_v51  ;;  %s2541_s13 = sld [smem:[#allocation15 + $0x80]] }
 0x197   :  { %v501_v60 = vsel %vm3505_vm12, %v479_v6, %v491_v56  ;;  %v502_v11 = vsel %vm3505_vm12, %v480_v7, %v492_v58  ;;  %s3577_s21 = sadd.f32 %s683_s27, %s682_s19  ;;  %s688_s20 = smul.f32 %s3445_s11, %s3527_s8  ;;  %v727_v12 = vsub.f32 0.0, %v3564_v10  ;;  %v736_v13 = vmul.f32 %v734_v54, %v3501_v24 }
 0x198   :  { %v3585_v14 = vsel %vm3516_vm13, %v481_v8, %v501_v60  ;;  %v3589_v15 = vsel %vm3516_vm13, %v482_v9, %v502_v11  ;;  %s687_s5 = sadd.f32 %s686_s18, %s685_s22  ;;  %s690_s7 = smul.f32 %s3556_s30, %s3430_s1  ;;  %v737_v16 = vadd.f32 %v735_v1, %v732_v59  ;;  %v742_v17 = vmul.f32 %v741_v20, %v712_v62 }
 0x199   :  { %867 = vst.msk [vmem:[%s4362_s10] sm:$0xff] %vm866_vm14, %v3585_v14  ;;  %887 = vrot.lane.b32.xlu0 %v3585_v14, %s2867_s29  ;;  %s691_s16 = smul.f32 %s3436_s25, %s3577_s21  ;;  %v738_v18 = vadd.f32 %v736_v13, %v733_v57  ;;  %v743_v19 = vmul.f32 %v741_v20, %v713_v63  ;;  %v745_v21 = vmul.f32 %v744_v27, %v726_v55  ;;  %s4363_s25 = smov 1e-20   ;;  %v2868_v32 = vmov 0  }
 0x19a   :  { %869 = vst.msk [vmem:[%s4362_s10 + $0x8] sm:$0x3] %vm868_vm15, %v3589_v15  ;;  %v746_v22 = vmul.f32 %v744_v27, %v727_v12  ;;  %s3621_s3 = sadd.f32 %s688_s20, %s687_s5  ;;  %v739_v23 = vsub.f32 0.0, %v737_v16  ;;  %2646 = vset.pattern.permute.xlu0 %v2868_v32  ;;  %2647 = vset.pattern.permute.xlu1 %v2868_v32  ;;  %v754_v26 = vstv %s4364_s17  ;;  %v762_v40 = vstv %s3556_s30  ;;  %s2545_s0 = sld [smem:[#allocation15 + $0x100]] }
 0x19b   :  { %s692_s14 = sadd.f32 %s691_s16, %s690_s7  ;;  %v740_v24 = vsub.f32 0.0, %v738_v18  ;;  %v747_v28 = vadd.f32 %v745_v21, %v742_v17  ;;  %v767_v41 = vstv %s3577_s21  ;;  %s2539_s12 = sld [smem:[#allocation15 + $0x1]] }
 0x19c   :  { %v748_v30 = vadd.f32 %v746_v22, %v743_v19  ;;  %s693_s23 = smul.f32 %s3445_s11, %s3621_s3  ;;  %v750_v31 = vmul.f32 %v749_v25, %v739_v23  ;;  %v772_v42 = vstv %s3621_s3  ;;  %s2543_s2 = sld [smem:[#allocation15 + $0x81]] }
 0x19d   :  { %889 = vrot.lane.b32.xlu0 %v3589_v15, %s2867_s29  ;;  %v751_v20 = vmul.f32 %v749_v25, %v740_v24  ;;  %s2547_s30 = sld [smem:[#allocation15 + $0x101]]  ;;  %s2538_s27 = sadd.s32 4294967295, %s836_s4 }
 0x19e   :  { %s694_s1 = sadd.f32 %s693_s23, %s692_s14  ;;  %v752_v3 = vadd.f32 %v750_v31, %v747_v28  ;;  %s2542_s19 = sadd.s32 4294967295, %s2541_s13 }
 0x19f   :  { %v753_v29 = vadd.f32 %v751_v20, %v748_v30  ;;  %s838_s18 = smul.u32 10, %s2538_s27  ;;  %s2870_s23 = smov [#allocation18]  }
 0x1a0   :  { %s695_s28 = smax.f32 %s4363_s25, %s694_s1  ;;  %v755_v25 = vsub.f32 %v752_v3, %v754_v26  ;;  %s2546_s21 = sadd.s32 4294967295, %s2545_s0 }
 0x1a1   :  { %v696_v27 = vstv %s695_s28  ;;  %v756_v34 = vsub.f32 %v753_v29, %v754_v26  ;;  %s848_s20 = smul.u32 10, %s2542_s19  ;;  %s2540_s5 = sadd.s32 4294967295, %s2539_s12 }
 0x1a2   :  { %2672 = vrcp.f32 %v696_v27  ;;  %v757_v35 = vmax.f32 %v755_v25, 0.0  ;;  %s2544_s7 = sadd.s32 4294967295, %s2543_s2  ;;  %s858_s26 = smul.u32 10, %s2546_s21 }
 0x1a3   :  { %v758_v36 = vmax.f32 %v756_v34, 0.0  ;;  %s2548_s9 = sadd.s32 4294967295, %s2547_s30  ;;  %s841_s24 = sadd.s32 %s2540_s5, %s838_s18 }
 0x1a4   :  { %s851_s6 = sadd.s32 %s2544_s7, %s848_s20  ;;  %s861_s16 = sadd.s32 %s2548_s9, %s858_s26 }
 0x1a5   :  { %s2440_s1 = sshll.u32 %s2870_s23, 4  ;;  %s2441_s1 = int_to_ptr.vmem [resolvable:$true] %s2440_s1 }
 0x1a6   :  { %p2829_p13 = scmp.lt.s32.totalorder %s2441_s1, %s2441_s1 }
 0x1ac   :  { %v2673_v33 = vpop.eup %2672 }
 0x1ad   :  { %2569 = vpush %v2673_v33 }
 0x1de   :  { %s2570_s11 = spop %2569 }
 0x1df   :  { %v759_v37 = vstv %s2570_s11 }
 0x1e0   :  { %v760_v38 = vmul.f32 %v759_v37, %v757_v35  ;;  %v761_v39 = vmul.f32 %v759_v37, %v758_v36 }
 0x1e2   :  { %v763_v43 = vmul.f32 %v762_v40, %v760_v38  ;;  %v764_v44 = vmul.f32 %v762_v40, %v761_v39  ;;  %v768_v45 = vmul.f32 %v767_v41, %v760_v38  ;;  %v769_v46 = vmul.f32 %v767_v41, %v761_v39 }
 0x1e3   :  { %v773_v50 = vmul.f32 %v772_v42, %v760_v38  ;;  %v774_v51 = vmul.f32 %v772_v42, %v761_v39 }
 0x1e4   :  { %v765_v52 = vsub.f32 %v712_v62, %v763_v43  ;;  %v766_v53 = vsub.f32 %v713_v63, %v764_v44  ;;  %v770_v2 = vsub.f32 %v726_v55, %v768_v45  ;;  %v771_v54 = vsub.f32 %v727_v12, %v769_v46 }
 0x1e5   :  { %v775_v61 = vsub.f32 %v739_v23, %v773_v50  ;;  %v776_v1 = vsub.f32 %v740_v24, %v774_v51 }
 0x1e6   :  { %v777_v4 = vmax.f32 %v765_v52, %v770_v2  ;;  %v778_v5 = vmax.f32 %v766_v53, %v771_v54 }
 0x1e8   :  { %v779_v6 = vmax.f32 %v777_v4, %v775_v61  ;;  %v780_v7 = vmax.f32 %v778_v5, %v776_v1  ;;  %v842_v5 = vstv %s841_s24 }
 0x1e9   :  { %vm843_vm2 = vcmp.eq.s32.totalorder %v3421_v47, %v842_v5 }
 0x1ea   :  { %v781_v8 = vsub.f32 %v765_v52, %v779_v6  ;;  %v782_v9 = vsub.f32 %v766_v53, %v780_v7  ;;  %v787_v10 = vsub.f32 %v770_v2, %v779_v6  ;;  %v788_v56 = vsub.f32 %v771_v54, %v780_v7 }
 0x1eb   :  { %v795_v58 = vsub.f32 %v775_v61, %v779_v6  ;;  %v796_v48 = vsub.f32 %v776_v1, %v780_v7 }
 0x1ec   :  { %v783_v62 = vmul.f32 1.442695, %v781_v8  ;;  %v785_v59 = vmul.f32 1.442695, %v782_v9  ;;  %v789_v49 = vmul.f32 1.442695, %v787_v10 }
 0x1ed   :  { %v791_v63 = vmul.f32 1.442695, %v788_v56  ;;  %v797_v0 = vmul.f32 1.442695, %v795_v58  ;;  %v799_v55 = vmul.f32 1.442695, %v796_v48 }
 0x1ee   :  { %2674 = vpow2.f32 %v783_v62 }
 0x1ef   :  { %2676 = vpow2.f32 %v785_v59 }
 0x1f0   :  { %2678 = vpow2.f32 %v789_v49 }
 0x1f1   :  { %2680 = vpow2.f32 %v791_v63 }
 0x1f2   :  { %2682 = vpow2.f32 %v797_v0 }
 0x1f3   :  { %2684 = vpow2.f32 %v799_v55 }
 0x1f8   :  { %v2675_v57 = vpop.eup %2674 }
 0x1f9   :  { %v2677_v60 = vpop.eup %2676 }
 0x1fa   :  { %v2679_v11 = vpop.eup %2678 }
 0x1fb   :  { %v2681_v12 = vpop.eup %2680  ;;  %v793_v13 = vadd.f32 %v2679_v11, %v2675_v57 }
 0x1fc   :  { %v2683_v16 = vpop.eup %2682  ;;  %v794_v17 = vadd.f32 %v2681_v12, %v2677_v60 }
 0x1fd   :  { %v2685_v18 = vpop.eup %2684  ;;  %v801_v19 = vadd.f32 %v2683_v16, %v793_v13 }
 0x1fe   :  { %v802_v21 = vadd.f32 %v2685_v18, %v794_v17 }
 0x1ff   :  { %2686 = vlog2.f32 %v801_v19 }
 0x200   :  { %2688 = vlog2.f32 %v802_v21 }
 0x209   :  { %v2687_v22 = vpop.eup %2686 }
 0x20a   :  { %v2689_v23 = vpop.eup %2688  ;;  %v804_v24 = vmul.f32 0.6931472, %v2687_v22 }
 0x20b   :  { %v806_v28 = vmul.f32 0.6931472, %v2689_v23  ;;  %v888_v30 = vpop.permute.xlu0 %887 }
 0x20c   :  { %v807_v31 = vadd.f32 %v804_v24, %v779_v6  ;;  %v893_v20 = vsub.f32 %v3585_v14, %v888_v30  ;;  %v905_v3 = vadd.f32 %v888_v30, %v3585_v14  ;;  %v852_v6 = vstv %s851_s6 }
 0x20d   :  { %v808_v29 = vadd.f32 %v806_v28, %v780_v7  ;;  %v862_v7 = vstv %s861_s16  ;;  %vm853_vm3 = vcmp.eq.s32.totalorder %v3421_v47, %v852_v6 }
 0x20e   :  { %v809_v27 = vsub.f32 %v807_v31, %v765_v52  ;;  %v811_v32 = vsub.f32 %v807_v31, %v770_v2  ;;  %v813_v33 = vsub.f32 %v807_v31, %v775_v61  ;;  %v907_v39 = vmul.f32 %v905_v3, %v893_v20 }
 0x20f   :  { %v810_v26 = vsub.f32 %v808_v29, %v766_v53  ;;  %v812_v25 = vsub.f32 %v808_v29, %v771_v54  ;;  %v890_v34 = vpop.permute.xlu0 %889  ;;  %v814_v35 = vsub.f32 %v808_v29, %v776_v1  ;;  %vm863_vm4 = vcmp.eq.s32.totalorder %v3421_v47, %v862_v7 }
 0x210   :  { %v3647_v36 = vsub.f32 %v3589_v15, %v890_v34  ;;  %v906_v37 = vadd.f32 %v890_v34, %v3589_v15  ;;  %v815_v38 = vmax.f32 %v809_v27, %v811_v32  ;;  %v910_v44 = vsel %vm909_vm0, %v907_v39, 0.0 }
 0x211   :  { %v816_v40 = vmax.f32 %v810_v26, %v812_v25 }
 0x212   :  { %v817_v41 = vmax.f32 %v815_v38, %v813_v33  ;;  %v908_v42 = vmul.f32 %v906_v37, %v3647_v36 }
 0x213   :  { %v818_v43 = vmax.f32 %v816_v40, %v814_v35 }
 0x214   :  { %v912_v45 = vsel %vm911_vm1, %v908_v42, 0.0 }
 0x215   :  { %v819_v46 = vsel %vm465_vm10, %v818_v43, -inf  ;;  %v913_v50 = vadd.f32 %v912_v45, %v910_v44 }
 0x216   :  { %v820_v51 = vmax.f32 %v817_v41, %v819_v46 }
 0x217   :  { %914 = vadd.xlane.f32.xlu0 %v913_v50 }
 0x218   :  { %v821_v52 = vrot.slane %v820_v51, 4 }
 0x21a   :  { %v822_v53 = vmax.f32 %v820_v51, %v821_v52 }
 0x21c   :  { %v823_v2 = vrot.slane %v822_v53, 2 }
 0x21e   :  { %v824_v54 = vmax.f32 %v822_v53, %v823_v2 }
 0x220   :  { %v825_v61 = vrot.slane %v824_v54, 1 }
 0x222   :  { %v826_v1 = vmax.f32 %v824_v54, %v825_v61 }
 0x224   :  { %2571 = vpush %v826_v1 }
 0x22d   :  { %945 = vperm.xlu0 %2646, %v893_v20  }
 0x255   :  { %s2572_s22 = spop %2571 }
 0x256   :  { %v828_v4 = vstv %s2572_s22 }
 0x257   :  { %2690 = vrcp.f32 %v828_v4 }
 0x261   :  { %v2691_v8 = vpop.eup %2690 }
 0x262   :  { %v830_v9 = vmul.f32 %v2691_v8, %v809_v27  ;;  %v831_v10 = vmul.f32 %v2691_v8, %v810_v26  ;;  %v832_v56 = vmul.f32 %v2691_v8, %v811_v32  ;;  %v833_v58 = vmul.f32 %v2691_v8, %v812_v25 }
 0x263   :  { %v834_v48 = vmul.f32 %v2691_v8, %v813_v33  ;;  %v835_v62 = vmul.f32 %v2691_v8, %v814_v35 }
 0x264   :  { %v844_v59 = vsel %vm843_vm2, %v830_v9, 0.0  ;;  %v845_v49 = vsel %vm843_vm2, %v831_v10, 0.0 }
 0x265   :  { %v854_v63 = vsel %vm853_vm3, %v832_v56, %v844_v59  ;;  %v855_v0 = vsel %vm853_vm3, %v833_v58, %v845_v49  ;;  %v2869_v59 = vmov 0.0  }
 0x266   :  { %v3657_v55 = vsel %vm863_vm4, %v834_v48, %v854_v63  ;;  %v3659_v57 = vsel %vm863_vm4, %v835_v62, %v855_v0 }
 0x267   :  { %2549 = vst.msk [vmem:[%s4362_s10 + $0x10] sm:$0xff] %vm866_vm14, %v3657_v55  ;;  %897 = vrot.lane.b32.xlu1 %v3657_v55, %s2867_s29 }
 0x268   :  { %2550 = vst.msk [vmem:[%s4362_s10 + $0x18] sm:$0x3] %vm868_vm15, %v3659_v57 }
 0x26b   :  { %899 = vrot.lane.b32.xlu1 %v3659_v57, %s2867_s29 }
 0x2a4   :  { %v915_v47 = vpop.xlane.xlu0 %914 }
 0x2a5   :  { %v916_v60 = vrot.slane %v915_v47, 4 }
 0x2a7   :  { %v917_v11 = vadd.f32 %v916_v60, %v915_v47 }
 0x2a9   :  { %v918_v12 = vrot.slane %v917_v11, 2 }
 0x2ab   :  { %v919_v13 = vadd.f32 %v918_v12, %v917_v11 }
 0x2ac   :  { %v946_v40 = vpop.permute.xlu0 %945 }
 0x2ad   :  { %v920_v16 = vrot.slane %v919_v13, 1  ;;  %v953_v42 = vmul.f32 %v946_v40, %v3585_v14 }
 0x2af   :  { %v921_v17 = vadd.f32 %v920_v16, %v919_v13  ;;  %v955_v50 = vsel %vm866_vm14, %v953_v42, 0.0  ;;  %v873_v13 = vsel %vm866_vm14, %v3585_v14, 0.0 }
 0x2b1   :  { %2573 = vpush %v921_v17 }
 0x2d9   :  { %v898_v18 = vpop.permute.xlu1 %897 }
 0x2da   :  { %v903_v19 = vsub.f32 %v3657_v55, %v898_v18  ;;  %v924_v21 = vadd.f32 %v898_v18, %v3657_v55  ;;  %v879_v18 = vsel %vm866_vm14, %v3657_v55, 0.0 }
 0x2dc   :  { %v926_v28 = vmul.f32 %v924_v21, %v903_v19  ;;  %v876_v21 = vsel %vm868_vm15, %v3589_v15, 0.0 }
 0x2dd   :  { %v900_v22 = vpop.permute.xlu1 %899 }
 0x2de   :  { %v904_v23 = vsub.f32 %v3659_v57, %v900_v22  ;;  %v925_v24 = vadd.f32 %v900_v22, %v3659_v57  ;;  %v928_v31 = vsel %vm909_vm0, %v926_v28, 0.0  ;;  %v882_v22 = vsel %vm868_vm15, %v3659_v57, 0.0 }
 0x2e0   :  { %v927_v30 = vmul.f32 %v925_v24, %v904_v23 }
 0x2e2   :  { %v929_v20 = vsel %vm911_vm1, %v927_v30, 0.0  ;;  %s2574_s10 = spop %2573 }
 0x2e3   :  { %v930_v3 = vadd.f32 %v929_v20, %v928_v31  ;;  %v923_v9 = vstv %s2574_s10  ;;  %s2824_s10 = scalar_lea.vmem %s2441_s1, 16 }
 0x2e4   :  { %p2825_p12 = scmp.ne.s32.totalorder %s2441_s1, %s2824_s10 }
 0x2e5   :  { %931 = vadd.xlane.f32.xlu1 %v930_v3 }
 0x2f6   :  { %950 = vperm.xlu1 %2647, %v3647_v36  }
 0x2fa   :  { %966 = vperm.xlu1 %2647, %v903_v19  }
 0x2fe   :  { %971 = vperm.xlu1 %2647, %v904_v23  }
 0x372   :  { %v932_v29 = vpop.xlane.xlu1 %931 }
 0x373   :  { %v933_v27 = vrot.slane %v932_v29, 4 }
 0x375   :  { %v934_v32 = vadd.f32 %v933_v27, %v932_v29 }
 0x376   :  { %v951_v35 = vpop.permute.xlu1 %950 }
 0x377   :  { %v935_v33 = vrot.slane %v934_v32, 2  ;;  %v954_v41 = vmul.f32 %v951_v35, %v3589_v15 }
 0x379   :  { %v936_v26 = vadd.f32 %v935_v33, %v934_v32  ;;  %v956_v44 = vsel %vm868_vm15, %v954_v41, 0.0 }
 0x37a   :  { %v967_v37 = vpop.permute.xlu1 %966  ;;  %v957_v51 = vadd.f32 %v956_v44, %v955_v50 }
 0x37b   :  { %v937_v25 = vrot.slane %v936_v26, 1  ;;  %v974_v36 = vmul.f32 %v967_v37, %v3657_v55 }
 0x37c   :  { %v958_v53 = vrot.slane %v957_v51, 4 }
 0x37d   :  { %v938_v34 = vadd.f32 %v937_v25, %v936_v26  ;;  %v976_v45 = vsel %vm866_vm14, %v974_v36, 0.0 }
 0x37e   :  { %v972_v38 = vpop.permute.xlu1 %971  ;;  %v959_v54 = vadd.f32 %v958_v53, %v957_v51 }
 0x37f   :  { %2575 = vpush %v938_v34  ;;  %v975_v39 = vmul.f32 %v972_v38, %v3659_v57 }
 0x380   :  { %v960_v1 = vrot.slane %v959_v54, 2 }
 0x381   :  { %v977_v43 = vsel %vm868_vm15, %v975_v39, 0.0 }
 0x382   :  { %v978_v46 = vadd.f32 %v977_v43, %v976_v45  ;;  %v961_v5 = vadd.f32 %v960_v1, %v959_v54 }
 0x384   :  { %v979_v52 = vrot.slane %v978_v46, 4  ;;  %v962_v7 = vrot.slane %v961_v5, 1 }
 0x386   :  { %v980_v2 = vadd.f32 %v979_v52, %v978_v46  ;;  %v963_v58 = vadd.f32 %v962_v7, %v961_v5 }
 0x388   :  { %v981_v61 = vrot.slane %v980_v2, 2 }
 0x38a   :  { %v982_v4 = vadd.f32 %v981_v61, %v980_v2 }
 0x38c   :  { %v983_v6 = vrot.slane %v982_v4, 1 }
 0x38e   :  { %v984_v8 = vadd.f32 %v983_v6, %v982_v4 }
 0x390   :  { %v985_v62 = vadd.f32 %v984_v8, %v963_v58 }
 0x3b0   :  { %s2576_s25 = spop %2575 }
 0x3b1   :  { %v940_v10 = vstv %s2576_s25  ;;  %s2828_s25 = scalar_lea.vmem %s2441_s1, 32 }
 0x3b2   :  { %v941_v56 = vadd.f32 %v940_v10, %v923_v9  ;;  %p2830_p0 = scmp.lt.s32.totalorder %s2828_s25, %s2824_s10 }
 0x3b4   :  { %v942_v48 = vmul.f32 0.5, %v941_v56  ;;  %p2831_p1 = por %p2830_p0, %p2829_p13 }
 0x3b6   :  { %vm986_vm6 = vcmp.lt.f32.partialorder %v985_v62, %v942_v48  ;;  %p2832_p2 = pnand %p2831_p1, %p2825_p12 }
 0x3b7   :  { %v2551_v49 = vsel %vm986_vm6, 1.0, %v2869_v59 }
 0x3b8   :  { %v990_v63 = vsel %vm989_vm5, %v2551_v49, 0.0  ;;  %v1002_v0 = vmul.f32 %v2551_v49, %v3585_v14  ;;  %v1003_v47 = vmul.f32 %v2551_v49, %v3589_v15  ;;  %v1010_v12 = vmul.f32 %v2551_v49, %v3657_v55 }
 0x3b9   :  { %991 = vadd.xlane.f32.xlu1 %v990_v63  ;;  %v1011_v17 = vmul.f32 %v2551_v49, %v3659_v57 }
 0x3ba   :  { %v1004_v60 = vsel %vm866_vm14, %v1002_v0, 0.0  ;;  %v1007_v11 = vsel %vm868_vm15, %v1003_v47, 0.0  ;;  %v1012_v16 = vsel %vm866_vm14, %v1010_v12, 0.0 }
 0x3bb   :  { %1005 = vadd.xlane.f32.xlu0 %v1004_v60  ;;  %v1015_v19 = vsel %vm868_vm15, %v1011_v17, 0.0 }
 0x3bd   :  { %1008 = vadd.xlane.f32.xlu1 %v1007_v11 }
 0x3bf   :  { %874 = vadd.xlane.f32.xlu0 %v873_v13 }
 0x3c1   :  { %1013 = vadd.xlane.f32.xlu1 %v1012_v16 }
 0x3c3   :  { %880 = vadd.xlane.f32.xlu0 %v879_v18 }
 0x3c5   :  { %1016 = vadd.xlane.f32.xlu1 %v1015_v19 }
 0x3c9   :  { %877 = vadd.xlane.f32.xlu1 %v876_v21 }
 0x3cd   :  { %883 = vadd.xlane.f32.xlu1 %v882_v22 }
 0x446   :  { %v992_v23 = vpop.xlane.xlu1 %991 }
 0x447   :  { %v993_v24 = vrot.slane %v992_v23, 4 }
 0x448   :  { %v1006_v25 = vpop.xlane.xlu0 %1005 }
 0x449   :  { %v994_v28 = vadd.f32 %v993_v24, %v992_v23 }
 0x44a   :  { %v1009_v32 = vpop.xlane.xlu1 %1008 }
 0x44b   :  { %v995_v30 = vrot.slane %v994_v28, 2 }
 0x44c   :  { %v3728_v45 = vpop.xlane.xlu0 %874 }
 0x44d   :  { %v996_v31 = vadd.f32 %v995_v30, %v994_v28  ;;  %v1018_v52 = vsub.f32 %v3728_v45, %v1006_v25 }
 0x44e   :  { %v1014_v33 = vpop.xlane.xlu1 %1013 }
 0x44f   :  { %v997_v20 = vrot.slane %v996_v31, 1 }
 0x450   :  { %v3734_v53 = vpop.xlane.xlu0 %880 }
 0x451   :  { %v998_v3 = vadd.f32 %v997_v20, %v996_v31  ;;  %v1020_v1 = vsub.f32 %v3734_v53, %v1014_v33 }
 0x452   :  { %v1017_v37 = vpop.xlane.xlu1 %1016 }
 0x453   :  { %2577 = vpush %v998_v3 }
 0x456   :  { %v3730_v46 = vpop.xlane.xlu1 %877 }
 0x457   :  { %v1019_v51 = vsub.f32 %v3730_v46, %v1009_v32 }
 0x45a   :  { %v3736_v2 = vpop.xlane.xlu1 %883 }
 0x45b   :  { %v1021_v4 = vsub.f32 %v3736_v2, %v1017_v37 }
 0x484   :  { %s2578_s28 = spop %2577 }
 0x485   :  { %v1000_v29 = vstv %s2578_s28 }
 0x486   :  { %v1022_v27 = vmax.f32 %v1000_v29, 1.0  ;;  %vm1027_vm7 = vcmp.gt.f32.partialorder %v1000_v29, 0.0  ;;  %v1001_v43 = vsub.f32 100.0, %v1000_v29 }
 0x488   :  { %2692 = vrcp.f32 %v1022_v27  ;;  %v1024_v44 = vmax.f32 %v1001_v43, 1.0  ;;  %vm1026_vm8 = vcmp.gt.f32.partialorder %v1001_v43, 0.0 }
 0x48a   :  { %2694 = vrcp.f32 %v1024_v44 }
 0x492   :  { %v2693_v26 = vpop.eup %2692 }
 0x493   :  { %v1039_v34 = vmul.f32 %v2693_v26, %v1009_v32  ;;  %v1038_v35 = vmul.f32 %v2693_v26, %v1006_v25  ;;  %v1044_v40 = vmul.f32 %v2693_v26, %v1014_v33  ;;  %v1045_v41 = vmul.f32 %v2693_v26, %v1017_v37 }
 0x494   :  { %v2695_v50 = vpop.eup %2694 }
 0x495   :  { %v3709_v38 = vsel %vm1027_vm7, %v1039_v34, %v3589_v15  ;;  %v3712_v39 = vsel %vm1027_vm7, %v1038_v35, %v3585_v14  ;;  %v3719_v36 = vsel %vm1027_vm7, %v1044_v40, %v3657_v55  ;;  %v3722_v42 = vsel %vm1027_vm7, %v1045_v41, %v3659_v57 }
 0x496   :  { %1052 = vrot.lane.b32.xlu1 %v3709_v38, %s2867_s29  ;;  %1050 = vrot.lane.b32.xlu0 %v3712_v39, %s2867_s29  ;;  %v1029_v54 = vmul.f32 %v2695_v50, %v1019_v51  ;;  %v1028_v61 = vmul.f32 %v2695_v50, %v1018_v52  ;;  %v1034_v9 = vmul.f32 %v2695_v50, %v1020_v1 }
 0x497   :  { %v1035_v10 = vmul.f32 %v2695_v50, %v1021_v4 }
 0x498   :  { %v3741_v5 = vsel %vm1026_vm8, %v1029_v54, %v3589_v15  ;;  %v3744_v7 = vsel %vm1026_vm8, %v1028_v61, %v3585_v14  ;;  %v3751_v47 = vsel %vm1026_vm8, %v1034_v9, %v3657_v55 }
 0x499   :  { %v3754_v60 = vsel %vm1026_vm8, %v1035_v10, %v3659_v57 }
 0x49a   :  { %1060 = vrot.lane.b32.xlu1 %v3719_v36, %s2867_s29  ;;  %1062 = vrot.lane.b32.xlu0 %v3722_v42, %s2867_s29 }
 0x508   :  { %v1053_v6 = vpop.permute.xlu1 %1052  ;;  %v1051_v8 = vpop.permute.xlu0 %1050 }
 0x509   :  { %v1057_v56 = vsub.f32 %v3741_v5, %v1053_v6  ;;  %v1069_v58 = vadd.f32 %v1053_v6, %v3741_v5  ;;  %v1056_v48 = vsub.f32 %v3744_v7, %v1051_v8  ;;  %v1068_v62 = vadd.f32 %v1051_v8, %v3744_v7 }
 0x50b   :  { %v1070_v49 = vmul.f32 %v1068_v62, %v1056_v48  ;;  %v1071_v63 = vmul.f32 %v1069_v58, %v1057_v56 }
 0x50c   :  { %v1061_v0 = vpop.permute.xlu1 %1060  ;;  %v1063_v11 = vpop.permute.xlu0 %1062 }
 0x50d   :  { %v1066_v12 = vsub.f32 %v3751_v47, %v1061_v0  ;;  %v1085_v13 = vadd.f32 %v1061_v0, %v3751_v47  ;;  %v1067_v16 = vsub.f32 %v3754_v60, %v1063_v11  ;;  %v1086_v17 = vadd.f32 %v1063_v11, %v3754_v60 }
 0x50e   :  { %v1072_v18 = vsel %vm909_vm0, %v1070_v49, 0.0  ;;  %v1073_v19 = vsel %vm911_vm1, %v1071_v63, 0.0 }
 0x50f   :  { %v1074_v21 = vadd.f32 %v1073_v19, %v1072_v18  ;;  %v1087_v22 = vmul.f32 %v1085_v13, %v1066_v12  ;;  %v1088_v23 = vmul.f32 %v1086_v17, %v1067_v16 }
 0x511   :  { %1075 = vadd.xlane.f32.xlu1 %v1074_v21  ;;  %v1089_v24 = vsel %vm909_vm0, %v1087_v22, 0.0  ;;  %v1090_v28 = vsel %vm911_vm1, %v1088_v23, 0.0 }
 0x512   :  { %v1091_v30 = vadd.f32 %v1090_v28, %v1089_v24 }
 0x514   :  { %1092 = vadd.xlane.f32.xlu0 %v1091_v30 }
 0x522   :  { %1111 = vperm.xlu1 %2647, %v1057_v56  }
 0x526   :  { %1127 = vperm.xlu1 %2647, %v1066_v12  }
 0x52a   :  { %1106 = vperm.xlu0 %2646, %v1056_v48  }
 0x52e   :  { %1132 = vperm.xlu0 %2646, %v1067_v16  }
 0x59e   :  { %v1076_v31 = vpop.xlane.xlu1 %1075 }
 0x59f   :  { %v1077_v20 = vrot.slane %v1076_v31, 4 }
 0x5a1   :  { %v1078_v3 = vadd.f32 %v1077_v20, %v1076_v31  ;;  %v1093_v29 = vpop.xlane.xlu0 %1092 }
 0x5a2   :  { %v1094_v27 = vrot.slane %v1093_v29, 4  ;;  %v1112_v44 = vpop.permute.xlu1 %1111 }
 0x5a3   :  { %v1079_v32 = vrot.slane %v1078_v3, 2  ;;  %v1115_v1 = vmul.f32 %v1112_v44, %v3589_v15 }
 0x5a4   :  { %v1095_v33 = vadd.f32 %v1094_v27, %v1093_v29 }
 0x5a5   :  { %v1080_v26 = vadd.f32 %v1079_v32, %v1078_v3  ;;  %v1117_v10 = vsel %vm868_vm15, %v1115_v1, 0.0 }
 0x5a6   :  { %v1096_v25 = vrot.slane %v1095_v33, 2  ;;  %v1128_v51 = vpop.permute.xlu1 %1127 }
 0x5a7   :  { %v1081_v34 = vrot.slane %v1080_v26, 1  ;;  %v1135_v54 = vmul.f32 %v1128_v51, %v3657_v55 }
 0x5a8   :  { %v1097_v35 = vadd.f32 %v1096_v25, %v1095_v33 }
 0x5a9   :  { %v1082_v37 = vadd.f32 %v1081_v34, %v1080_v26  ;;  %v1107_v43 = vpop.permute.xlu0 %1106  ;;  %v1137_v6 = vsel %vm866_vm14, %v1135_v54, 0.0 }
 0x5aa   :  { %v1098_v40 = vrot.slane %v1097_v35, 1  ;;  %v1114_v61 = vmul.f32 %v1107_v43, %v3585_v14 }
 0x5ab   :  { %2579 = vpush %v1082_v37 }
 0x5ac   :  { %v1099_v41 = vadd.f32 %v1098_v40, %v1097_v35  ;;  %v1116_v8 = vsel %vm866_vm14, %v1114_v61, 0.0 }
 0x5ad   :  { %v1133_v50 = vpop.permute.xlu0 %1132  ;;  %v1118_v56 = vadd.f32 %v1117_v10, %v1116_v8 }
 0x5ae   :  { %2581 = vpush %v1099_v41  ;;  %v1136_v52 = vmul.f32 %v1133_v50, %v3659_v57 }
 0x5af   :  { %v1119_v48 = vrot.slane %v1118_v56, 4 }
 0x5b0   :  { %v1138_v4 = vsel %vm868_vm15, %v1136_v52, 0.0 }
 0x5b1   :  { %v1139_v9 = vadd.f32 %v1138_v4, %v1137_v6  ;;  %v1120_v49 = vadd.f32 %v1119_v48, %v1118_v56 }
 0x5b3   :  { %v1140_v58 = vrot.slane %v1139_v9, 4  ;;  %v1121_v0 = vrot.slane %v1120_v49, 2 }
 0x5b5   :  { %v1141_v62 = vadd.f32 %v1140_v58, %v1139_v9  ;;  %v1122_v12 = vadd.f32 %v1121_v0, %v1120_v49 }
 0x5b7   :  { %v1142_v63 = vrot.slane %v1141_v62, 2  ;;  %v1123_v16 = vrot.slane %v1122_v12, 1 }
 0x5b9   :  { %v1143_v11 = vadd.f32 %v1142_v63, %v1141_v62  ;;  %v1124_v22 = vadd.f32 %v1123_v16, %v1122_v12 }
 0x5bb   :  { %v1144_v13 = vrot.slane %v1143_v11, 1 }
 0x5bd   :  { %v1145_v17 = vadd.f32 %v1144_v13, %v1143_v11 }
 0x5bf   :  { %v1146_v24 = vadd.f32 %v1145_v17, %v1124_v22 }
 0x5dc   :  { %s2580_s15 = spop %2579 }
 0x5dd   :  { %v1084_v18 = vstv %s2580_s15 }
 0x5df   :  { %s2582_s8 = spop %2581 }
 0x5e0   :  { %v1101_v19 = vstv %s2582_s8 }
 0x5e1   :  { %v1102_v21 = vadd.f32 %v1101_v19, %v1084_v18 }
 0x5e3   :  { %v1103_v23 = vmul.f32 0.5, %v1102_v21 }
 0x5e5   :  { %vm1147_vm9 = vcmp.lt.f32.partialorder %v1146_v24, %v1103_v23 }
 0x5e6   :  { %v2552_v28 = vsel %vm1147_vm9, 1.0, %v2869_v59 }
 0x5e7   :  { %v1150_v30 = vsel %vm989_vm5, %v2552_v28, 0.0  ;;  %v1162_v31 = vmul.f32 %v2552_v28, %v3585_v14  ;;  %v1170_v20 = vmul.f32 %v2552_v28, %v3657_v55  ;;  %v1163_v29 = vmul.f32 %v2552_v28, %v3589_v15 }
 0x5e8   :  { %1151 = vadd.xlane.f32.xlu1 %v1150_v30  ;;  %v1171_v33 = vmul.f32 %v2552_v28, %v3659_v57 }
 0x5e9   :  { %v1164_v3 = vsel %vm866_vm14, %v1162_v31, 0.0  ;;  %v1172_v27 = vsel %vm866_vm14, %v1170_v20, 0.0  ;;  %v1167_v32 = vsel %vm868_vm15, %v1163_v29, 0.0 }
 0x5ea   :  { %1165 = vadd.xlane.f32.xlu0 %v1164_v3  ;;  %v1175_v26 = vsel %vm868_vm15, %v1171_v33, 0.0 }
 0x5ec   :  { %1173 = vadd.xlane.f32.xlu1 %v1172_v27 }
 0x5ee   :  { %1168 = vadd.xlane.f32.xlu0 %v1167_v32 }
 0x5f2   :  { %1176 = vadd.xlane.f32.xlu0 %v1175_v26 }
 0x675   :  { %v1152_v25 = vpop.xlane.xlu1 %1151 }
 0x676   :  { %v1153_v34 = vrot.slane %v1152_v25, 4 }
 0x677   :  { %v1166_v51 = vpop.xlane.xlu0 %1165 }
 0x678   :  { %v1154_v35 = vadd.f32 %v1153_v34, %v1152_v25  ;;  %v1178_v49 = vsub.f32 %v3728_v45, %v1166_v51 }
 0x679   :  { %v1174_v4 = vpop.xlane.xlu1 %1173 }
 0x67a   :  { %v1155_v37 = vrot.slane %v1154_v35, 2  ;;  %v1180_v11 = vsub.f32 %v3734_v53, %v1174_v4 }
 0x67b   :  { %v1169_v54 = vpop.xlane.xlu0 %1168 }
 0x67c   :  { %v1156_v40 = vadd.f32 %v1155_v37, %v1154_v35  ;;  %v1179_v63 = vsub.f32 %v3730_v46, %v1169_v54 }
 0x67e   :  { %v1157_v41 = vrot.slane %v1156_v40, 1 }
 0x67f   :  { %v1177_v10 = vpop.xlane.xlu0 %1176 }
 0x680   :  { %v1158_v43 = vadd.f32 %v1157_v41, %v1156_v40  ;;  %v1181_v24 = vsub.f32 %v3736_v2, %v1177_v10 }
 0x682   :  { %2583 = vpush %v1158_v43 }
 0x6b3   :  { %s2584_s17 = spop %2583 }
 0x6b4   :  { %v1160_v44 = vstv %s2584_s17 }
 0x6b5   :  { %v1182_v50 = vmax.f32 %v1160_v44, 1.0  ;;  %vm1187_vm10 = vcmp.gt.f32.partialorder %v1160_v44, 0.0 }
 0x6b7   :  { %2696 = vrcp.f32 %v1182_v50 }
 0x6c1   :  { %v2697_v52 = vpop.eup %2696 }
 0x6c2   :  { %v1199_v61 = vmul.f32 %v2697_v52, %v1169_v54  ;;  %v1198_v1 = vmul.f32 %v2697_v52, %v1166_v51  ;;  %v1204_v9 = vmul.f32 %v2697_v52, %v1174_v4  ;;  %v1205_v58 = vmul.f32 %v2697_v52, %v1177_v10 }
 0x6c4   :  { %v3783_v6 = vsel %vm1187_vm10, %v1199_v61, %v3709_v38  ;;  %v3786_v8 = vsel %vm1187_vm10, %v1198_v1, %v3712_v39  ;;  %v3793_v56 = vsel %vm1187_vm10, %v1204_v9, %v3719_v36  ;;  %v3798_v38 = vsel %vm1187_vm10, %v1205_v58, %v3722_v42 }
 0x6c5   :  { %1212 = vrot.lane.b32.xlu0 %v3783_v6, %s2867_s29  ;;  %1210 = vrot.lane.b32.xlu1 %v3786_v8, %s2867_s29  ;;  %v1161_v39 = vsub.f32 100.0, %v1160_v44 }
 0x6c7   :  { %v1184_v48 = vmax.f32 %v1161_v39, 1.0  ;;  %vm3805_vm11 = vcmp.gt.f32.partialorder %v1161_v39, 0.0 }
 0x6c9   :  { %1220 = vrot.lane.b32.xlu1 %v3793_v56, %s2867_s29  ;;  %2698 = vrcp.f32 %v1184_v48 }
 0x6cd   :  { %1222 = vrot.lane.b32.xlu1 %v3798_v38, %s2867_s29 }
 0x6d3   :  { %v2699_v62 = vpop.eup %2698 }
 0x6d4   :  { %v1189_v36 = vmul.f32 %v2699_v62, %v1179_v63  ;;  %v1188_v0 = vmul.f32 %v2699_v62, %v1178_v49  ;;  %v1194_v18 = vmul.f32 %v2699_v62, %v1180_v11  ;;  %v1195_v31 = vmul.f32 %v2699_v62, %v1181_v24 }
 0x6d6   :  { %v3812_v13 = vsel %vm3805_vm11, %v1189_v36, %v3741_v5  ;;  %v3817_v16 = vsel %vm3805_vm11, %v1188_v0, %v3744_v7  ;;  %v3827_v30 = vsel %vm3805_vm11, %v1194_v18, %v3751_v47  ;;  %v3836_v33 = vsel %vm3805_vm11, %v1195_v31, %v3754_v60 }
 0x737   :  { %v1213_v42 = vpop.permute.xlu0 %1212  ;;  %v1211_v17 = vpop.permute.xlu1 %1210 }
 0x738   :  { %v1217_v19 = vsub.f32 %v3812_v13, %v1213_v42  ;;  %v1229_v21 = vadd.f32 %v1213_v42, %v3812_v13  ;;  %v1216_v22 = vsub.f32 %v3817_v16, %v1211_v17  ;;  %v1228_v23 = vadd.f32 %v1211_v17, %v3817_v16 }
 0x73a   :  { %v1230_v28 = vmul.f32 %v1228_v23, %v1216_v22  ;;  %v1231_v5 = vmul.f32 %v1229_v21, %v1217_v19 }
 0x73b   :  { %v1221_v7 = vpop.permute.xlu1 %1220 }
 0x73c   :  { %v1226_v20 = vsub.f32 %v3827_v30, %v1221_v7  ;;  %v1245_v3 = vadd.f32 %v1221_v7, %v3827_v30  ;;  %v1232_v29 = vsel %vm909_vm0, %v1230_v28, 0.0  ;;  %v1233_v27 = vsel %vm911_vm1, %v1231_v5, 0.0 }
 0x73d   :  { %v1234_v32 = vadd.f32 %v1233_v27, %v1232_v29 }
 0x73e   :  { %v1247_v34 = vmul.f32 %v1245_v3, %v1226_v20 }
 0x73f   :  { %1235 = vadd.xlane.f32.xlu0 %v1234_v32  ;;  %v1223_v26 = vpop.permute.xlu1 %1222 }
 0x740   :  { %v1227_v47 = vsub.f32 %v3836_v33, %v1223_v26  ;;  %v1246_v25 = vadd.f32 %v1223_v26, %v3836_v33  ;;  %v1249_v37 = vsel %vm909_vm0, %v1247_v34, 0.0 }
 0x742   :  { %v1248_v35 = vmul.f32 %v1246_v25, %v1227_v47 }
 0x744   :  { %v1250_v40 = vsel %vm911_vm1, %v1248_v35, 0.0 }
 0x745   :  { %v1251_v41 = vadd.f32 %v1250_v40, %v1249_v37 }
 0x747   :  { %1252 = vadd.xlane.f32.xlu1 %v1251_v41 }
 0x755   :  { %1266 = vperm.xlu0 %2646, %v1216_v22  }
 0x758   :  { %1271 = vperm.xlu1 %2647, %v1217_v19  }
 0x759   :  { %1287 = vperm.xlu0 %2646, %v1226_v20  }
 0x75c   :  { %1292 = vperm.xlu1 %2647, %v1227_v47  }
 0x7cc   :  { %v1236_v43 = vpop.xlane.xlu0 %1235 }
 0x7cd   :  { %v1237_v60 = vrot.slane %v1236_v43, 4 }
 0x7cf   :  { %v1238_v44 = vadd.f32 %v1237_v60, %v1236_v43 }
 0x7d1   :  { %v1239_v50 = vrot.slane %v1238_v44, 2 }
 0x7d3   :  { %v1240_v51 = vadd.f32 %v1239_v50, %v1238_v44 }
 0x7d4   :  { %v1253_v52 = vpop.xlane.xlu1 %1252  ;;  %v1267_v62 = vpop.permute.xlu0 %1266 }
 0x7d5   :  { %v1254_v54 = vrot.slane %v1253_v52, 4  ;;  %v1241_v61 = vrot.slane %v1240_v51, 1  ;;  %v1274_v12 = vmul.f32 %v1267_v62, %v3585_v14 }
 0x7d7   :  { %v1255_v1 = vadd.f32 %v1254_v54, %v1253_v52  ;;  %v1242_v4 = vadd.f32 %v1241_v61, %v1240_v51  ;;  %v1276_v21 = vsel %vm866_vm14, %v1274_v12, 0.0 }
 0x7d8   :  { %v1272_v48 = vpop.permute.xlu1 %1271  ;;  %v1288_v63 = vpop.permute.xlu0 %1287 }
 0x7d9   :  { %2585 = vpush %v1242_v4  ;;  %v1256_v9 = vrot.slane %v1255_v1, 2  ;;  %v1295_v0 = vmul.f32 %v1288_v63, %v3657_v55  ;;  %v1275_v11 = vmul.f32 %v1272_v48, %v3589_v15 }
 0x7db   :  { %v1257_v10 = vadd.f32 %v1256_v9, %v1255_v1  ;;  %v1297_v17 = vsel %vm866_vm14, %v1295_v0, 0.0  ;;  %v1277_v18 = vsel %vm868_vm15, %v1275_v11, 0.0 }
 0x7dc   :  { %v1293_v49 = vpop.permute.xlu1 %1292  ;;  %v1278_v22 = vadd.f32 %v1277_v18, %v1276_v21 }
 0x7dd   :  { %v1258_v58 = vrot.slane %v1257_v10, 1  ;;  %v1296_v36 = vmul.f32 %v1293_v49, %v3659_v57 }
 0x7de   :  { %v1279_v24 = vrot.slane %v1278_v22, 4 }
 0x7df   :  { %v1259_v39 = vadd.f32 %v1258_v58, %v1257_v10  ;;  %v1298_v42 = vsel %vm868_vm15, %v1296_v36, 0.0 }
 0x7e0   :  { %v1299_v19 = vadd.f32 %v1298_v42, %v1297_v17  ;;  %v1280_v5 = vadd.f32 %v1279_v24, %v1278_v22 }
 0x7e1   :  { %2587 = vpush %v1259_v39 }
 0x7e2   :  { %v1300_v23 = vrot.slane %v1299_v19, 4  ;;  %v1281_v31 = vrot.slane %v1280_v5, 2 }
 0x7e4   :  { %v1301_v28 = vadd.f32 %v1300_v23, %v1299_v19  ;;  %v1282_v3 = vadd.f32 %v1281_v31, %v1280_v5 }
 0x7e6   :  { %v1302_v7 = vrot.slane %v1301_v28, 2  ;;  %v1283_v27 = vrot.slane %v1282_v3, 1 }
 0x7e8   :  { %v1303_v20 = vadd.f32 %v1302_v7, %v1301_v28  ;;  %v1284_v34 = vadd.f32 %v1283_v27, %v1282_v3 }
 0x7ea   :  { %v1304_v29 = vrot.slane %v1303_v20, 1 }
 0x7ec   :  { %v1305_v32 = vadd.f32 %v1304_v29, %v1303_v20 }
 0x7ee   :  { %v1306_v37 = vadd.f32 %v1305_v32, %v1284_v34 }
 0x80a   :  { %s2586_s11 = spop %2585 }
 0x80b   :  { %v1244_v26 = vstv %s2586_s11 }
 0x812   :  { %s2588_s4 = spop %2587 }
 0x813   :  { %v1261_v47 = vstv %s2588_s4 }
 0x814   :  { %v1262_v25 = vadd.f32 %v1261_v47, %v1244_v26 }
 0x816   :  { %v1263_v35 = vmul.f32 0.5, %v1262_v25 }
 0x818   :  { %vm1307_vm12 = vcmp.lt.f32.partialorder %v1306_v37, %v1263_v35 }
 0x819   :  { %v2553_v40 = vsel %vm1307_vm12, 1.0, %v2869_v59 }
 0x81a   :  { %v1310_v41 = vsel %vm989_vm5, %v2553_v40, 0.0  ;;  %v1322_v43 = vmul.f32 %v2553_v40, %v3585_v14  ;;  %v1323_v60 = vmul.f32 %v2553_v40, %v3589_v15  ;;  %v1331_v50 = vmul.f32 %v2553_v40, %v3659_v57 }
 0x81b   :  { %1311 = vadd.xlane.f32.xlu0 %v1310_v41  ;;  %v1330_v52 = vmul.f32 %v2553_v40, %v3657_v55 }
 0x81c   :  { %v1324_v44 = vsel %vm866_vm14, %v1322_v43, 0.0  ;;  %v1327_v51 = vsel %vm868_vm15, %v1323_v60, 0.0  ;;  %v1335_v54 = vsel %vm868_vm15, %v1331_v50, 0.0 }
 0x81d   :  { %1325 = vadd.xlane.f32.xlu1 %v1324_v44  ;;  %v1332_v61 = vsel %vm866_vm14, %v1330_v52, 0.0 }
 0x81f   :  { %1328 = vadd.xlane.f32.xlu0 %v1327_v51 }
 0x821   :  { %1336 = vadd.xlane.f32.xlu1 %v1335_v54 }
 0x823   :  { %1333 = vadd.xlane.f32.xlu0 %v1332_v61 }
 0x8a8   :  { %v1312_v1 = vpop.xlane.xlu0 %1311 }
 0x8a9   :  { %v1313_v4 = vrot.slane %v1312_v1, 4 }
 0x8aa   :  { %v1326_v63 = vpop.xlane.xlu1 %1325 }
 0x8ab   :  { %v1314_v9 = vadd.f32 %v1313_v4, %v1312_v1  ;;  %v1338_v5 = vsub.f32 %v3728_v45, %v1326_v63 }
 0x8ac   :  { %v1329_v36 = vpop.xlane.xlu0 %1328 }
 0x8ad   :  { %v1315_v10 = vrot.slane %v1314_v9, 2  ;;  %v1339_v7 = vsub.f32 %v3730_v46, %v1329_v36 }
 0x8ae   :  { %v1337_v42 = vpop.xlane.xlu1 %1336 }
 0x8af   :  { %v1316_v58 = vadd.f32 %v1315_v10, %v1314_v9  ;;  %v1341_v20 = vsub.f32 %v3736_v2, %v1337_v42 }
 0x8b0   :  { %v1334_v17 = vpop.xlane.xlu0 %1333 }
 0x8b1   :  { %v1317_v39 = vrot.slane %v1316_v58, 1 }
 0x8b3   :  { %v1318_v48 = vadd.f32 %v1317_v39, %v1316_v58 }
 0x8b5   :  { %2589 = vpush %v1318_v48 }
 0x8e6   :  { %s2590_s13 = spop %2589 }
 0x8e7   :  { %v1320_v62 = vstv %s2590_s13 }
 0x8e8   :  { %v1342_v49 = vmax.f32 %v1320_v62, 1.0  ;;  %vm1347_vm13 = vcmp.gt.f32.partialorder %v1320_v62, 0.0 }
 0x8ea   :  { %2700 = vrcp.f32 %v1342_v49 }
 0x8f4   :  { %v2701_v0 = vpop.eup %2700 }
 0x8f5   :  { %v1358_v11 = vmul.f32 %v2701_v0, %v1326_v63  ;;  %v1359_v12 = vmul.f32 %v2701_v0, %v1329_v36  ;;  %v1365_v21 = vmul.f32 %v2701_v0, %v1337_v42  ;;  %v1364_v22 = vmul.f32 %v2701_v0, %v1334_v17 }
 0x8f7   :  { %v3861_v18 = vsel %vm1347_vm13, %v1358_v11, %v3786_v8  ;;  %v3864_v19 = vsel %vm1347_vm13, %v1359_v12, %v3783_v6  ;;  %v3871_v23 = vsel %vm1347_vm13, %v1365_v21, %v3798_v38  ;;  %v3874_v24 = vsel %vm1347_vm13, %v1364_v22, %v3793_v56 }
 0x8f8   :  { %1370 = vrot.lane.b32.xlu0 %v3861_v18, %s2867_s29  ;;  %1372 = vrot.lane.b32.xlu1 %v3864_v19, %s2867_s29  ;;  %v1321_v6 = vsub.f32 100.0, %v1320_v62  ;;  %v1340_v56 = vsub.f32 %v3734_v53, %v1334_v17 }
 0x8fa   :  { %v1344_v8 = vmax.f32 %v1321_v6, 1.0  ;;  %vm1346_vm2 = vcmp.gt.f32.partialorder %v1321_v6, 0.0 }
 0x8fc   :  { %1382 = vrot.lane.b32.xlu0 %v3871_v23, %s2867_s29  ;;  %1380 = vrot.lane.b32.xlu1 %v3874_v24, %s2867_s29  ;;  %2702 = vrcp.f32 %v1344_v8 }
 0x906   :  { %v2703_v28 = vpop.eup %2702 }
 0x907   :  { %v1349_v31 = vmul.f32 %v2703_v28, %v1339_v7  ;;  %v1348_v38 = vmul.f32 %v2703_v28, %v1338_v5  ;;  %v1354_v26 = vmul.f32 %v2703_v28, %v1340_v56  ;;  %v1355_v47 = vmul.f32 %v2703_v28, %v1341_v20 }
 0x909   :  { %v3885_v29 = vsel %vm1346_vm2, %v1349_v31, %v3812_v13  ;;  %v3888_v27 = vsel %vm1346_vm2, %v1348_v38, %v3817_v16  ;;  %v3895_v13 = vsel %vm1346_vm2, %v1354_v26, %v3827_v30  ;;  %v3898_v16 = vsel %vm1346_vm2, %v1355_v47, %v3836_v33 }
 0x96a   :  { %v1373_v3 = vpop.permute.xlu1 %1372  ;;  %v1371_v32 = vpop.permute.xlu0 %1370 }
 0x96b   :  { %v1377_v25 = vsub.f32 %v3885_v29, %v1373_v3  ;;  %v1389_v34 = vadd.f32 %v1373_v3, %v3885_v29  ;;  %v1376_v35 = vsub.f32 %v3888_v27, %v1371_v32  ;;  %v1388_v37 = vadd.f32 %v1371_v32, %v3888_v27 }
 0x96d   :  { %v1390_v40 = vmul.f32 %v1388_v37, %v1376_v35  ;;  %v1391_v41 = vmul.f32 %v1389_v34, %v1377_v25 }
 0x96e   :  { %v1381_v43 = vpop.permute.xlu1 %1380  ;;  %v1383_v60 = vpop.permute.xlu0 %1382 }
 0x96f   :  { %v1386_v44 = vsub.f32 %v3895_v13, %v1381_v43  ;;  %v1405_v50 = vadd.f32 %v1381_v43, %v3895_v13  ;;  %v1387_v51 = vsub.f32 %v3898_v16, %v1383_v60  ;;  %v1406_v52 = vadd.f32 %v1383_v60, %v3898_v16 }
 0x970   :  { %v1392_v54 = vsel %vm909_vm0, %v1390_v40, 0.0  ;;  %v1393_v61 = vsel %vm911_vm1, %v1391_v41, 0.0 }
 0x971   :  { %v1407_v1 = vmul.f32 %v1405_v50, %v1386_v44  ;;  %v1408_v4 = vmul.f32 %v1406_v52, %v1387_v51  ;;  %v1394_v30 = vadd.f32 %v1393_v61, %v1392_v54 }
 0x973   :  { %1395 = vadd.xlane.f32.xlu1 %v1394_v30  ;;  %v1409_v33 = vsel %vm909_vm0, %v1407_v1, 0.0  ;;  %v1410_v9 = vsel %vm911_vm1, %v1408_v4, 0.0 }
 0x974   :  { %v1411_v10 = vadd.f32 %v1410_v9, %v1409_v33 }
 0x976   :  { %1412 = vadd.xlane.f32.xlu0 %v1411_v10 }
 0x984   :  { %1431 = vperm.xlu1 %2647, %v1377_v25  }
 0x988   :  { %1447 = vperm.xlu1 %2647, %v1386_v44  }
 0x98c   :  { %1426 = vperm.xlu0 %2646, %v1376_v35  }
 0x990   :  { %1452 = vperm.xlu0 %2646, %v1387_v51  }
 0xa00   :  { %v1396_v58 = vpop.xlane.xlu1 %1395 }
 0xa01   :  { %v1397_v39 = vrot.slane %v1396_v58, 4 }
 0xa03   :  { %v1398_v48 = vadd.f32 %v1397_v39, %v1396_v58  ;;  %v1413_v62 = vpop.xlane.xlu0 %1412 }
 0xa04   :  { %v1414_v49 = vrot.slane %v1413_v62, 4  ;;  %v1432_v8 = vpop.permute.xlu1 %1431 }
 0xa05   :  { %v1399_v63 = vrot.slane %v1398_v48, 2  ;;  %v1435_v20 = vmul.f32 %v1432_v8, %v3589_v15 }
 0xa06   :  { %v1415_v36 = vadd.f32 %v1414_v49, %v1413_v62 }
 0xa07   :  { %v1400_v0 = vadd.f32 %v1399_v63, %v1398_v48  ;;  %v1437_v47 = vsel %vm868_vm15, %v1435_v20, 0.0 }
 0xa08   :  { %v1416_v11 = vrot.slane %v1415_v36, 2  ;;  %v1448_v5 = vpop.permute.xlu1 %1447 }
 0xa09   :  { %v1401_v12 = vrot.slane %v1400_v0, 1  ;;  %v1455_v31 = vmul.f32 %v1448_v5, %v3657_v55 }
 0xa0a   :  { %v1417_v42 = vadd.f32 %v1416_v11, %v1415_v36 }
 0xa0b   :  { %v1402_v17 = vadd.f32 %v1401_v12, %v1400_v0  ;;  %v1427_v6 = vpop.permute.xlu0 %1426  ;;  %v1457_v3 = vsel %vm866_vm14, %v1455_v31, 0.0 }
 0xa0c   :  { %v1418_v21 = vrot.slane %v1417_v42, 1  ;;  %v1434_v38 = vmul.f32 %v1427_v6, %v3585_v14 }
 0xa0d   :  { %2591 = vpush %v1402_v17 }
 0xa0e   :  { %v1419_v22 = vadd.f32 %v1418_v21, %v1417_v42  ;;  %v1436_v32 = vsel %vm866_vm14, %v1434_v38, 0.0 }
 0xa0f   :  { %v1453_v28 = vpop.permute.xlu0 %1452  ;;  %v1438_v25 = vadd.f32 %v1437_v47, %v1436_v32 }
 0xa10   :  { %2593 = vpush %v1419_v22  ;;  %v1456_v7 = vmul.f32 %v1453_v28, %v3659_v57 }
 0xa11   :  { %v1439_v35 = vrot.slane %v1438_v25, 4 }
 0xa12   :  { %v1458_v56 = vsel %vm868_vm15, %v1456_v7, 0.0 }
 0xa13   :  { %v1459_v26 = vadd.f32 %v1458_v56, %v1457_v3  ;;  %v1440_v40 = vadd.f32 %v1439_v35, %v1438_v25 }
 0xa15   :  { %v1460_v34 = vrot.slane %v1459_v26, 4  ;;  %v1441_v43 = vrot.slane %v1440_v40, 2 }
 0xa17   :  { %v1461_v37 = vadd.f32 %v1460_v34, %v1459_v26  ;;  %v1442_v44 = vadd.f32 %v1441_v43, %v1440_v40 }
 0xa19   :  { %v1462_v41 = vrot.slane %v1461_v37, 2  ;;  %v1443_v51 = vrot.slane %v1442_v44, 1 }
 0xa1b   :  { %v1463_v60 = vadd.f32 %v1462_v41, %v1461_v37  ;;  %v1444_v4 = vadd.f32 %v1443_v51, %v1442_v44 }
 0xa1d   :  { %v1464_v50 = vrot.slane %v1463_v60, 1 }
 0xa1f   :  { %v1465_v52 = vadd.f32 %v1464_v50, %v1463_v60 }
 0xa21   :  { %v1466_v33 = vadd.f32 %v1465_v52, %v1444_v4 }
 0xa3e   :  { %s2592_s0 = spop %2591 }
 0xa3f   :  { %v1404_v54 = vstv %s2592_s0 }
 0xa41   :  { %s2594_s12 = spop %2593 }
 0xa42   :  { %v1421_v61 = vstv %s2594_s12 }
 0xa43   :  { %v1422_v1 = vadd.f32 %v1421_v61, %v1404_v54 }
 0xa45   :  { %v1423_v30 = vmul.f32 0.5, %v1422_v1 }
 0xa47   :  { %vm1467_vm3 = vcmp.lt.f32.partialorder %v1466_v33, %v1423_v30 }
 0xa48   :  { %v2554_v9 = vsel %vm1467_vm3, 1.0, %v2869_v59 }
 0xa49   :  { %v1470_v10 = vsel %vm989_vm5, %v2554_v9, 0.0  ;;  %v1482_v58 = vmul.f32 %v2554_v9, %v3585_v14  ;;  %v1490_v39 = vmul.f32 %v2554_v9, %v3657_v55  ;;  %v1483_v62 = vmul.f32 %v2554_v9, %v3589_v15 }
 0xa4a   :  { %1471 = vadd.xlane.f32.xlu1 %v1470_v10  ;;  %v1491_v36 = vmul.f32 %v2554_v9, %v3659_v57 }
 0xa4b   :  { %v1484_v48 = vsel %vm866_vm14, %v1482_v58, 0.0  ;;  %v1492_v49 = vsel %vm866_vm14, %v1490_v39, 0.0  ;;  %v1487_v63 = vsel %vm868_vm15, %v1483_v62, 0.0 }
 0xa4c   :  { %1485 = vadd.xlane.f32.xlu0 %v1484_v48  ;;  %v1495_v0 = vsel %vm868_vm15, %v1491_v36, 0.0 }
 0xa4e   :  { %1493 = vadd.xlane.f32.xlu1 %v1492_v49 }
 0xa50   :  { %1488 = vadd.xlane.f32.xlu0 %v1487_v63 }
 0xa54   :  { %1496 = vadd.xlane.f32.xlu0 %v1495_v0 }
 0xad7   :  { %v1472_v11 = vpop.xlane.xlu1 %1471 }
 0xad8   :  { %v1473_v12 = vrot.slane %v1472_v11, 4 }
 0xad9   :  { %v1486_v5 = vpop.xlane.xlu0 %1485 }
 0xada   :  { %v1474_v42 = vadd.f32 %v1473_v12, %v1472_v11  ;;  %v1498_v40 = vsub.f32 %v3728_v45, %v1486_v5 }
 0xadb   :  { %v1494_v56 = vpop.xlane.xlu1 %1493 }
 0xadc   :  { %v1475_v17 = vrot.slane %v1474_v42, 2  ;;  %v1500_v60 = vsub.f32 %v3734_v53, %v1494_v56 }
 0xadd   :  { %v1489_v31 = vpop.xlane.xlu0 %1488 }
 0xade   :  { %v1476_v21 = vadd.f32 %v1475_v17, %v1474_v42  ;;  %v1499_v41 = vsub.f32 %v3730_v46, %v1489_v31 }
 0xae0   :  { %v1477_v22 = vrot.slane %v1476_v21, 1 }
 0xae1   :  { %v1497_v47 = vpop.xlane.xlu0 %1496 }
 0xae2   :  { %v1478_v6 = vadd.f32 %v1477_v22, %v1476_v21  ;;  %v1501_v33 = vsub.f32 %v3736_v2, %v1497_v47 }
 0xae4   :  { %2595 = vpush %v1478_v6 }
 0xb15   :  { %s2596_s2 = spop %2595 }
 0xb16   :  { %v1480_v8 = vstv %s2596_s2 }
 0xb17   :  { %v1502_v28 = vmax.f32 %v1480_v8, 1.0  ;;  %vm1507_vm4 = vcmp.gt.f32.partialorder %v1480_v8, 0.0 }
 0xb19   :  { %2704 = vrcp.f32 %v1502_v28 }
 0xb23   :  { %v2705_v7 = vpop.eup %2704 }
 0xb24   :  { %v1519_v38 = vmul.f32 %v2705_v7, %v1489_v31  ;;  %v1518_v20 = vmul.f32 %v2705_v7, %v1486_v5  ;;  %v1524_v26 = vmul.f32 %v2705_v7, %v1494_v56  ;;  %v1525_v34 = vmul.f32 %v2705_v7, %v1497_v47 }
 0xb26   :  { %v3927_v3 = vsel %vm1507_vm4, %v1519_v38, %v3864_v19  ;;  %v3930_v32 = vsel %vm1507_vm4, %v1518_v20, %v3861_v18  ;;  %v3937_v25 = vsel %vm1507_vm4, %v1524_v26, %v3874_v24  ;;  %v3942_v19 = vsel %vm1507_vm4, %v1525_v34, %v3871_v23 }
 0xb27   :  { %1532 = vrot.lane.b32.xlu0 %v3927_v3, %s2867_s29  ;;  %1530 = vrot.lane.b32.xlu1 %v3930_v32, %s2867_s29  ;;  %v1481_v18 = vsub.f32 100.0, %v1480_v8 }
 0xb29   :  { %v1504_v35 = vmax.f32 %v1481_v18, 1.0  ;;  %vm3949_vm6 = vcmp.gt.f32.partialorder %v1481_v18, 0.0 }
 0xb2b   :  { %1540 = vrot.lane.b32.xlu1 %v3937_v25, %s2867_s29  ;;  %2706 = vrcp.f32 %v1504_v35 }
 0xb2f   :  { %1542 = vrot.lane.b32.xlu1 %v3942_v19, %s2867_s29 }
 0xb35   :  { %v2707_v37 = vpop.eup %2706 }
 0xb36   :  { %v1509_v24 = vmul.f32 %v2707_v37, %v1499_v41  ;;  %v1508_v43 = vmul.f32 %v2707_v37, %v1498_v40  ;;  %v1514_v54 = vmul.f32 %v2707_v37, %v1500_v60  ;;  %v1515_v58 = vmul.f32 %v2707_v37, %v1501_v33 }
 0xb38   :  { %v3956_v50 = vsel %vm3949_vm6, %v1509_v24, %v3885_v29  ;;  %v3961_v51 = vsel %vm3949_vm6, %v1508_v43, %v3888_v27  ;;  %v3971_v10 = vsel %vm3949_vm6, %v1514_v54, %v3895_v13  ;;  %v3980_v36 = vsel %vm3949_vm6, %v1515_v58, %v3898_v16 }
 0xb99   :  { %v1533_v23 = vpop.permute.xlu0 %1532  ;;  %v1531_v52 = vpop.permute.xlu1 %1530 }
 0xb9a   :  { %v1537_v61 = vsub.f32 %v3956_v50, %v1533_v23  ;;  %v1549_v1 = vadd.f32 %v1533_v23, %v3956_v50  ;;  %v1536_v4 = vsub.f32 %v3961_v51, %v1531_v52  ;;  %v1548_v30 = vadd.f32 %v1531_v52, %v3961_v51 }
 0xb9c   :  { %v1551_v9 = vmul.f32 %v1549_v1, %v1537_v61  ;;  %v1550_v29 = vmul.f32 %v1548_v30, %v1536_v4 }
 0xb9d   :  { %v1541_v27 = vpop.permute.xlu1 %1540 }
 0xb9e   :  { %v1546_v39 = vsub.f32 %v3971_v10, %v1541_v27  ;;  %v1565_v48 = vadd.f32 %v1541_v27, %v3971_v10  ;;  %v1552_v62 = vsel %vm909_vm0, %v1550_v29, 0.0  ;;  %v1553_v49 = vsel %vm911_vm1, %v1551_v9, 0.0 }
 0xb9f   :  { %v1554_v63 = vadd.f32 %v1553_v49, %v1552_v62 }
 0xba0   :  { %v1567_v13 = vmul.f32 %v1565_v48, %v1546_v39 }
 0xba1   :  { %1555 = vadd.xlane.f32.xlu0 %v1554_v63  ;;  %v1543_v0 = vpop.permute.xlu1 %1542 }
 0xba2   :  { %v1547_v11 = vsub.f32 %v3980_v36, %v1543_v0  ;;  %v1566_v12 = vadd.f32 %v1543_v0, %v3980_v36  ;;  %v1569_v17 = vsel %vm909_vm0, %v1567_v13, 0.0 }
 0xba4   :  { %v1568_v42 = vmul.f32 %v1566_v12, %v1547_v11 }
 0xba6   :  { %v1570_v21 = vsel %vm911_vm1, %v1568_v42, 0.0 }
 0xba7   :  { %v1571_v22 = vadd.f32 %v1570_v21, %v1569_v17 }
 0xba9   :  { %1572 = vadd.xlane.f32.xlu1 %v1571_v22 }
 0xbb7   :  { %1586 = vperm.xlu0 %2646, %v1536_v4  }
 0xbba   :  { %1591 = vperm.xlu1 %2647, %v1537_v61  }
 0xbbb   :  { %1607 = vperm.xlu0 %2646, %v1546_v39  }
 0xbbe   :  { %1612 = vperm.xlu1 %2647, %v1547_v11  }
 0xc2e   :  { %v1556_v6 = vpop.xlane.xlu0 %1555 }
 0xc2f   :  { %v1557_v16 = vrot.slane %v1556_v6, 4 }
 0xc31   :  { %v1558_v8 = vadd.f32 %v1557_v16, %v1556_v6 }
 0xc33   :  { %v1559_v28 = vrot.slane %v1558_v8, 2 }
 0xc35   :  { %v1560_v5 = vadd.f32 %v1559_v28, %v1558_v8 }
 0xc36   :  { %v1573_v7 = vpop.xlane.xlu1 %1572  ;;  %v1587_v37 = vpop.permute.xlu0 %1586 }
 0xc37   :  { %v1574_v31 = vrot.slane %v1573_v7, 4  ;;  %v1561_v38 = vrot.slane %v1560_v5, 1  ;;  %v1594_v44 = vmul.f32 %v1587_v37, %v3585_v14 }
 0xc39   :  { %v1575_v20 = vadd.f32 %v1574_v31, %v1573_v7  ;;  %v1562_v56 = vadd.f32 %v1561_v38, %v1560_v5  ;;  %v1596_v1 = vsel %vm866_vm14, %v1594_v44, 0.0 }
 0xc3a   :  { %v1592_v35 = vpop.permute.xlu1 %1591  ;;  %v1608_v41 = vpop.permute.xlu0 %1607 }
 0xc3b   :  { %v1576_v26 = vrot.slane %v1575_v20, 2  ;;  %2597 = vpush %v1562_v56  ;;  %v1615_v43 = vmul.f32 %v1608_v41, %v3657_v55  ;;  %v1595_v60 = vmul.f32 %v1592_v35, %v3589_v15 }
 0xc3d   :  { %v1577_v47 = vadd.f32 %v1576_v26, %v1575_v20  ;;  %v1617_v52 = vsel %vm866_vm14, %v1615_v43, 0.0  ;;  %v1597_v54 = vsel %vm868_vm15, %v1595_v60, 0.0 }
 0xc3e   :  { %v1613_v40 = vpop.permute.xlu1 %1612  ;;  %v1598_v4 = vadd.f32 %v1597_v54, %v1596_v1 }
 0xc3f   :  { %v1578_v34 = vrot.slane %v1577_v47, 1  ;;  %v1616_v24 = vmul.f32 %v1613_v40, %v3659_v57 }
 0xc40   :  { %v1599_v33 = vrot.slane %v1598_v4, 4 }
 0xc41   :  { %v1579_v18 = vadd.f32 %v1578_v34, %v1577_v47  ;;  %v1618_v23 = vsel %vm868_vm15, %v1616_v24, 0.0 }
 0xc42   :  { %v1619_v61 = vadd.f32 %v1618_v23, %v1617_v52  ;;  %v1600_v29 = vadd.f32 %v1599_v33, %v1598_v4 }
 0xc43   :  { %2599 = vpush %v1579_v18 }
 0xc44   :  { %v1620_v30 = vrot.slane %v1619_v61, 4  ;;  %v1601_v58 = vrot.slane %v1600_v29, 2 }
 0xc46   :  { %v1621_v9 = vadd.f32 %v1620_v30, %v1619_v61  ;;  %v1602_v48 = vadd.f32 %v1601_v58, %v1600_v29 }
 0xc48   :  { %v1622_v27 = vrot.slane %v1621_v9, 2  ;;  %v1603_v49 = vrot.slane %v1602_v48, 1 }
 0xc4a   :  { %v1623_v39 = vadd.f32 %v1622_v27, %v1621_v9  ;;  %v1604_v12 = vadd.f32 %v1603_v49, %v1602_v48 }
 0xc4c   :  { %v1624_v62 = vrot.slane %v1623_v39, 1 }
 0xc4e   :  { %v1625_v63 = vadd.f32 %v1624_v62, %v1623_v39 }
 0xc50   :  { %v1626_v17 = vadd.f32 %v1625_v63, %v1604_v12 }
 0xc6c   :  { %s2598_s30 = spop %2597 }
 0xc6d   :  { %v1564_v0 = vstv %s2598_s30 }
 0xc74   :  { %s2600_s27 = spop %2599 }
 0xc75   :  { %v1581_v13 = vstv %s2600_s27 }
 0xc76   :  { %v1582_v11 = vadd.f32 %v1581_v13, %v1564_v0 }
 0xc78   :  { %v1583_v42 = vmul.f32 0.5, %v1582_v11 }
 0xc7a   :  { %vm1627_vm7 = vcmp.lt.f32.partialorder %v1626_v17, %v1583_v42 }
 0xc7b   :  { %v2555_v21 = vsel %vm1627_vm7, 1.0, %v2869_v59 }
 0xc7c   :  { %v1630_v22 = vsel %vm989_vm5, %v2555_v21, 0.0  ;;  %v1642_v6 = vmul.f32 %v2555_v21, %v3585_v14  ;;  %v1643_v16 = vmul.f32 %v2555_v21, %v3589_v15  ;;  %v1651_v28 = vmul.f32 %v2555_v21, %v3659_v57 }
 0xc7d   :  { %1631 = vadd.xlane.f32.xlu0 %v1630_v22  ;;  %v1650_v7 = vmul.f32 %v2555_v21, %v3657_v55 }
 0xc7e   :  { %v1644_v8 = vsel %vm866_vm14, %v1642_v6, 0.0  ;;  %v1647_v5 = vsel %vm868_vm15, %v1643_v16, 0.0  ;;  %v1655_v31 = vsel %vm868_vm15, %v1651_v28, 0.0 }
 0xc7f   :  { %1645 = vadd.xlane.f32.xlu1 %v1644_v8  ;;  %v1652_v38 = vsel %vm866_vm14, %v1650_v7, 0.0 }
 0xc81   :  { %1648 = vadd.xlane.f32.xlu0 %v1647_v5 }
 0xc83   :  { %1656 = vadd.xlane.f32.xlu1 %v1655_v31 }
 0xc85   :  { %1653 = vadd.xlane.f32.xlu0 %v1652_v38 }
 0xd0a   :  { %v1632_v20 = vpop.xlane.xlu0 %1631 }
 0xd0b   :  { %v1633_v56 = vrot.slane %v1632_v20, 4 }
 0xd0c   :  { %v1646_v41 = vpop.xlane.xlu1 %1645 }
 0xd0d   :  { %v1634_v26 = vadd.f32 %v1633_v56, %v1632_v20  ;;  %v1658_v29 = vsub.f32 %v3728_v45, %v1646_v41 }
 0xd0e   :  { %v1649_v24 = vpop.xlane.xlu0 %1648 }
 0xd0f   :  { %v1635_v47 = vrot.slane %v1634_v26, 2  ;;  %v1659_v27 = vsub.f32 %v3730_v46, %v1649_v24 }
 0xd10   :  { %v1657_v23 = vpop.xlane.xlu1 %1656 }
 0xd11   :  { %v1636_v34 = vadd.f32 %v1635_v47, %v1634_v26  ;;  %v1661_v39 = vsub.f32 %v3736_v2, %v1657_v23 }
 0xd12   :  { %v1654_v52 = vpop.xlane.xlu0 %1653 }
 0xd13   :  { %v1637_v18 = vrot.slane %v1636_v34, 1 }
 0xd15   :  { %v1638_v35 = vadd.f32 %v1637_v18, %v1636_v34 }
 0xd17   :  { %2601 = vpush %v1638_v35 }
 0xd48   :  { %s2602_s19 = spop %2601 }
 0xd49   :  { %v1640_v37 = vstv %s2602_s19 }
 0xd4a   :  { %v1662_v40 = vmax.f32 %v1640_v37, 1.0  ;;  %vm1667_vm8 = vcmp.gt.f32.partialorder %v1640_v37, 0.0 }
 0xd4c   :  { %2708 = vrcp.f32 %v1662_v40 }
 0xd56   :  { %v2709_v43 = vpop.eup %2708 }
 0xd57   :  { %v1678_v60 = vmul.f32 %v2709_v43, %v1646_v41  ;;  %v1679_v44 = vmul.f32 %v2709_v43, %v1649_v24  ;;  %v1685_v1 = vmul.f32 %v2709_v43, %v1657_v23  ;;  %v1684_v4 = vmul.f32 %v2709_v43, %v1654_v52 }
 0xd59   :  { %v4005_v54 = vsel %vm1667_vm8, %v1678_v60, %v3930_v32  ;;  %v4008_v61 = vsel %vm1667_vm8, %v1679_v44, %v3927_v3  ;;  %v4015_v30 = vsel %vm1667_vm8, %v1685_v1, %v3942_v19  ;;  %v4018_v33 = vsel %vm1667_vm8, %v1684_v4, %v3937_v25 }
 0xd5a   :  { %1690 = vrot.lane.b32.xlu0 %v4005_v54, %s2867_s29  ;;  %1692 = vrot.lane.b32.xlu1 %v4008_v61, %s2867_s29  ;;  %v1641_v3 = vsub.f32 100.0, %v1640_v37  ;;  %v1660_v25 = vsub.f32 %v3734_v53, %v1654_v52 }
 0xd5c   :  { %v1664_v32 = vmax.f32 %v1641_v3, 1.0  ;;  %vm1666_vm9 = vcmp.gt.f32.partialorder %v1641_v3, 0.0 }
 0xd5e   :  { %1702 = vrot.lane.b32.xlu0 %v4015_v30, %s2867_s29  ;;  %1700 = vrot.lane.b32.xlu1 %v4018_v33, %s2867_s29  ;;  %2710 = vrcp.f32 %v1664_v32 }
 0xd68   :  { %v2711_v9 = vpop.eup %2710 }
 0xd69   :  { %v1669_v58 = vmul.f32 %v2711_v9, %v1659_v27  ;;  %v1668_v19 = vmul.f32 %v2711_v9, %v1658_v29  ;;  %v1674_v0 = vmul.f32 %v2711_v9, %v1660_v25  ;;  %v1675_v13 = vmul.f32 %v2711_v9, %v1661_v39 }
 0xd6b   :  { %v4029_v62 = vsel %vm1666_vm9, %v1669_v58, %v3956_v50  ;;  %v4032_v49 = vsel %vm1666_vm9, %v1668_v19, %v3961_v51  ;;  %v4039_v50 = vsel %vm1666_vm9, %v1674_v0, %v3971_v10  ;;  %v4042_v51 = vsel %vm1666_vm9, %v1675_v13, %v3980_v36 }
 0xdcc   :  { %v1693_v48 = vpop.permute.xlu1 %1692  ;;  %v1691_v63 = vpop.permute.xlu0 %1690 }
 0xdcd   :  { %v1697_v11 = vsub.f32 %v4029_v62, %v1693_v48  ;;  %v1709_v12 = vadd.f32 %v1693_v48, %v4029_v62  ;;  %v1696_v42 = vsub.f32 %v4032_v49, %v1691_v63  ;;  %v1708_v17 = vadd.f32 %v1691_v63, %v4032_v49 }
 0xdcf   :  { %v1711_v21 = vmul.f32 %v1709_v12, %v1697_v11  ;;  %v1710_v22 = vmul.f32 %v1708_v17, %v1696_v42 }
 0xdd0   :  { %v1701_v6 = vpop.permute.xlu1 %1700  ;;  %v1703_v16 = vpop.permute.xlu0 %1702 }
 0xdd1   :  { %v1706_v8 = vsub.f32 %v4039_v50, %v1701_v6  ;;  %v1725_v28 = vadd.f32 %v1701_v6, %v4039_v50  ;;  %v1707_v5 = vsub.f32 %v4042_v51, %v1703_v16  ;;  %v1726_v7 = vadd.f32 %v1703_v16, %v4042_v51 }
 0xdd2   :  { %v1712_v31 = vsel %vm909_vm0, %v1710_v22, 0.0  ;;  %v1713_v38 = vsel %vm911_vm1, %v1711_v21, 0.0 }
 0xdd3   :  { %v1727_v20 = vmul.f32 %v1725_v28, %v1706_v8  ;;  %v1728_v56 = vmul.f32 %v1726_v7, %v1707_v5  ;;  %v1714_v10 = vadd.f32 %v1713_v38, %v1712_v31 }
 0xdd5   :  { %1715 = vadd.xlane.f32.xlu1 %v1714_v10  ;;  %v1729_v36 = vsel %vm909_vm0, %v1727_v20, 0.0  ;;  %v1730_v26 = vsel %vm911_vm1, %v1728_v56, 0.0 }
 0xdd6   :  { %v1731_v47 = vadd.f32 %v1730_v26, %v1729_v36 }
 0xdd8   :  { %1732 = vadd.xlane.f32.xlu0 %v1731_v47 }
 0xde6   :  { %1751 = vperm.xlu1 %2647, %v1697_v11  }
 0xdea   :  { %1767 = vperm.xlu1 %2647, %v1706_v8  }
 0xdee   :  { %1746 = vperm.xlu0 %2646, %v1696_v42  }
 0xdf2   :  { %1772 = vperm.xlu0 %2646, %v1707_v5  }
 0xe62   :  { %v1716_v34 = vpop.xlane.xlu1 %1715 }
 0xe63   :  { %v1717_v18 = vrot.slane %v1716_v34, 4 }
 0xe65   :  { %v1718_v35 = vadd.f32 %v1717_v18, %v1716_v34  ;;  %v1733_v37 = vpop.xlane.xlu0 %1732 }
 0xe66   :  { %v1734_v40 = vrot.slane %v1733_v37, 4  ;;  %v1752_v32 = vpop.permute.xlu1 %1751 }
 0xe67   :  { %v1719_v41 = vrot.slane %v1718_v35, 2  ;;  %v1755_v39 = vmul.f32 %v1752_v32, %v3589_v15 }
 0xe68   :  { %v1735_v24 = vadd.f32 %v1734_v40, %v1733_v37 }
 0xe69   :  { %v1720_v43 = vadd.f32 %v1719_v41, %v1718_v35  ;;  %v1757_v13 = vsel %vm868_vm15, %v1755_v39, 0.0 }
 0xe6a   :  { %v1736_v60 = vrot.slane %v1735_v24, 2  ;;  %v1768_v29 = vpop.permute.xlu1 %1767 }
 0xe6b   :  { %v1721_v44 = vrot.slane %v1720_v43, 1  ;;  %v1775_v58 = vmul.f32 %v1768_v29, %v3657_v55 }
 0xe6c   :  { %v1737_v23 = vadd.f32 %v1736_v60, %v1735_v24 }
 0xe6d   :  { %v1722_v52 = vadd.f32 %v1721_v44, %v1720_v43  ;;  %v1747_v3 = vpop.permute.xlu0 %1746  ;;  %v1777_v48 = vsel %vm866_vm14, %v1775_v58, 0.0 }
 0xe6e   :  { %v1738_v1 = vrot.slane %v1737_v23, 1  ;;  %v1754_v19 = vmul.f32 %v1747_v3, %v3585_v14 }
 0xe6f   :  { %2603 = vpush %v1722_v52 }
 0xe70   :  { %v1739_v4 = vadd.f32 %v1738_v1, %v1737_v23  ;;  %v1756_v63 = vsel %vm866_vm14, %v1754_v19, 0.0 }
 0xe71   :  { %v1773_v9 = vpop.permute.xlu0 %1772  ;;  %v1758_v11 = vadd.f32 %v1757_v13, %v1756_v63 }
 0xe72   :  { %2605 = vpush %v1739_v4  ;;  %v1776_v27 = vmul.f32 %v1773_v9, %v3659_v57 }
 0xe73   :  { %v1759_v42 = vrot.slane %v1758_v11, 4 }
 0xe74   :  { %v1778_v25 = vsel %vm868_vm15, %v1776_v27, 0.0 }
 0xe75   :  { %v1779_v0 = vadd.f32 %v1778_v25, %v1777_v48  ;;  %v1760_v21 = vadd.f32 %v1759_v42, %v1758_v11 }
 0xe77   :  { %v1780_v12 = vrot.slane %v1779_v0, 4  ;;  %v1761_v6 = vrot.slane %v1760_v21, 2 }
 0xe79   :  { %v1781_v17 = vadd.f32 %v1780_v12, %v1779_v0  ;;  %v1762_v8 = vadd.f32 %v1761_v6, %v1760_v21 }
 0xe7b   :  { %v1782_v22 = vrot.slane %v1781_v17, 2  ;;  %v1763_v5 = vrot.slane %v1762_v8, 1 }
 0xe7d   :  { %v1783_v16 = vadd.f32 %v1782_v22, %v1781_v17  ;;  %v1764_v56 = vadd.f32 %v1763_v5, %v1762_v8 }
 0xe7f   :  { %v1784_v28 = vrot.slane %v1783_v16, 1 }
 0xe81   :  { %v1785_v7 = vadd.f32 %v1784_v28, %v1783_v16 }
 0xe83   :  { %v1786_v36 = vadd.f32 %v1785_v7, %v1764_v56 }
 0xea0   :  { %s2604_s22 = spop %2603 }
 0xea1   :  { %v1724_v31 = vstv %s2604_s22 }
 0xea3   :  { %s2606_s18 = spop %2605 }
 0xea4   :  { %v1741_v38 = vstv %s2606_s18 }
 0xea5   :  { %v1742_v20 = vadd.f32 %v1741_v38, %v1724_v31 }
 0xea7   :  { %v1743_v10 = vmul.f32 0.5, %v1742_v20 }
 0xea9   :  { %vm1787_vm10 = vcmp.lt.f32.partialorder %v1786_v36, %v1743_v10 }
 0xeaa   :  { %v2556_v26 = vsel %vm1787_vm10, 1.0, %v2869_v59 }
 0xeab   :  { %v1790_v47 = vsel %vm989_vm5, %v2556_v26, 0.0  ;;  %v1802_v34 = vmul.f32 %v2556_v26, %v3585_v14  ;;  %v1810_v18 = vmul.f32 %v2556_v26, %v3657_v55  ;;  %v1803_v37 = vmul.f32 %v2556_v26, %v3589_v15 }
 0xeac   :  { %1791 = vadd.xlane.f32.xlu1 %v1790_v47  ;;  %v1811_v24 = vmul.f32 %v2556_v26, %v3659_v57 }
 0xead   :  { %v1804_v35 = vsel %vm866_vm14, %v1802_v34, 0.0  ;;  %v1812_v40 = vsel %vm866_vm14, %v1810_v18, 0.0  ;;  %v1807_v41 = vsel %vm868_vm15, %v1803_v37, 0.0 }
 0xeae   :  { %1805 = vadd.xlane.f32.xlu0 %v1804_v35  ;;  %v1815_v43 = vsel %vm868_vm15, %v1811_v24, 0.0 }
 0xeb0   :  { %1813 = vadd.xlane.f32.xlu1 %v1812_v40 }
 0xeb2   :  { %1808 = vadd.xlane.f32.xlu0 %v1807_v41 }
 0xeb6   :  { %1816 = vadd.xlane.f32.xlu0 %v1815_v43 }
 0xf39   :  { %v1792_v60 = vpop.xlane.xlu1 %1791 }
 0xf3a   :  { %v1793_v44 = vrot.slane %v1792_v60, 4 }
 0xf3b   :  { %v1806_v29 = vpop.xlane.xlu0 %1805 }
 0xf3c   :  { %v1794_v23 = vadd.f32 %v1793_v44, %v1792_v60  ;;  %v1818_v21 = vsub.f32 %v3728_v45, %v1806_v29 }
 0xf3d   :  { %v1814_v25 = vpop.xlane.xlu1 %1813 }
 0xf3e   :  { %v1795_v52 = vrot.slane %v1794_v23, 2  ;;  %v1820_v16 = vsub.f32 %v3734_v53, %v1814_v25 }
 0xf3f   :  { %v1809_v58 = vpop.xlane.xlu0 %1808 }
 0xf40   :  { %v1796_v1 = vadd.f32 %v1795_v52, %v1794_v23  ;;  %v1819_v22 = vsub.f32 %v3730_v46, %v1809_v58 }
 0xf42   :  { %v1797_v4 = vrot.slane %v1796_v1, 1 }
 0xf43   :  { %v1817_v13 = vpop.xlane.xlu0 %1816 }
 0xf44   :  { %v1798_v3 = vadd.f32 %v1797_v4, %v1796_v1  ;;  %v1821_v36 = vsub.f32 %v3736_v2, %v1817_v13 }
 0xf46   :  { %2607 = vpush %v1798_v3 }
 0xf77   :  { %s2608_s21 = spop %2607 }
 0xf78   :  { %v1800_v32 = vstv %s2608_s21 }
 0xf79   :  { %v1822_v9 = vmax.f32 %v1800_v32, 1.0  ;;  %vm1827_vm11 = vcmp.gt.f32.partialorder %v1800_v32, 0.0 }
 0xf7b   :  { %2712 = vrcp.f32 %v1822_v9 }
 0xf85   :  { %v2713_v27 = vpop.eup %2712 }
 0xf86   :  { %v1839_v19 = vmul.f32 %v2713_v27, %v1809_v58  ;;  %v1838_v39 = vmul.f32 %v2713_v27, %v1806_v29  ;;  %v1844_v0 = vmul.f32 %v2713_v27, %v1814_v25  ;;  %v1845_v12 = vmul.f32 %v2713_v27, %v1817_v13 }
 0xf88   :  { %v4071_v48 = vsel %vm1827_vm11, %v1839_v19, %v4008_v61  ;;  %v4074_v63 = vsel %vm1827_vm11, %v1838_v39, %v4005_v54  ;;  %v4081_v11 = vsel %vm1827_vm11, %v1844_v0, %v4018_v33  ;;  %v4086_v61 = vsel %vm1827_vm11, %v1845_v12, %v4015_v30 }
 0xf89   :  { %1852 = vrot.lane.b32.xlu0 %v4071_v48, %s2867_s29  ;;  %1850 = vrot.lane.b32.xlu1 %v4074_v63, %s2867_s29  ;;  %v1801_v54 = vsub.f32 100.0, %v1800_v32 }
 0xf8b   :  { %v1824_v42 = vmax.f32 %v1801_v54, 1.0  ;;  %vm4093_vm12 = vcmp.gt.f32.partialorder %v1801_v54, 0.0 }
 0xf8d   :  { %1860 = vrot.lane.b32.xlu1 %v4081_v11, %s2867_s29  ;;  %2714 = vrcp.f32 %v1824_v42 }
 0xf91   :  { %1862 = vrot.lane.b32.xlu1 %v4086_v61, %s2867_s29 }
 0xf97   :  { %v2715_v17 = vpop.eup %2714 }
 0xf98   :  { %v1829_v33 = vmul.f32 %v2715_v17, %v1819_v22  ;;  %v1828_v6 = vmul.f32 %v2715_v17, %v1818_v21  ;;  %v1834_v31 = vmul.f32 %v2715_v17, %v1820_v16  ;;  %v1835_v34 = vmul.f32 %v2715_v17, %v1821_v36 }
 0xf9a   :  { %v4100_v28 = vsel %vm4093_vm12, %v1829_v33, %v4029_v62  ;;  %v4105_v5 = vsel %vm4093_vm12, %v1828_v6, %v4032_v49  ;;  %v4115_v47 = vsel %vm4093_vm12, %v1834_v31, %v4039_v50  ;;  %v4124_v24 = vsel %vm4093_vm12, %v1835_v34, %v4042_v51 }
 0xffb   :  { %v1853_v30 = vpop.permute.xlu0 %1852  ;;  %v1851_v7 = vpop.permute.xlu1 %1850 }
 0xffc   :  { %v1857_v38 = vsub.f32 %v4100_v28, %v1853_v30  ;;  %v1869_v20 = vadd.f32 %v1853_v30, %v4100_v28  ;;  %v1856_v56 = vsub.f32 %v4105_v5, %v1851_v7  ;;  %v1868_v10 = vadd.f32 %v1851_v7, %v4105_v5 }
 0xffe   :  { %v1871_v26 = vmul.f32 %v1869_v20, %v1857_v38  ;;  %v1870_v62 = vmul.f32 %v1868_v10, %v1856_v56 }
 0xfff   :  { %v1861_v49 = vpop.permute.xlu1 %1860 }
0x1000   :  { %v1866_v18 = vsub.f32 %v4115_v47, %v1861_v49  ;;  %v1885_v35 = vadd.f32 %v1861_v49, %v4115_v47  ;;  %v1872_v37 = vsel %vm909_vm0, %v1870_v62, 0.0  ;;  %v1873_v40 = vsel %vm911_vm1, %v1871_v26, 0.0 }
0x1001   :  { %v1874_v41 = vadd.f32 %v1873_v40, %v1872_v37 }
0x1002   :  { %v1887_v50 = vmul.f32 %v1885_v35, %v1866_v18 }
0x1003   :  { %1875 = vadd.xlane.f32.xlu0 %v1874_v41  ;;  %v1863_v43 = vpop.permute.xlu1 %1862 }
0x1004   :  { %v1867_v60 = vsub.f32 %v4124_v24, %v1863_v43  ;;  %v1886_v44 = vadd.f32 %v1863_v43, %v4124_v24  ;;  %v1889_v52 = vsel %vm909_vm0, %v1887_v50, 0.0 }
0x1006   :  { %v1888_v23 = vmul.f32 %v1886_v44, %v1867_v60 }
0x1008   :  { %v1890_v1 = vsel %vm911_vm1, %v1888_v23, 0.0 }
0x1009   :  { %v1891_v4 = vadd.f32 %v1890_v1, %v1889_v52 }
0x100b   :  { %1892 = vadd.xlane.f32.xlu1 %v1891_v4 }
0x1019   :  { %1906 = vperm.xlu0 %2646, %v1856_v56  }
0x101c   :  { %1911 = vperm.xlu1 %2647, %v1857_v38  }
0x101d   :  { %1927 = vperm.xlu0 %2646, %v1866_v18  }
0x1020   :  { %1932 = vperm.xlu1 %2647, %v1867_v60  }
0x1090   :  { %v1876_v3 = vpop.xlane.xlu0 %1875 }
0x1091   :  { %v1877_v51 = vrot.slane %v1876_v3, 4 }
0x1093   :  { %v1878_v32 = vadd.f32 %v1877_v51, %v1876_v3 }
0x1095   :  { %v1879_v9 = vrot.slane %v1878_v32, 2 }
0x1097   :  { %v1880_v29 = vadd.f32 %v1879_v9, %v1878_v32 }
0x1098   :  { %v1893_v27 = vpop.xlane.xlu1 %1892  ;;  %v1907_v17 = vpop.permute.xlu0 %1906 }
0x1099   :  { %v1894_v58 = vrot.slane %v1893_v27, 4  ;;  %v1881_v19 = vrot.slane %v1880_v29, 1  ;;  %v1914_v8 = vmul.f32 %v1907_v17, %v3585_v14 }
0x109b   :  { %v1895_v39 = vadd.f32 %v1894_v58, %v1893_v27  ;;  %v1882_v25 = vadd.f32 %v1881_v19, %v1880_v29  ;;  %v1916_v20 = vsel %vm866_vm14, %v1914_v8, 0.0 }
0x109c   :  { %v1912_v42 = vpop.permute.xlu1 %1911  ;;  %v1928_v22 = vpop.permute.xlu0 %1927 }
0x109d   :  { %v1896_v0 = vrot.slane %v1895_v39, 2  ;;  %2609 = vpush %v1882_v25  ;;  %v1935_v6 = vmul.f32 %v1928_v22, %v3657_v55  ;;  %v1915_v16 = vmul.f32 %v1912_v42, %v3589_v15 }
0x109f   :  { %v1897_v13 = vadd.f32 %v1896_v0, %v1895_v39  ;;  %v1937_v7 = vsel %vm866_vm14, %v1935_v6, 0.0  ;;  %v1917_v31 = vsel %vm868_vm15, %v1915_v16, 0.0 }
0x10a0   :  { %v1933_v21 = vpop.permute.xlu1 %1932  ;;  %v1918_v56 = vadd.f32 %v1917_v31, %v1916_v20 }
0x10a1   :  { %v1898_v12 = vrot.slane %v1897_v13, 1  ;;  %v1936_v33 = vmul.f32 %v1933_v21, %v3659_v57 }
0x10a2   :  { %v1919_v36 = vrot.slane %v1918_v56, 4 }
0x10a3   :  { %v1899_v54 = vadd.f32 %v1898_v12, %v1897_v13  ;;  %v1938_v30 = vsel %vm868_vm15, %v1936_v33, 0.0 }
0x10a4   :  { %v1939_v38 = vadd.f32 %v1938_v30, %v1937_v7  ;;  %v1920_v62 = vadd.f32 %v1919_v36, %v1918_v56 }
0x10a5   :  { %2611 = vpush %v1899_v54 }
0x10a6   :  { %v1940_v10 = vrot.slane %v1939_v38, 4  ;;  %v1921_v34 = vrot.slane %v1920_v62, 2 }
0x10a8   :  { %v1941_v26 = vadd.f32 %v1940_v10, %v1939_v38  ;;  %v1922_v35 = vadd.f32 %v1921_v34, %v1920_v62 }
0x10aa   :  { %v1942_v49 = vrot.slane %v1941_v26, 2  ;;  %v1923_v40 = vrot.slane %v1922_v35, 1 }
0x10ac   :  { %v1943_v18 = vadd.f32 %v1942_v49, %v1941_v26  ;;  %v1924_v44 = vadd.f32 %v1923_v40, %v1922_v35 }
0x10ae   :  { %v1944_v37 = vrot.slane %v1943_v18, 1 }
0x10b0   :  { %v1945_v41 = vadd.f32 %v1944_v37, %v1943_v18 }
0x10b2   :  { %v1946_v52 = vadd.f32 %v1945_v41, %v1924_v44 }
0x10ce   :  { %s2610_s20 = spop %2609 }
0x10cf   :  { %v1884_v43 = vstv %s2610_s20 }
0x10d6   :  { %s2612_s5 = spop %2611 }
0x10d7   :  { %v1901_v50 = vstv %s2612_s5 }
0x10d8   :  { %v1902_v60 = vadd.f32 %v1901_v50, %v1884_v43 }
0x10da   :  { %v1903_v23 = vmul.f32 0.5, %v1902_v60 }
0x10dc   :  { %vm1947_vm13 = vcmp.lt.f32.partialorder %v1946_v52, %v1903_v23 }
0x10dd   :  { %v2557_v1 = vsel %vm1947_vm13, 1.0, %v2869_v59 }
0x10de   :  { %v1950_v4 = vsel %vm989_vm5, %v2557_v1, 0.0  ;;  %v1962_v3 = vmul.f32 %v2557_v1, %v3585_v14  ;;  %v1963_v51 = vmul.f32 %v2557_v1, %v3589_v15  ;;  %v1971_v9 = vmul.f32 %v2557_v1, %v3659_v57 }
0x10df   :  { %1951 = vadd.xlane.f32.xlu0 %v1950_v4  ;;  %v1970_v27 = vmul.f32 %v2557_v1, %v3657_v55 }
0x10e0   :  { %v1964_v32 = vsel %vm866_vm14, %v1962_v3, 0.0  ;;  %v1967_v29 = vsel %vm868_vm15, %v1963_v51, 0.0  ;;  %v1975_v58 = vsel %vm868_vm15, %v1971_v9, 0.0 }
0x10e1   :  { %1965 = vadd.xlane.f32.xlu1 %v1964_v32  ;;  %v1972_v19 = vsel %vm866_vm14, %v1970_v27, 0.0 }
0x10e3   :  { %1968 = vadd.xlane.f32.xlu0 %v1967_v29 }
0x10e5   :  { %1976 = vadd.xlane.f32.xlu1 %v1975_v58 }
0x10e7   :  { %1973 = vadd.xlane.f32.xlu0 %v1972_v19 }
0x116c   :  { %v1952_v39 = vpop.xlane.xlu0 %1951 }
0x116d   :  { %v1953_v25 = vrot.slane %v1952_v39, 4 }
0x116e   :  { %v1966_v22 = vpop.xlane.xlu1 %1965 }
0x116f   :  { %v1954_v0 = vadd.f32 %v1953_v25, %v1952_v39  ;;  %v1978_v62 = vsub.f32 %v3728_v45, %v1966_v22 }
0x1170   :  { %v1969_v33 = vpop.xlane.xlu0 %1968 }
0x1171   :  { %v1955_v13 = vrot.slane %v1954_v0, 2  ;;  %v1979_v49 = vsub.f32 %v3730_v46, %v1969_v33 }
0x1172   :  { %v1977_v30 = vpop.xlane.xlu1 %1976 }
0x1173   :  { %v1956_v12 = vadd.f32 %v1955_v13, %v1954_v0  ;;  %v1981_v18 = vsub.f32 %v3736_v2, %v1977_v30 }
0x1174   :  { %v1974_v7 = vpop.xlane.xlu0 %1973 }
0x1175   :  { %v1957_v54 = vrot.slane %v1956_v12, 1 }
0x1177   :  { %v1958_v42 = vadd.f32 %v1957_v54, %v1956_v12 }
0x1179   :  { %2613 = vpush %v1958_v42 }
0x11aa   :  { %s2614_s7 = spop %2613 }
0x11ab   :  { %v1960_v17 = vstv %s2614_s7 }
0x11ac   :  { %v1982_v21 = vmax.f32 %v1960_v17, 1.0  ;;  %vm1987_vm2 = vcmp.gt.f32.partialorder %v1960_v17, 0.0 }
0x11ae   :  { %2716 = vrcp.f32 %v1982_v21 }
0x11b8   :  { %v2717_v6 = vpop.eup %2716 }
0x11b9   :  { %v1998_v16 = vmul.f32 %v2717_v6, %v1966_v22  ;;  %v1999_v8 = vmul.f32 %v2717_v6, %v1969_v33  ;;  %v2005_v20 = vmul.f32 %v2717_v6, %v1977_v30  ;;  %v2004_v56 = vmul.f32 %v2717_v6, %v1974_v7 }
0x11bb   :  { %v4149_v31 = vsel %vm1987_vm2, %v1998_v16, %v4074_v63  ;;  %v4152_v38 = vsel %vm1987_vm2, %v1999_v8, %v4071_v48  ;;  %v4159_v10 = vsel %vm1987_vm2, %v2005_v20, %v4086_v61  ;;  %v4162_v36 = vsel %vm1987_vm2, %v2004_v56, %v4081_v11 }
0x11bc   :  { %2010 = vrot.lane.b32.xlu0 %v4149_v31, %s2867_s29  ;;  %2012 = vrot.lane.b32.xlu1 %v4152_v38, %s2867_s29  ;;  %v1961_v48 = vsub.f32 100.0, %v1960_v17  ;;  %v1980_v11 = vsub.f32 %v3734_v53, %v1974_v7 }
0x11be   :  { %v1984_v63 = vmax.f32 %v1961_v48, 1.0  ;;  %vm1986_vm3 = vcmp.gt.f32.partialorder %v1961_v48, 0.0 }
0x11c0   :  { %2022 = vrot.lane.b32.xlu0 %v4159_v10, %s2867_s29  ;;  %2020 = vrot.lane.b32.xlu1 %v4162_v36, %s2867_s29  ;;  %2718 = vrcp.f32 %v1984_v63 }
0x11ca   :  { %v2719_v26 = vpop.eup %2718 }
0x11cb   :  { %v1989_v34 = vmul.f32 %v2719_v26, %v1979_v49  ;;  %v1988_v61 = vmul.f32 %v2719_v26, %v1978_v62  ;;  %v1994_v43 = vmul.f32 %v2719_v26, %v1980_v11  ;;  %v1995_v50 = vmul.f32 %v2719_v26, %v1981_v18 }
0x11cd   :  { %v4173_v37 = vsel %vm1986_vm3, %v1989_v34, %v4100_v28  ;;  %v4176_v40 = vsel %vm1986_vm3, %v1988_v61, %v4105_v5  ;;  %v4183_v28 = vsel %vm1986_vm3, %v1994_v43, %v4115_v47  ;;  %v4186_v5 = vsel %vm1986_vm3, %v1995_v50, %v4124_v24 }
0x122e   :  { %v2013_v35 = vpop.permute.xlu1 %2012  ;;  %v2011_v41 = vpop.permute.xlu0 %2010 }
0x122f   :  { %v2017_v60 = vsub.f32 %v4173_v37, %v2013_v35  ;;  %v2029_v44 = vadd.f32 %v2013_v35, %v4173_v37  ;;  %v2016_v23 = vsub.f32 %v4176_v40, %v2011_v41  ;;  %v2028_v52 = vadd.f32 %v2011_v41, %v4176_v40 }
0x1231   :  { %v2031_v1 = vmul.f32 %v2029_v44, %v2017_v60  ;;  %v2030_v4 = vmul.f32 %v2028_v52, %v2016_v23 }
0x1232   :  { %v2021_v3 = vpop.permute.xlu1 %2020  ;;  %v2023_v51 = vpop.permute.xlu0 %2022 }
0x1233   :  { %v2026_v32 = vsub.f32 %v4183_v28, %v2021_v3  ;;  %v2045_v9 = vadd.f32 %v2021_v3, %v4183_v28  ;;  %v2027_v29 = vsub.f32 %v4186_v5, %v2023_v51  ;;  %v2046_v27 = vadd.f32 %v2023_v51, %v4186_v5 }
0x1234   :  { %v2032_v58 = vsel %vm909_vm0, %v2030_v4, 0.0  ;;  %v2033_v19 = vsel %vm911_vm1, %v2031_v1, 0.0 }
0x1235   :  { %v2047_v39 = vmul.f32 %v2045_v9, %v2026_v32  ;;  %v2048_v25 = vmul.f32 %v2046_v27, %v2027_v29  ;;  %v2034_v47 = vadd.f32 %v2033_v19, %v2032_v58 }
0x1237   :  { %2035 = vadd.xlane.f32.xlu1 %v2034_v47  ;;  %v2049_v24 = vsel %vm909_vm0, %v2047_v39, 0.0  ;;  %v2050_v0 = vsel %vm911_vm1, %v2048_v25, 0.0 }
0x1238   :  { %v2051_v13 = vadd.f32 %v2050_v0, %v2049_v24 }
0x123a   :  { %2052 = vadd.xlane.f32.xlu0 %v2051_v13 }
0x1248   :  { %2071 = vperm.xlu1 %2647, %v2017_v60  }
0x124c   :  { %2087 = vperm.xlu1 %2647, %v2026_v32  }
0x1250   :  { %2066 = vperm.xlu0 %2646, %v2016_v23  }
0x1254   :  { %2092 = vperm.xlu0 %2646, %v2027_v29  }
0x12c4   :  { %v2036_v12 = vpop.xlane.xlu1 %2035 }
0x12c5   :  { %v2037_v54 = vrot.slane %v2036_v12, 4 }
0x12c7   :  { %v2038_v42 = vadd.f32 %v2037_v54, %v2036_v12  ;;  %v2053_v17 = vpop.xlane.xlu0 %2052 }
0x12c8   :  { %v2054_v21 = vrot.slane %v2053_v17, 4  ;;  %v2072_v63 = vpop.permute.xlu1 %2071 }
0x12c9   :  { %v2039_v22 = vrot.slane %v2038_v42, 2  ;;  %v2075_v18 = vmul.f32 %v2072_v63, %v3589_v15 }
0x12ca   :  { %v2055_v33 = vadd.f32 %v2054_v21, %v2053_v17 }
0x12cb   :  { %v2040_v6 = vadd.f32 %v2039_v22, %v2038_v42  ;;  %v2077_v50 = vsel %vm868_vm15, %v2075_v18, 0.0 }
0x12cc   :  { %v2056_v16 = vrot.slane %v2055_v33, 2  ;;  %v2088_v62 = vpop.permute.xlu1 %2087 }
0x12cd   :  { %v2041_v8 = vrot.slane %v2040_v6, 1  ;;  %v2095_v34 = vmul.f32 %v2088_v62, %v3657_v55 }
0x12ce   :  { %v2057_v30 = vadd.f32 %v2056_v16, %v2055_v33 }
0x12cf   :  { %v2042_v7 = vadd.f32 %v2041_v8, %v2040_v6  ;;  %v2067_v48 = vpop.permute.xlu0 %2066  ;;  %v2097_v35 = vsel %vm866_vm14, %v2095_v34, 0.0 }
0x12d0   :  { %v2058_v20 = vrot.slane %v2057_v30, 1  ;;  %v2074_v61 = vmul.f32 %v2067_v48, %v3585_v14 }
0x12d1   :  { %2615 = vpush %v2042_v7 }
0x12d2   :  { %v2059_v56 = vadd.f32 %v2058_v20, %v2057_v30  ;;  %v2076_v41 = vsel %vm866_vm14, %v2074_v61, 0.0 }
0x12d3   :  { %v2093_v26 = vpop.permute.xlu0 %2092  ;;  %v2078_v60 = vadd.f32 %v2077_v50, %v2076_v41 }
0x12d4   :  { %2617 = vpush %v2059_v56  ;;  %v2096_v49 = vmul.f32 %v2093_v26, %v3659_v57 }
0x12d5   :  { %v2079_v23 = vrot.slane %v2078_v60, 4 }
0x12d6   :  { %v2098_v11 = vsel %vm868_vm15, %v2096_v49, 0.0 }
0x12d7   :  { %v2099_v43 = vadd.f32 %v2098_v11, %v2097_v35  ;;  %v2080_v1 = vadd.f32 %v2079_v23, %v2078_v60 }
0x12d9   :  { %v2100_v44 = vrot.slane %v2099_v43, 4  ;;  %v2081_v3 = vrot.slane %v2080_v1, 2 }
0x12db   :  { %v2101_v52 = vadd.f32 %v2100_v44, %v2099_v43  ;;  %v2082_v32 = vadd.f32 %v2081_v3, %v2080_v1 }
0x12dd   :  { %v2102_v4 = vrot.slane %v2101_v52, 2  ;;  %v2083_v29 = vrot.slane %v2082_v32, 1 }
0x12df   :  { %v2103_v51 = vadd.f32 %v2102_v4, %v2101_v52  ;;  %v2084_v25 = vadd.f32 %v2083_v29, %v2082_v32 }
0x12e1   :  { %v2104_v9 = vrot.slane %v2103_v51, 1 }
0x12e3   :  { %v2105_v27 = vadd.f32 %v2104_v9, %v2103_v51 }
0x12e5   :  { %v2106_v24 = vadd.f32 %v2105_v27, %v2084_v25 }
0x1302   :  { %s2616_s26 = spop %2615 }
0x1303   :  { %v2044_v58 = vstv %s2616_s26 }
0x1305   :  { %s2618_s9 = spop %2617 }
0x1306   :  { %v2061_v19 = vstv %s2618_s9 }
0x1307   :  { %v2062_v39 = vadd.f32 %v2061_v19, %v2044_v58 }
0x1309   :  { %v2063_v47 = vmul.f32 0.5, %v2062_v39 }
0x130b   :  { %vm2107_vm4 = vcmp.lt.f32.partialorder %v2106_v24, %v2063_v47 }
0x130c   :  { %v2558_v0 = vsel %vm2107_vm4, 1.0, %v2869_v59 }
0x130d   :  { %v2110_v13 = vsel %vm989_vm5, %v2558_v0, 0.0  ;;  %v2122_v12 = vmul.f32 %v2558_v0, %v3585_v14  ;;  %v2130_v54 = vmul.f32 %v2558_v0, %v3657_v55  ;;  %v2123_v17 = vmul.f32 %v2558_v0, %v3589_v15 }
0x130e   :  { %2111 = vadd.xlane.f32.xlu1 %v2110_v13  ;;  %v2131_v33 = vmul.f32 %v2558_v0, %v3659_v57 }
0x130f   :  { %v2124_v42 = vsel %vm866_vm14, %v2122_v12, 0.0  ;;  %v2132_v21 = vsel %vm866_vm14, %v2130_v54, 0.0  ;;  %v2127_v22 = vsel %vm868_vm15, %v2123_v17, 0.0 }
0x1310   :  { %2125 = vadd.xlane.f32.xlu0 %v2124_v42  ;;  %v2135_v6 = vsel %vm868_vm15, %v2131_v33, 0.0 }
0x1312   :  { %2133 = vadd.xlane.f32.xlu1 %v2132_v21 }
0x1314   :  { %2128 = vadd.xlane.f32.xlu0 %v2127_v22 }
0x1318   :  { %2136 = vadd.xlane.f32.xlu0 %v2135_v6 }
0x139b   :  { %v2112_v16 = vpop.xlane.xlu1 %2111 }
0x139c   :  { %v2113_v8 = vrot.slane %v2112_v16, 4 }
0x139d   :  { %v2126_v62 = vpop.xlane.xlu0 %2125 }
0x139e   :  { %v2114_v30 = vadd.f32 %v2113_v8, %v2112_v16  ;;  %v2138_v1 = vsub.f32 %v3728_v45, %v2126_v62 }
0x139f   :  { %v2134_v11 = vpop.xlane.xlu1 %2133 }
0x13a0   :  { %v2115_v7 = vrot.slane %v2114_v30, 2  ;;  %v2140_v51 = vsub.f32 %v3734_v53, %v2134_v11 }
0x13a1   :  { %v2129_v34 = vpop.xlane.xlu0 %2128 }
0x13a2   :  { %v2116_v20 = vadd.f32 %v2115_v7, %v2114_v30  ;;  %v2139_v4 = vsub.f32 %v3730_v46, %v2129_v34 }
0x13a4   :  { %v2117_v56 = vrot.slane %v2116_v20, 1 }
0x13a5   :  { %v2137_v50 = vpop.xlane.xlu0 %2136 }
0x13a6   :  { %v2118_v48 = vadd.f32 %v2117_v56, %v2116_v20  ;;  %v2141_v24 = vsub.f32 %v3736_v2, %v2137_v50 }
0x13a8   :  { %2619 = vpush %v2118_v48 }
0x13d9   :  { %s2620_s24 = spop %2619 }
0x13da   :  { %v2120_v63 = vstv %s2620_s24 }
0x13db   :  { %v2142_v26 = vmax.f32 %v2120_v63, 1.0  ;;  %vm2147_vm6 = vcmp.gt.f32.partialorder %v2120_v63, 0.0 }
0x13dd   :  { %2720 = vrcp.f32 %v2142_v26 }
0x13e7   :  { %v2721_v49 = vpop.eup %2720 }
0x13e8   :  { %v2159_v61 = vmul.f32 %v2721_v49, %v2129_v34  ;;  %v2158_v18 = vmul.f32 %v2721_v49, %v2126_v62  ;;  %v2164_v43 = vmul.f32 %v2721_v49, %v2134_v11  ;;  %v2165_v44 = vmul.f32 %v2721_v49, %v2137_v50 }
0x13ea   :  { %v4215_v35 = vsel %vm2147_vm6, %v2159_v61, %v4152_v38  ;;  %v4218_v41 = vsel %vm2147_vm6, %v2158_v18, %v4149_v31  ;;  %v4225_v60 = vsel %vm2147_vm6, %v2164_v43, %v4162_v36  ;;  %v4230_v38 = vsel %vm2147_vm6, %v2165_v44, %v4159_v10 }
0x13eb   :  { %2172 = vrot.lane.b32.xlu0 %v4215_v35, %s2867_s29  ;;  %2170 = vrot.lane.b32.xlu1 %v4218_v41, %s2867_s29  ;;  %v2121_v31 = vsub.f32 100.0, %v2120_v63 }
0x13ed   :  { %v2144_v23 = vmax.f32 %v2121_v31, 1.0  ;;  %vm4237_vm7 = vcmp.gt.f32.partialorder %v2121_v31, 0.0 }
0x13ef   :  { %2180 = vrot.lane.b32.xlu1 %v4225_v60, %s2867_s29  ;;  %2722 = vrcp.f32 %v2144_v23 }
0x13f3   :  { %2182 = vrot.lane.b32.xlu1 %v4230_v38, %s2867_s29 }
0x13f9   :  { %v2723_v52 = vpop.eup %2722 }
0x13fa   :  { %v2149_v36 = vmul.f32 %v2723_v52, %v2139_v4  ;;  %v2148_v3 = vmul.f32 %v2723_v52, %v2138_v1  ;;  %v2154_v58 = vmul.f32 %v2723_v52, %v2140_v51  ;;  %v2155_v12 = vmul.f32 %v2723_v52, %v2141_v24 }
0x13fc   :  { %v4244_v9 = vsel %vm4237_vm7, %v2149_v36, %v4173_v37  ;;  %v4249_v29 = vsel %vm4237_vm7, %v2148_v3, %v4176_v40  ;;  %v4259_v13 = vsel %vm4237_vm7, %v2154_v58, %v4183_v28  ;;  %v4268_v33 = vsel %vm4237_vm7, %v2155_v12, %v4186_v5 }
0x145d   :  { %v2173_v10 = vpop.permute.xlu0 %2172  ;;  %v2171_v27 = vpop.permute.xlu1 %2170 }
0x145e   :  { %v2177_v19 = vsub.f32 %v4244_v9, %v2173_v10  ;;  %v2189_v39 = vadd.f32 %v2173_v10, %v4244_v9  ;;  %v2176_v25 = vsub.f32 %v4249_v29, %v2171_v27  ;;  %v2188_v47 = vadd.f32 %v2171_v27, %v4249_v29 }
0x1460   :  { %v2191_v0 = vmul.f32 %v2189_v39, %v2177_v19  ;;  %v2190_v37 = vmul.f32 %v2188_v47, %v2176_v25 }
0x1461   :  { %v2181_v40 = vpop.permute.xlu1 %2180 }
0x1462   :  { %v2186_v54 = vsub.f32 %v4259_v13, %v2181_v40  ;;  %v2205_v42 = vadd.f32 %v2181_v40, %v4259_v13  ;;  %v2192_v17 = vsel %vm909_vm0, %v2190_v37, 0.0  ;;  %v2193_v21 = vsel %vm911_vm1, %v2191_v0, 0.0 }
0x1463   :  { %v2194_v22 = vadd.f32 %v2193_v21, %v2192_v17 }
0x1464   :  { %v2207_v28 = vmul.f32 %v2205_v42, %v2186_v54 }
0x1465   :  { %2195 = vadd.xlane.f32.xlu0 %v2194_v22  ;;  %v2183_v6 = vpop.permute.xlu1 %2182 }
0x1466   :  { %v2187_v16 = vsub.f32 %v4268_v33, %v2183_v6  ;;  %v2206_v8 = vadd.f32 %v2183_v6, %v4268_v33  ;;  %v2209_v7 = vsel %vm909_vm0, %v2207_v28, 0.0 }
0x1468   :  { %v2208_v30 = vmul.f32 %v2206_v8, %v2187_v16 }
0x146a   :  { %v2210_v20 = vsel %vm911_vm1, %v2208_v30, 0.0 }
0x146b   :  { %v2211_v56 = vadd.f32 %v2210_v20, %v2209_v7 }
0x146d   :  { %2212 = vadd.xlane.f32.xlu1 %v2211_v56 }
0x147b   :  { %2226 = vperm.xlu0 %2646, %v2176_v25  }
0x147e   :  { %2231 = vperm.xlu1 %2647, %v2177_v19  }
0x147f   :  { %2247 = vperm.xlu0 %2646, %v2186_v54  }
0x1482   :  { %2252 = vperm.xlu1 %2647, %v2187_v16  }
0x14f2   :  { %v2196_v48 = vpop.xlane.xlu0 %2195 }
0x14f3   :  { %v2197_v5 = vrot.slane %v2196_v48, 4 }
0x14f5   :  { %v2198_v63 = vadd.f32 %v2197_v5, %v2196_v48 }
0x14f7   :  { %v2199_v26 = vrot.slane %v2198_v63, 2 }
0x14f9   :  { %v2200_v62 = vadd.f32 %v2199_v26, %v2198_v63 }
0x14fa   :  { %v2213_v49 = vpop.xlane.xlu1 %2212  ;;  %v2227_v52 = vpop.permute.xlu0 %2226 }
0x14fb   :  { %v2214_v34 = vrot.slane %v2213_v49, 4  ;;  %v2201_v61 = vrot.slane %v2200_v62, 1  ;;  %v2234_v32 = vmul.f32 %v2227_v52, %v3585_v14 }
0x14fd   :  { %v2215_v18 = vadd.f32 %v2214_v34, %v2213_v49  ;;  %v2202_v11 = vadd.f32 %v2201_v61, %v2200_v62  ;;  %v2236_v39 = vsel %vm866_vm14, %v2234_v32, 0.0 }
0x14fe   :  { %v2232_v23 = vpop.permute.xlu1 %2231  ;;  %v2248_v4 = vpop.permute.xlu0 %2247 }
0x14ff   :  { %v2216_v43 = vrot.slane %v2215_v18, 2  ;;  %2621 = vpush %v2202_v11  ;;  %v2255_v3 = vmul.f32 %v2248_v4, %v3657_v55  ;;  %v2235_v51 = vmul.f32 %v2232_v23, %v3589_v15 }
0x1501   :  { %v2217_v50 = vadd.f32 %v2216_v43, %v2215_v18  ;;  %v2257_v27 = vsel %vm866_vm14, %v2255_v3, 0.0  ;;  %v2237_v58 = vsel %vm868_vm15, %v2235_v51, 0.0 }
0x1502   :  { %v2253_v1 = vpop.permute.xlu1 %2252  ;;  %v2238_v25 = vadd.f32 %v2237_v58, %v2236_v39 }
0x1503   :  { %v2218_v44 = vrot.slane %v2217_v50, 1  ;;  %v2256_v36 = vmul.f32 %v2253_v1, %v3659_v57 }
0x1504   :  { %v2239_v24 = vrot.slane %v2238_v25, 4 }
0x1505   :  { %v2219_v31 = vadd.f32 %v2218_v44, %v2217_v50  ;;  %v2258_v10 = vsel %vm868_vm15, %v2256_v36, 0.0 }
0x1506   :  { %v2259_v19 = vadd.f32 %v2258_v10, %v2257_v27  ;;  %v2240_v37 = vadd.f32 %v2239_v24, %v2238_v25 }
0x1507   :  { %2623 = vpush %v2219_v31 }
0x1508   :  { %v2260_v47 = vrot.slane %v2259_v19, 4  ;;  %v2241_v12 = vrot.slane %v2240_v37, 2 }
0x150a   :  { %v2261_v0 = vadd.f32 %v2260_v47, %v2259_v19  ;;  %v2242_v42 = vadd.f32 %v2241_v12, %v2240_v37 }
0x150c   :  { %v2262_v40 = vrot.slane %v2261_v0, 2  ;;  %v2243_v21 = vrot.slane %v2242_v42, 1 }
0x150e   :  { %v2263_v54 = vadd.f32 %v2262_v40, %v2261_v0  ;;  %v2244_v8 = vadd.f32 %v2243_v21, %v2242_v42 }
0x1510   :  { %v2264_v17 = vrot.slane %v2263_v54, 1 }
0x1512   :  { %v2265_v22 = vadd.f32 %v2264_v17, %v2263_v54 }
0x1514   :  { %v2266_v7 = vadd.f32 %v2265_v22, %v2244_v8 }
0x1530   :  { %s2622_s6 = spop %2621 }
0x1531   :  { %v2204_v6 = vstv %s2622_s6 }
0x1538   :  { %s2624_s16 = spop %2623 }
0x1539   :  { %v2221_v28 = vstv %s2624_s16 }
0x153a   :  { %v2222_v16 = vadd.f32 %v2221_v28, %v2204_v6 }
0x153c   :  { %v2223_v30 = vmul.f32 0.5, %v2222_v16 }
0x153e   :  { %vm2267_vm8 = vcmp.lt.f32.partialorder %v2266_v7, %v2223_v30 }
0x153f   :  { %v2559_v20 = vsel %vm2267_vm8, 1.0, %v2869_v59 }
0x1540   :  { %v2270_v56 = vsel %vm989_vm5, %v2559_v20, 0.0  ;;  %v2282_v48 = vmul.f32 %v2559_v20, %v3585_v14  ;;  %v2283_v5 = vmul.f32 %v2559_v20, %v3589_v15  ;;  %v2291_v26 = vmul.f32 %v2559_v20, %v3659_v57 }
0x1541   :  { %2271 = vadd.xlane.f32.xlu0 %v2270_v56  ;;  %v2290_v49 = vmul.f32 %v2559_v20, %v3657_v55 }
0x1542   :  { %v2284_v63 = vsel %vm866_vm14, %v2282_v48, 0.0  ;;  %v2287_v62 = vsel %vm868_vm15, %v2283_v5, 0.0  ;;  %v2295_v34 = vsel %vm868_vm15, %v2291_v26, 0.0 }
0x1543   :  { %2285 = vadd.xlane.f32.xlu1 %v2284_v63  ;;  %v2292_v61 = vsel %vm866_vm14, %v2290_v49, 0.0 }
0x1545   :  { %2288 = vadd.xlane.f32.xlu0 %v2287_v62 }
0x1547   :  { %2296 = vadd.xlane.f32.xlu1 %v2295_v34 }
0x1549   :  { %2293 = vadd.xlane.f32.xlu0 %v2292_v61 }
0x15ce   :  { %v2272_v18 = vpop.xlane.xlu0 %2271 }
0x15cf   :  { %v2273_v11 = vrot.slane %v2272_v18, 4 }
0x15d0   :  { %v2286_v4 = vpop.xlane.xlu1 %2285 }
0x15d1   :  { %v2274_v43 = vadd.f32 %v2273_v11, %v2272_v18 }
0x15d2   :  { %v2289_v36 = vpop.xlane.xlu0 %2288 }
0x15d3   :  { %v2275_v50 = vrot.slane %v2274_v43, 2  ;;  %v2299_v40 = vsub.f32 %v3730_v46, %v2289_v36 }
0x15d4   :  { %v2297_v10 = vpop.xlane.xlu1 %2296 }
0x15d5   :  { %v2276_v44 = vadd.f32 %v2275_v50, %v2274_v43  ;;  %v2301_v42 = vsub.f32 %v3736_v2, %v2297_v10 }
0x15d6   :  { %v2294_v27 = vpop.xlane.xlu0 %2293 }
0x15d7   :  { %v2277_v31 = vrot.slane %v2276_v44, 1 }
0x15d9   :  { %v2278_v23 = vadd.f32 %v2277_v31, %v2276_v44 }
0x15db   :  { %2625 = vpush %v2278_v23 }
0x160c   :  { %s2626_s3 = spop %2625 }
0x160d   :  { %v2280_v52 = vstv %s2626_s3 }
0x160e   :  { %v2302_v1 = vmax.f32 %v2280_v52, 1.0  ;;  %vm2307_vm9 = vcmp.gt.f32.partialorder %v2280_v52, 0.0  ;;  %v2281_v0 = vsub.f32 100.0, %v2280_v52 }
0x1610   :  { %2724 = vrcp.f32 %v2302_v1  ;;  %v2304_v37 = vmax.f32 %v2281_v0, 1.0  ;;  %vm2306_vm10 = vcmp.gt.f32.partialorder %v2281_v0, 0.0 }
0x1612   :  { %2726 = vrcp.f32 %v2304_v37 }
0x161a   :  { %v2725_v3 = vpop.eup %2724 }
0x161b   :  { %v2318_v51 = vmul.f32 %v2725_v3, %v2286_v4  ;;  %v2319_v32 = vmul.f32 %v2725_v3, %v2289_v36  ;;  %v2325_v39 = vmul.f32 %v2725_v3, %v2297_v10  ;;  %v2324_v25 = vmul.f32 %v2725_v3, %v2294_v27 }
0x161d   :  { %v2322_v58 = vsel %vm2307_vm9, %v2318_v51, %v4218_v41  ;;  %v2323_v19 = vsel %vm2307_vm9, %v2319_v32, %v4215_v35  ;;  %v2327_v47 = vsel %vm2307_vm9, %v2325_v39, %v4230_v38  ;;  %v2326_v24 = vsel %vm2307_vm9, %v2324_v25, %v4225_v60  ;;  %v2727_v41 = vpop.eup %2726 }
0x161e   :  { %2330 = vrot.lane.b32.xlu0 %v2322_v58, %s2867_s29  ;;  %2332 = vrot.lane.b32.xlu1 %v2323_v19, %s2867_s29  ;;  %v2298_v35 = vsub.f32 %v3728_v45, %v2286_v4  ;;  %v2309_v12 = vmul.f32 %v2727_v41, %v2299_v40  ;;  %v2300_v38 = vsub.f32 %v3734_v53, %v2294_v27 }
0x161f   :  { %v2315_v28 = vmul.f32 %v2727_v41, %v2301_v42 }
0x1620   :  { %v2308_v54 = vmul.f32 %v2727_v41, %v2298_v35  ;;  %v2313_v17 = vsel %vm2306_vm10, %v2309_v12, %v4244_v9  ;;  %v2314_v6 = vmul.f32 %v2727_v41, %v2300_v38 }
0x1621   :  { %v2317_v53 = vsel %vm2306_vm10, %v2315_v28, %v4268_v33 }
0x1622   :  { %2342 = vrot.lane.b32.xlu0 %v2327_v47, %s2867_s29  ;;  %2340 = vrot.lane.b32.xlu1 %v2326_v24, %s2867_s29  ;;  %v2312_v21 = vsel %vm2306_vm10, %v2308_v54, %v4249_v29  ;;  %v2316_v2 = vsel %vm2306_vm10, %v2314_v6, %v4259_v13 }
0x1690   :  { %v2333_v60 = vpop.permute.xlu1 %2332  ;;  %v2331_v22 = vpop.permute.xlu0 %2330 }
0x1691   :  { %v2337_v16 = vsub.f32 %v2313_v17, %v2333_v60  ;;  %v2349_v8 = vadd.f32 %v2333_v60, %v2313_v17  ;;  %v2336_v45 = vsub.f32 %v2312_v21, %v2331_v22  ;;  %v2348_v30 = vadd.f32 %v2331_v22, %v2312_v21 }
0x1693   :  { %v2351_v46 = vmul.f32 %v2349_v8, %v2337_v16  ;;  %v2350_v7 = vmul.f32 %v2348_v30, %v2336_v45 }
0x1694   :  { %v2341_v20 = vpop.permute.xlu1 %2340  ;;  %v2343_v56 = vpop.permute.xlu0 %2342 }
0x1695   :  { %v2346_v48 = vsub.f32 %v2316_v2, %v2341_v20  ;;  %v2365_v5 = vadd.f32 %v2341_v20, %v2316_v2  ;;  %v2347_v9 = vsub.f32 %v2317_v53, %v2343_v56  ;;  %v2366_v63 = vadd.f32 %v2343_v56, %v2317_v53 }
0x1696   :  { %v2352_v29 = vsel %vm909_vm0, %v2350_v7, 0.0  ;;  %v2353_v26 = vsel %vm911_vm1, %v2351_v46, 0.0 }
0x1697   :  { %v2367_v62 = vmul.f32 %v2365_v5, %v2346_v48  ;;  %v2368_v49 = vmul.f32 %v2366_v63, %v2347_v9  ;;  %v2354_v34 = vadd.f32 %v2353_v26, %v2352_v29 }
0x1699   :  { %2355 = vadd.xlane.f32.xlu1 %v2354_v34  ;;  %v2369_v61 = vsel %vm909_vm0, %v2367_v62, 0.0  ;;  %v2370_v18 = vsel %vm911_vm1, %v2368_v49, 0.0 }
0x169a   :  { %v2371_v13 = vadd.f32 %v2370_v18, %v2369_v61 }
0x169c   :  { %2372 = vadd.xlane.f32.xlu0 %v2371_v13 }
0x16aa   :  { %2391 = vperm.xlu1 %2647, %v2337_v16  }
0x16ae   :  { %2407 = vperm.xlu1 %2647, %v2346_v48  }
0x16b2   :  { %2386 = vperm.xlu0 %2646, %v2336_v45  }
0x16b6   :  { %2412 = vperm.xlu0 %2646, %v2347_v9  }
0x1726   :  { %v2356_v33 = vpop.xlane.xlu1 %2355 }
0x1727   :  { %v2357_v11 = vrot.slane %v2356_v33, 4 }
0x1729   :  { %v2358_v43 = vadd.f32 %v2357_v11, %v2356_v33  ;;  %v2373_v50 = vpop.xlane.xlu0 %2372 }
0x172a   :  { %v2374_v44 = vrot.slane %v2373_v50, 4  ;;  %v2392_v27 = vpop.permute.xlu1 %2391 }
0x172b   :  { %v2359_v31 = vrot.slane %v2358_v43, 2  ;;  %v2395_v24 = vmul.f32 %v2392_v27, %v3589_v15 }
0x172c   :  { %v2375_v23 = vadd.f32 %v2374_v44, %v2373_v50 }
0x172d   :  { %v2360_v52 = vadd.f32 %v2359_v31, %v2358_v43  ;;  %v2397_v40 = vsel %vm868_vm15, %v2395_v24, 0.0 }
0x172e   :  { %v2376_v1 = vrot.slane %v2375_v23, 2  ;;  %v2408_v19 = vpop.permute.xlu1 %2407 }
0x172f   :  { %v2361_v4 = vrot.slane %v2360_v52, 1  ;;  %v2415_v25 = vmul.f32 %v2408_v19, %v3657_v55 }
0x1730   :  { %v2377_v36 = vadd.f32 %v2376_v1, %v2375_v23 }
0x1731   :  { %v2362_v3 = vadd.f32 %v2361_v4, %v2360_v52  ;;  %v2387_v10 = vpop.permute.xlu0 %2386  ;;  %v2417_v37 = vsel %vm866_vm14, %v2415_v25, 0.0 }
0x1732   :  { %v2378_v51 = vrot.slane %v2377_v36, 1  ;;  %v2394_v47 = vmul.f32 %v2387_v10, %v3585_v14 }
0x1733   :  { %2627 = vpush %v2362_v3 }
0x1734   :  { %v2379_v32 = vadd.f32 %v2378_v51, %v2377_v36  ;;  %v2396_v41 = vsel %vm866_vm14, %v2394_v47, 0.0 }
0x1735   :  { %v2413_v58 = vpop.permute.xlu0 %2412  ;;  %v2398_v12 = vadd.f32 %v2397_v40, %v2396_v41 }
0x1736   :  { %2629 = vpush %v2379_v32  ;;  %v2416_v39 = vmul.f32 %v2413_v58, %v3659_v57 }
0x1737   :  { %v2399_v42 = vrot.slane %v2398_v12, 4 }
0x1738   :  { %v2418_v0 = vsel %vm868_vm15, %v2416_v39, 0.0 }
0x1739   :  { %v2419_v35 = vadd.f32 %v2418_v0, %v2417_v37  ;;  %v2400_v57 = vadd.f32 %v2399_v42, %v2398_v12 }
0x173b   :  { %v2420_v54 = vrot.slane %v2419_v35, 4  ;;  %v2401_v55 = vrot.slane %v2400_v57, 2 }
0x173d   :  { %v2421_v38 = vadd.f32 %v2420_v54, %v2419_v35  ;;  %v2402_v14 = vadd.f32 %v2401_v55, %v2400_v57 }
0x173f   :  { %v2422_v60 = vrot.slane %v2421_v38, 2  ;;  %v2403_v15 = vrot.slane %v2402_v14, 1 }
0x1741   :  { %v2423_v17 = vadd.f32 %v2422_v60, %v2421_v38  ;;  %v2404_v8 = vadd.f32 %v2403_v15, %v2402_v14 }
0x1743   :  { %v2424_v21 = vrot.slane %v2423_v17, 1 }
0x1745   :  { %v2425_v22 = vadd.f32 %v2424_v21, %v2423_v17 }
0x1747   :  { %v2426_v30 = vadd.f32 %v2425_v22, %v2404_v8 }
0x1764   :  { %s2628_s29 = spop %2627 }
0x1765   :  { %v2364_v6 = vstv %s2628_s29 }
0x1767   :  { %s2630_s14 = spop %2629 }
0x1768   :  { %v2381_v28 = vstv %s2630_s14 }
0x1769   :  { %v2382_v16 = vadd.f32 %v2381_v28, %v2364_v6 }
0x176b   :  { %v2383_v45 = vmul.f32 0.5, %v2382_v16 }
0x176d   :  { %vm2427_vm14 = vcmp.lt.f32.partialorder %v2426_v30, %v2383_v45 }
0x176e   :  { %v2560_v46 = vsel %vm2427_vm14, 1.0, %v2869_v59 }
0x176f   :  { %v2631_v7 = vtrunc.f32 %v2560_v46 }
0x1771   :  { %v2632_v20 = vcvt.f32.s32 %v2631_v7 }
0x1773   :  { %2431 = vst.msk [vmem:[#allocation18] sm:$0x1] %vm989_vm5, %v2632_v20 }
0x1774   :  { %2835 = shalt.err (!%p2832_p2)
}
0x1775   :  { %s4373_s8 = sld [smem:[#allocation28_spill]] }
0x177b   :  { %s2836_s17 = scalar_lea.hbm %s4373_s8, 16 }
0x177c   :  { %p2837_p3 = scmp.ne.s32.totalorder %s4373_s8, %s2836_s17  ;;  %p2840_p4 = scmp.lt.u32.totalorder %s2836_s17, %s4373_s8 }
0x177e   :  { %p2842_p5 = pnand %p2840_p4, %p2837_p3 }
0x1780   :  { %2845 = shalt.err (!%p2842_p5)
}
0x1781   :  { %2443 = dma.vmem_to_hbm [thread:$0]  %s2441_s1, 16, %s4373_s8, [#allocation5]  }
0x1782   :  { %2856 = dma.done.wait [#allocation5], 16  }
0x1783   :  { %2857 = vsyncadd [#allocation5], 4294967280 }
0x1784   :  { %2449 = vsyncpa [#allocation5], 1 }
0x1785   :  { %2450 = vsyncpa [#allocation6], 1 }
0x1786   :  { %2451 = vsyncpa [#allocation8], 1 }
0x1787   :  { %2452 = vsyncpa [#allocation11], 1 }
0x1788   :  { %2453 = vsyncpa [#allocation14], 1 }
0x1789   :  { %2454 = vsyncpa [#allocation17], 1 }

</bundles_post_ra>
